<compile_context>
chip_gen: v6e
topology: v6e:2x2x1
jax: 0.10.0
libtpu: 0.0.40
codegen_flags: <defaults>
</compile_context>

<pallas_src>
import jax
import jax.numpy as jnp
from jax import lax
from jax.experimental import pallas as pl
from jax.experimental.pallas import tpu as pltpu

EPS_BN = 1e-5


def _softplus(x):
    # PyTorch Softplus(beta=1, threshold=20)
    return jnp.where(x > 20.0, x, jnp.log1p(jnp.exp(jnp.minimum(x, 20.0))))


def variance_kernel(x_ref, w1_ref, t1_ref, w2_ref, t2_ref, wfc_ref, bfc_ref, o_ref):
    x = x_ref[...]                      # (tb, Cin*T), batch on sublanes, col = c*T + t
    wdt = w2_ref.dtype                  # matmul dtype (f32 or bf16)

    # conv1 + BN + ReLU: both output positions in ONE matmul against the fused
    # (2*F1, Cin*T) slab.  Contracting the last dim of both operands keeps the
    # (tb, Cin*T) -> (Cin*T, tb) flip on-chip (no HBM transpose pre-pass).
    h1 = lax.dot_general(w1_ref[...], x, (((1,), (1,)), ((), ())),
                         preferred_element_type=jnp.float32)       # (2*F1, tb)
    h1 = jnp.maximum(h1 + t1_ref[...], 0.0)                        # BN scale already in w1

    # conv2 + BN + ReLU: single K = 2*F1 matmul on the already-stacked h1.
    h2 = jnp.dot(w2_ref[...], h1.astype(wdt),
                 preferred_element_type=jnp.float32)               # (F2, tb)
    h2 = jnp.maximum(h2 + t2_ref[...], 0.0)

    # fc -> lane-dense (1, tb); Softplus + 1e-6.
    y = jnp.dot(wfc_ref[...], h2.astype(wdt),
                preferred_element_type=jnp.float32) + bfc_ref[...]
    o_ref[...] = _softplus(y) + 1e-6


def variance_model(x_ncl, folded_params, *, tb=2048, use_bf16=False):
    """x_ncl: (B, C_in, T) float32, PyTorch NCL layout. Returns (B, 1)."""
    w1, t1, w2, t2, wfc, bfc = folded_params
    B, Cin, T = x_ncl.shape
    assert T == 3, "fc layer sizing assumes time_steps == 3"
    assert w1.shape[1] == Cin * T
    f1x2 = w1.shape[0]      # 2 * num_filters
    f2 = w2.shape[0]        # num_filters * 2

    # Batch tile: multiple of 128 (lane-dense output blocks).  Clamp so the grid
    # has >= 2 steps whenever B > 128 -- v7x shards the "parallel" axis across
    # its 2 TensorCores and a 1-step grid would idle one of them.
    tb = max(128, (int(tb) // 128) * 128)
    if B > 128:
        tb = min(tb, ((B + 1) // 2 + 127) // 128 * 128)
    B_pad = pl.cdiv(B, tb) * tb
    grid = (B_pad // tb,)

    # (B, Cin, T) -> (B, Cin*T) is a free row-major reshape (col index = c*T + t);
    # no standalone HBM transpose pass.  Padded batch rows are zeros and flow
    # through ReLU/Softplus harmlessly; they are sliced off below.
    x2d = x_ncl.reshape(B, Cin * T)
    if B_pad != B:
        x2d = jnp.pad(x2d, ((0, B_pad - B), (0, 0)))

    if use_bf16:
        # bf16 matmuls: single-pass MXU + half the x HBM traffic.  Shifts/bias
        # stay f32 (added to the f32 accumulator).  Not bit-matching the f32 ref.
        x2d = x2d.astype(jnp.bfloat16)
        w1 = w1.astype(jnp.bfloat16)
        w2 = w2.astype(jnp.bfloat16)
        wfc = wfc.astype(jnp.bfloat16)

    itemsize = jnp.dtype(x2d.dtype).itemsize
    flops_per_row = 2 * (f1x2 * Cin * T + f2 * f1x2 + f2)
    weight_bytes = sum(int(a.size) * jnp.dtype(a.dtype).itemsize
                       for a in (w1, t1, w2, t2, wfc, bfc))
    cost = pl.CostEstimate(
        flops=int(flops_per_row) * int(B_pad),
        transcendentals=int(B_pad),
        bytes_accessed=int(x2d.size) * itemsize + 4 * int(B_pad) + weight_bytes)

    # Rough per-step VMEM footprint (bytes): double-buffered x block (lane-padded
    # to 128), double-buffered out block, x^T relayout, h1/h2 + temporaries.
    est_vmem = 4 * tb * (2 * 128 + 2 * 8 + 16 + 3 * f1x2 + 3 * f2)
    cp_kwargs = dict(dimension_semantics=("parallel",))
    if est_vmem > (14 << 20):
        # v5e's scoped-VMEM default is only 16 MiB; raise it explicitly for very
        # large tb (cap at 64 MiB = v7x physical VMEM per TensorCore).
        cp_kwargs["vmem_limit_bytes"] = int(min(2 * est_vmem, 64 << 20))

    out = pl.pallas_call(
        variance_kernel,
        out_shape=jax.ShapeDtypeStruct((1, B_pad), jnp.float32),
        grid_spec=pl.GridSpec(
            grid=grid,
            in_specs=[
                # If a profile ever shows exposed x-DMA waits, add
                # pipeline_mode=pl.Buffered(3) to this one spec only.
                pl.BlockSpec((tb, Cin * T), lambda i: (i, 0)),
                pl.BlockSpec(w1.shape, lambda i: (0, 0)),
                pl.BlockSpec(t1.shape, lambda i: (0, 0)),
                pl.BlockSpec(w2.shape, lambda i: (0, 0)),
                pl.BlockSpec(t2.shape, lambda i: (0, 0)),
                pl.BlockSpec(wfc.shape, lambda i: (0, 0)),
                pl.BlockSpec(bfc.shape, lambda i: (0, 0)),
            ],
            out_specs=pl.BlockSpec((1, tb), lambda i: (0, i)),
        ),
        compiler_params=pltpu.CompilerParams(**cp_kwargs),
        cost_estimate=cost,
    )(x2d, w1, t1, w2, t2, wfc, bfc)

    return out[0, :B].reshape(B, 1)


def make_params(key, input_channels=4, num_filters=32, time_steps=3):
    """Deterministic synthetic parameters matching the PyTorch module shapes."""
    assert time_steps == 3
    f1, f2 = num_filters, num_filters * 2
    cin = input_channels
    ks = jax.random.split(key, 14)
    W1 = jax.random.normal(ks[0], (f1, cin, 2), jnp.float32) * 0.2
    b1 = jax.random.normal(ks[1], (f1,), jnp.float32) * 0.1
    g1 = 1.0 + 0.1 * jax.random.normal(ks[2], (f1,), jnp.float32)
    be1 = 0.1 * jax.random.normal(ks[3], (f1,), jnp.float32)
    m1 = 0.05 * jax.random.normal(ks[4], (f1,), jnp.float32)
    v1 = 1.0 + 0.1 * jax.random.uniform(ks[5], (f1,), jnp.float32)

    W2 = jax.random.normal(ks[6], (f2, f1, 2), jnp.float32) * 0.1
    b2 = jax.random.normal(ks[7], (f2,), jnp.float32) * 0.1
    g2 = 1.0 + 0.1 * jax.random.normal(ks[8], (f2,), jnp.float32)
    be2 = 0.1 * jax.random.normal(ks[9], (f2,), jnp.float32)
    m2 = 0.05 * jax.random.normal(ks[10], (f2,), jnp.float32)
    v2 = 1.0 + 0.1 * jax.random.uniform(ks[11], (f2,), jnp.float32)

    Wfc = jax.random.normal(ks[12], (1, f2 * (time_steps - 2)), jnp.float32) * 0.1
    bfc = jax.random.normal(ks[13], (1,), jnp.float32) * 0.1

    raw = (W1, b1, g1, be1, m1, v1, W2, b2, g2, be2, m2, v2, Wfc, bfc)

    # ---- Eval-mode folding ----------------------------------------------------
    sc1 = g1 / jnp.sqrt(v1 + EPS_BN)
    sh1 = (b1 - m1) * sc1 + be1
    sc2 = g2 / jnp.sqrt(v2 + EPS_BN)
    sh2 = (b2 - m2) * sc2 + be2

    # Fold BN scale directly into the conv weights (exact algebra: the scale
    # commutes through the matmul; ReLU comes after the shift).
    W1s = W1 * sc1[:, None, None]           # (F1, Cin, 2)
    W2s = W2 * sc2[:, None, None]           # (F2, F1, 2)

    # Fused conv1 slab (2*F1, Cin*T): rows 0..F1-1 = output position 0 (taps at
    # t=0,1), rows F1..2F1-1 = output position 1 (taps at t=1,2); column index
    # = c*T + t to match x.reshape(B, Cin*T).  One matmul yields h1 pre-stacked.
    zcol = jnp.zeros((f1, cin, 1), jnp.float32)
    w1big = jnp.concatenate(
        [jnp.concatenate([W1s, zcol], axis=2),
         jnp.concatenate([zcol, W1s], axis=2)], axis=0
    ).reshape(2 * f1, cin * time_steps)
    t1big = jnp.concatenate([sh1, sh1])[:, None]          # (2*F1, 1)

    # conv2 slab (F2, 2*F1): column index = k*F1 + c, matching stacked h1 rows.
    w2big = jnp.transpose(W2s, (0, 2, 1)).reshape(f2, 2 * f1)
    t2col = sh2[:, None]                                  # (F2, 1)

    folded = (w1big, t1big, w2big, t2col, Wfc, bfc.reshape(1, 1))
    return raw, folded


def reference_forward(x_ncl, raw):
    """Pure-JAX reference with the original (unfolded) parameterization."""
    (W1, b1, g1, be1, m1, v1, W2, b2, g2, be2, m2, v2, Wfc, bfc) = raw

    def conv1d_k2(x, W, b):  # x: (B, C, T), W: (F, C, 2)
        Tout = x.shape[2] - 1
        outs = [jnp.einsum('fck,bck->bf', W, x[:, :, t:t + 2]) for t in range(Tout)]
        return jnp.stack(outs, axis=2) + b[None, :, None]

    def bn(x, g, be, m, v):
        return (x - m[None, :, None]) / jnp.sqrt(v[None, :, None] + EPS_BN) \
            * g[None, :, None] + be[None, :, None]

    h1 = jax.nn.relu(bn(conv1d_k2(x_ncl, W1, b1), g1, be1, m1, v1))
    h2 = jax.nn.relu(bn(conv1d_k2(h1, W2, b2), g2, be2, m2, v2))
    flat = h2.reshape(h2.shape[0], -1)
    y = flat @ Wfc.T + bfc[None, :]
    return jax.nn.softplus(y) + 1e-6


if __name__ == "__main__":
    key = jax.random.PRNGKey(0)
    kx, kp = jax.random.split(key)

    # Small model; batch large enough to exercise padding and >= 2 grid steps
    # (so both v7x TensorCores get work), but still tiny (4000 x 12 floats).
    B, Cin, T, F1 = 4000, 4, 3, 32
    x = jax.random.normal(kx, (B, Cin, T), jnp.float32)   # PyTorch NCL input

    raw, folded = make_params(kp, input_channels=Cin, num_filters=F1, time_steps=T)

    out = jax.block_until_ready(variance_model(x, folded))   # f32 path, tb=2048
    ref = reference_forward(x, raw)

    assert out.shape == (B, 1)
    assert jnp.allclose(out, ref, atol=1e-5, rtol=1e-5), \
        float(jnp.max(jnp.abs(out - ref)))

    print("KERNEL_OK")
</pallas_src>

<mosaic_0001>
module attributes {stable_mosaic.version = 11 : i64} {
  func.func @variance_kernel(%arg0: i32, %arg1: memref<2048x12xf32, #tpu.memory_space<vmem>>, %arg2: memref<64x12xf32, #tpu.memory_space<vmem>>, %arg3: memref<64x1xf32, #tpu.memory_space<vmem>>, %arg4: memref<64x64xf32, #tpu.memory_space<vmem>>, %arg5: memref<64x1xf32, #tpu.memory_space<vmem>>, %arg6: memref<1x64xf32, #tpu.memory_space<vmem>>, %arg7: memref<1x1xf32, #tpu.memory_space<vmem>>, %arg8: memref<1x2048xf32, #tpu.memory_space<vmem>>) attributes {dimension_semantics = [#tpu.dimension_semantics<parallel>], iteration_bounds = array<i64: 2>, scalar_prefetch = 0 : i64, scratch_operands = 0 : i64, tpu.core_type = #tpu.core_type<tc>, window_params = [{transform_indices = @transform_0, window_bounds = array<i64: 2048, 12>}, {pipeline_mode = #tpu.pipeline_mode<synchronous>, transform_indices = @transform_1, window_bounds = array<i64: 64, 12>}, {pipeline_mode = #tpu.pipeline_mode<synchronous>, transform_indices = @transform_2, window_bounds = array<i64: 64, 1>}, {pipeline_mode = #tpu.pipeline_mode<synchronous>, transform_indices = @transform_3, window_bounds = array<i64: 64, 64>}, {pipeline_mode = #tpu.pipeline_mode<synchronous>, transform_indices = @transform_4, window_bounds = array<i64: 64, 1>}, {pipeline_mode = #tpu.pipeline_mode<synchronous>, transform_indices = @transform_5, window_bounds = array<i64: 1, 64>}, {pipeline_mode = #tpu.pipeline_mode<synchronous>, transform_indices = @transform_6, window_bounds = array<i64: 1, 1>}, {transform_indices = @transform_7, window_bounds = array<i64: 1, 2048>}]} {
    %c0 = arith.constant 0 : index
    %c0_0 = arith.constant 0 : index
    %0 = vector.load %arg1[%c0, %c0_0] : memref<2048x12xf32, #tpu.memory_space<vmem>>, vector<2048x12xf32>
    %c0_1 = arith.constant 0 : index
    %c0_2 = arith.constant 0 : index
    %1 = vector.load %arg2[%c0_1, %c0_2] : memref<64x12xf32, #tpu.memory_space<vmem>>, vector<64x12xf32>
    %cst = arith.constant dense<0.000000e+00> : vector<64x2048xf32>
    %2 = tpu.matmul %1, %0, %cst {dimension_numbers = #tpu.dot_dimension_numbers<[1], [1], [0], [0], [0, 0, 1, 0], [], []>} : vector<64x12xf32>, vector<2048x12xf32>, vector<64x2048xf32> -> vector<64x2048xf32>
    %c0_3 = arith.constant 0 : index
    %c0_4 = arith.constant 0 : index
    %3 = vector.load %arg3[%c0_3, %c0_4] : memref<64x1xf32, #tpu.memory_space<vmem>>, vector<64x1xf32>
    %4 = vector.broadcast %3 : vector<64x1xf32> to vector<64x2048xf32>
    %5 = arith.addf %2, %4 : vector<64x2048xf32>
    %cst_5 = arith.constant 0.000000e+00 : f32
    %6 = vector.broadcast %cst_5 : f32 to vector<64x2048xf32>
    %7 = arith.maximumf %5, %6 : vector<64x2048xf32>
    %c0_6 = arith.constant 0 : index
    %c0_7 = arith.constant 0 : index
    %8 = vector.load %arg4[%c0_6, %c0_7] : memref<64x64xf32, #tpu.memory_space<vmem>>, vector<64x64xf32>
    %cst_8 = arith.constant dense<0.000000e+00> : vector<64x2048xf32>
    %9 = tpu.matmul %8, %7, %cst_8 {dimension_numbers = #tpu.dot_dimension_numbers<[1], [0], [0], [1], [0, 0, 1, 1], [], []>} : vector<64x64xf32>, vector<64x2048xf32>, vector<64x2048xf32> -> vector<64x2048xf32>
    %c0_9 = arith.constant 0 : index
    %c0_10 = arith.constant 0 : index
    %10 = vector.load %arg5[%c0_9, %c0_10] : memref<64x1xf32, #tpu.memory_space<vmem>>, vector<64x1xf32>
    %11 = vector.broadcast %10 : vector<64x1xf32> to vector<64x2048xf32>
    %12 = arith.addf %9, %11 : vector<64x2048xf32>
    %cst_11 = arith.constant 0.000000e+00 : f32
    %13 = vector.broadcast %cst_11 : f32 to vector<64x2048xf32>
    %14 = arith.maximumf %12, %13 : vector<64x2048xf32>
    %c0_12 = arith.constant 0 : index
    %c0_13 = arith.constant 0 : index
    %15 = vector.load %arg6[%c0_12, %c0_13] : memref<1x64xf32, #tpu.memory_space<vmem>>, vector<1x64xf32>
    %cst_14 = arith.constant dense<0.000000e+00> : vector<1x2048xf32>
    %16 = tpu.matmul %15, %14, %cst_14 {dimension_numbers = #tpu.dot_dimension_numbers<[1], [0], [0], [1], [0, 0, 1, 1], [], []>} : vector<1x64xf32>, vector<64x2048xf32>, vector<1x2048xf32> -> vector<1x2048xf32>
    %c0_15 = arith.constant 0 : index
    %c0_16 = arith.constant 0 : index
    %17 = vector.load %arg7[%c0_15, %c0_16] : memref<1x1xf32, #tpu.memory_space<vmem>>, vector<1x1xf32>
    %18 = vector.broadcast %17 : vector<1x1xf32> to vector<1x2048xf32>
    %19 = arith.addf %16, %18 : vector<1x2048xf32>
    %cst_17 = arith.constant 2.000000e+01 : f32
    %20 = vector.broadcast %cst_17 : f32 to vector<1x2048xf32>
    %21 = arith.cmpf ogt, %19, %20 : vector<1x2048xf32>
    %cst_18 = arith.constant 2.000000e+01 : f32
    %22 = vector.broadcast %cst_18 : f32 to vector<1x2048xf32>
    %23 = arith.minimumf %19, %22 : vector<1x2048xf32>
    %24 = math.exp %23 : vector<1x2048xf32>
    %25 = math.log1p %24 : vector<1x2048xf32>
    %26 = arith.select %21, %19, %25 : vector<1x2048xi1>, vector<1x2048xf32>
    %cst_19 = arith.constant 9.99999997E-7 : f32
    %27 = vector.broadcast %cst_19 : f32 to vector<1x2048xf32>
    %28 = arith.addf %26, %27 : vector<1x2048xf32>
    %c0_20 = arith.constant 0 : index
    %c0_21 = arith.constant 0 : index
    %29 = vector.load %arg8[%c0_20, %c0_21] : memref<1x2048xf32, #tpu.memory_space<vmem>>, vector<1x2048xf32>
    tpu.vector_store %arg8[%c0_20, %c0_21], %28 {strides = array<i32>} : memref<1x2048xf32, #tpu.memory_space<vmem>>, vector<1x2048xf32>,
    return
  }
  func.func @transform_0(%arg0: i32) -> (i32, i32) {
    %c0_i32 = arith.constant 0 : i32
    %c0_i32_0 = arith.constant 0 : i32
    return %arg0, %c0_i32 : i32, i32
  }
  func.func @transform_1(%arg0: i32) -> (i32, i32) {
    %c0_i32 = arith.constant 0 : i32
    %c0_i32_0 = arith.constant 0 : i32
    %c0_i32_1 = arith.constant 0 : i32
    return %c0_i32, %c0_i32_0 : i32, i32
  }
  func.func @transform_2(%arg0: i32) -> (i32, i32) {
    %c0_i32 = arith.constant 0 : i32
    %c0_i32_0 = arith.constant 0 : i32
    %c0_i32_1 = arith.constant 0 : i32
    return %c0_i32, %c0_i32_0 : i32, i32
  }
  func.func @transform_3(%arg0: i32) -> (i32, i32) {
    %c0_i32 = arith.constant 0 : i32
    %c0_i32_0 = arith.constant 0 : i32
    %c0_i32_1 = arith.constant 0 : i32
    return %c0_i32, %c0_i32_0 : i32, i32
  }
  func.func @transform_4(%arg0: i32) -> (i32, i32) {
    %c0_i32 = arith.constant 0 : i32
    %c0_i32_0 = arith.constant 0 : i32
    %c0_i32_1 = arith.constant 0 : i32
    return %c0_i32, %c0_i32_0 : i32, i32
  }
  func.func @transform_5(%arg0: i32) -> (i32, i32) {
    %c0_i32 = arith.constant 0 : i32
    %c0_i32_0 = arith.constant 0 : i32
    %c0_i32_1 = arith.constant 0 : i32
    return %c0_i32, %c0_i32_0 : i32, i32
  }
  func.func @transform_6(%arg0: i32) -> (i32, i32) {
    %c0_i32 = arith.constant 0 : i32
    %c0_i32_0 = arith.constant 0 : i32
    %c0_i32_1 = arith.constant 0 : i32
    return %c0_i32, %c0_i32_0 : i32, i32
  }
  func.func @transform_7(%arg0: i32) -> (i32, i32) {
    %c0_i32 = arith.constant 0 : i32
    %c0_i32_0 = arith.constant 0 : i32
    return %c0_i32, %arg0 : i32, i32
  }
}

</mosaic_0001>

<bundles_post_ra>
// kernel: tpu_custom_call.1
= control target key start
LH: loop header
LB: loop body
LE: loop exit
PB: predicated region body
PF: predicated region fallthrough
CT: control target
= control target key end

     0   :  { %s7568_s0 = inlined_call_operand.vmem [shape: f32[4096,12], index: 0, kind: input, shape index: {}]   ;;  %s7569_s1 = inlined_call_operand.vmem [shape: f32[64,12], index: 1, kind: input, shape index: {}]   ;;  %s7570_s2 = inlined_call_operand.vmem [shape: f32[64,1], index: 2, kind: input, shape index: {}]   ;;  %s7571_s3 = inlined_call_operand.vmem [shape: f32[64,64], index: 3, kind: input, shape index: {}]   ;;  %s7572_s4 = inlined_call_operand.vmem [shape: f32[64,1], index: 4, kind: input, shape index: {}]   ;;  %s7573_s5 = inlined_call_operand.vmem [shape: f32[1,64], index: 5, kind: input, shape index: {}]   ;;  %s7574_s6 = inlined_call_operand.<no memory space> [shape: f32[1,1], index: 6, kind: input, shape index: {}]   ;;  %s7575_s7 = inlined_call_operand.hbm [shape: f32[1,4096], index: 7, kind: output, shape index: {}]  }
   0x1   :  { %v12_v0 = vstv %s7574_s6 }
   0x2   :  { %13 = vst [vmem:[#allocation2] sm:$0x1] %v12_v0 }
   0x3   :  { %14 = vsyncpa [#allocation4], 0 }
   0x4   :  { %16 = vsyncpa [#allocation4 + $0x1], 0  ;;  %s5554_s26 = smov 0   ;;  %s5556_s27 = smov 0  }
   0x5   :  { %s5558_s28 = smov 0   ;;  %s5560_s29 = smov 0  }
   0x6 LB: > { %s4545_s6 = sadd.s32 4294967295, %s5505_s29   ;;  %s4546_s30 = sadd.s32 4294967294, %s5505_s29   ;;  %s5505_s29 = sphi %s5560_s29, %s7587_s29   ;;  %s5501_s28 = sphi %s5558_s28, %s7586_s28   ;;  %s5497_s27 = sphi %s5556_s27, %s7585_s27   ;;  %s5493_s26 = sphi %s5554_s26, %s7584_s26  }
   0x7   : > { %s5577_s8 = sadd.s32 1, %s5505_s29   ;;  %s181_s9 = sadd.s32 1, %s5501_s28 }
   0x8   : > { %s178_s10 = ssub.s32 %s5505_s29, %s5577_s8  ;;  %p191_p0 = scmp.ne.s32.totalorder %s5501_s28, %s5497_s27 }
   0x9   : > { %p179_p1 = scmp.eq.s32.totalorder %s178_s10, 0  ;;  %p192_p2 = scmp.eq.s32.totalorder %s4545_s6, 1 }
   0xa   : > { %p197_p3 = scmp.ne.s32.totalorder %s5497_s27, %s5493_s26  ;;  %p198_p4 = scmp.eq.s32.totalorder %s4546_s30, 1 }
   0xb   : > { %s5587_s11 = scalar_select %p179_p1, %s5501_s28, %s181_s9  }
   0xc   : > { %p5589_p5 = por %p192_p2, %p191_p0  ;;  %p5593_p6 = por %p198_p4, %p197_p3 }
   0xd   : > { %p4549_p7 = scmp.ge.s32.totalorder %s5505_s29, 1  ;;  %p243_p8 = scmp.lt.s32.totalorder %s5505_s29, 3 }
   0xf   : > { %p244_p9 = pnand %p4549_p7, %p243_p8 }
  0x10   : > { %s5599_s14 = sshll.u32 (!%p244_p9), %s4545_s6, 8  ;;  %s272_s17 = sand.u32 (!%p244_p9), 1, %s5497_s27  }
  0x11   : > { %247 = sbr.rel (%p244_p9) target bundleno = 1032 (0x408), region = 48  ;;  %p276_p10 = scmp.lt.s32.totalorder (!%p244_p9), %s5599_s14, 511 }
  0x12   : > { %s4550_s18 = sshll.u32 (!%p244_p9), %s272_s17, 4  ;;  %s4485_s23 = scalar_lea.hbm (!%p244_p9), %s7575_s7, %s5599_s14 }
  0x13   : > { %s4473_s24 = scalar_lea.sflag (!%p244_p9), [#allocation4], %s272_s17  ;;  %s5510_s30 = smov (!%p244_p9), [#allocation3]  }
  0x16   : > { %vm594_vm0 = vcmask 97280   ;;  %v5604_v1 = vld [vmem:[%s7569_s1] sm:$0xff]  ;;  %v5507_v2 = vmov 0   ;;  %v551_v3 = vld [vmem:[%s7570_s2 + $0x28] sm:$0xff]  ;;  %s277_s19 = scalar_select %p276_p10, %s5599_s14, 511  ;;  %v548_v55 = vld [vmem:[%s7570_s2 + $0x10] sm:$0xff] }
  0x17   : > { %4983 = vmatprep.mubr.msk.f32.mxu0 %vm594_vm0, %v5604_v1  ;;  %5031 = vmatprep.mubr.msk.f32.mxu1 %vm594_vm0, %v5604_v1  ;;  %v550_v4 = vld [vmem:[%s7570_s2 + $0x20] sm:$0xff]  ;;  %vm2475_vm1 = vcmask 523264  }
  0x18   : > { %5378 = vset.pattern.permute.xlu1 %v5507_v2  ;;  %5377 = vset.pattern.permute.xlu0 %v5507_v2  ;;  %s4552_s20 = sshll.u32 %s277_s19, 3  ;;  %v546_v56 = vld [vmem:[%s7570_s2] sm:$0xff]  ;;  %v553_v2 = vld [vmem:[%s7570_s2 + $0x38] sm:$0xff]  ;;  %s7426_s19 = scalar_lea.vmem [#allocation3], %s4550_s18 }
  0x19   : > { %581 = vperm.xlu1 %5378, %v551_v3   ;;  %s5621_s25 = scalar_lea.vmem %s7568_s0, %s4552_s20  ;;  %591 = vperm.xlu0 %5377, %v553_v2   ;;  %s4487_s20 = sshll.u32 %s7426_s19, 4  ;;  %s4488_s20 = int_to_ptr.vmem [resolvable:$true] %s4487_s20 }
  0x1a   : > { %v313_v5 = vld [vmem:[%s5621_s25 + $0xf8] sm:$0xff]  ;;  %v312_v9 = vld [vmem:[%s5621_s25 + $0xf0] sm:$0xff]  ;;  %v311_v13 = vld [vmem:[%s5621_s25 + $0xe8] sm:$0xff]  ;;  %s5445_s6 = scalar_lea.vmem %s4488_s20, 256 }
  0x1b   : > { %v345_v6 = vld [vmem:[%s5621_s25 + $0x1f8] sm:$0xff]  ;;  %4951 = vmatprep.subr.msk.mxu0 %vm594_vm0, %v313_v5  ;;  %v344_v10 = vld [vmem:[%s5621_s25 + $0x1f0] sm:$0xff]  ;;  %v343_v14 = vld [vmem:[%s5621_s25 + $0x1e8] sm:$0xff]  ;;  %p5446_p11 = scmp.ne.s32.totalorder %s4488_s20, %s5445_s6 }
  0x1c   : > { %v297_v7 = vld [vmem:[%s5621_s25 + $0x78] sm:$0xff]  ;;  %4999 = vmatprep.subr.msk.mxu1 %vm594_vm0, %v345_v6  ;;  %v296_v11 = vld [vmem:[%s5621_s25 + $0x70] sm:$0xff]  ;;  %v295_v15 = vld [vmem:[%s5621_s25 + $0x68] sm:$0xff] }
  0x1d   : > { %576 = vperm.xlu1 %5378, %v550_v4   ;;  %v329_v8 = vld [vmem:[%s5621_s25 + $0x178] sm:$0xff]  ;;  %4952 = vmatpush3.xpose.msk.msra.mxu0 %vm594_vm0, %v297_v7  ;;  %v328_v12 = vld [vmem:[%s5621_s25 + $0x170] sm:$0xff]  ;;  %v327_v16 = vld [vmem:[%s5621_s25 + $0x168] sm:$0xff]  ;;  %p5447_p12 = pnand %p5446_p11, %p5589_p5 }
  0x1e   : > { %5000 = vmatpush3.xpose.msk.msra.mxu1 %vm594_vm0, %v329_v8  ;;  %4953 = vmatprep.subr.msk.mxu0 %vm594_vm0, %v312_v9  ;;  %v310_v17 = vld [vmem:[%s5621_s25 + $0xe0] sm:$0xff]  ;;  %v309_v21 = vld [vmem:[%s5621_s25 + $0xd8] sm:$0xff]  ;;  %v308_v25 = vld [vmem:[%s5621_s25 + $0xd0] sm:$0xff] }
  0x1f   : > { %5001 = vmatprep.subr.msk.mxu1 %vm594_vm0, %v344_v10  ;;  %v342_v18 = vld [vmem:[%s5621_s25 + $0x1e0] sm:$0xff]  ;;  %v341_v22 = vld [vmem:[%s5621_s25 + $0x1d8] sm:$0xff]  ;;  %v340_v26 = vld [vmem:[%s5621_s25 + $0x1d0] sm:$0xff]  ;;  %p5448_p13 = pneg %p5447_p12 }
  0x20   : > { %v294_v19 = vld [vmem:[%s5621_s25 + $0x60] sm:$0xff]  ;;  %v293_v23 = vld [vmem:[%s5621_s25 + $0x58] sm:$0xff]  ;;  %v292_v27 = vld [vmem:[%s5621_s25 + $0x50] sm:$0xff] }
  0x21   : > { %4954 = vmatpush3.xpose.msk.msra.mxu0 %vm594_vm0, %v296_v11  ;;  %v326_v20 = vld [vmem:[%s5621_s25 + $0x160] sm:$0xff]  ;;  %v325_v24 = vld [vmem:[%s5621_s25 + $0x158] sm:$0xff]  ;;  %v324_v28 = vld [vmem:[%s5621_s25 + $0x150] sm:$0xff]  ;;  %566 = vperm.xlu1 %5378, %v548_v55  }
  0x22   : > { %5002 = vmatpush3.xpose.msk.msra.mxu1 %vm594_vm0, %v328_v12  ;;  %4955 = vmatprep.subr.msk.mxu0 %vm594_vm0, %v311_v13  ;;  %v307_v29 = vld [vmem:[%s5621_s25 + $0xc8] sm:$0xff]  ;;  %v306_v33 = vld [vmem:[%s5621_s25 + $0xc0] sm:$0xff]  ;;  %v305_v37 = vld [vmem:[%s5621_s25 + $0xb8] sm:$0xff] }
  0x23   : > { %5003 = vmatprep.subr.msk.mxu1 %vm594_vm0, %v343_v14  ;;  %v339_v30 = vld [vmem:[%s5621_s25 + $0x1c8] sm:$0xff]  ;;  %v338_v34 = vld [vmem:[%s5621_s25 + $0x1c0] sm:$0xff]  ;;  %v337_v38 = vld [vmem:[%s5621_s25 + $0x1b8] sm:$0xff] }
  0x24   : > { %v291_v31 = vld [vmem:[%s5621_s25 + $0x48] sm:$0xff]  ;;  %v290_v35 = vld [vmem:[%s5621_s25 + $0x40] sm:$0xff]  ;;  %v289_v39 = vld [vmem:[%s5621_s25 + $0x38] sm:$0xff] }
  0x25   : > { %4956 = vmatpush3.xpose.msk.msra.mxu0 %vm594_vm0, %v295_v15  ;;  %v323_v32 = vld [vmem:[%s5621_s25 + $0x148] sm:$0xff]  ;;  %v322_v36 = vld [vmem:[%s5621_s25 + $0x140] sm:$0xff]  ;;  %v321_v40 = vld [vmem:[%s5621_s25 + $0x138] sm:$0xff]  ;;  %556 = vperm.xlu1 %5378, %v546_v56  }
  0x26   : > { %5004 = vmatpush3.xpose.msk.msra.mxu1 %vm594_vm0, %v327_v16  ;;  %4957 = vmatprep.subr.msk.mxu0 %vm594_vm0, %v310_v17  ;;  %v304_v41 = vld [vmem:[%s5621_s25 + $0xb0] sm:$0xff]  ;;  %v303_v45 = vld [vmem:[%s5621_s25 + $0xa8] sm:$0xff]  ;;  %v302_v49 = vld [vmem:[%s5621_s25 + $0xa0] sm:$0xff] }
  0x27   : > { %5005 = vmatprep.subr.msk.mxu1 %vm594_vm0, %v342_v18  ;;  %v336_v42 = vld [vmem:[%s5621_s25 + $0x1b0] sm:$0xff]  ;;  %v335_v46 = vld [vmem:[%s5621_s25 + $0x1a8] sm:$0xff]  ;;  %v334_v50 = vld [vmem:[%s5621_s25 + $0x1a0] sm:$0xff] }
  0x28   : > { %v288_v43 = vld [vmem:[%s5621_s25 + $0x30] sm:$0xff]  ;;  %v287_v47 = vld [vmem:[%s5621_s25 + $0x28] sm:$0xff]  ;;  %v286_v51 = vld [vmem:[%s5621_s25 + $0x20] sm:$0xff] }
  0x29   : > { %4958 = vmatpush3.xpose.msk.msra.mxu0 %vm594_vm0, %v294_v19  ;;  %v320_v44 = vld [vmem:[%s5621_s25 + $0x130] sm:$0xff]  ;;  %v319_v48 = vld [vmem:[%s5621_s25 + $0x128] sm:$0xff]  ;;  %v318_v52 = vld [vmem:[%s5621_s25 + $0x120] sm:$0xff] }
  0x2a   : > { %5006 = vmatpush3.xpose.msk.msra.mxu1 %vm594_vm0, %v326_v20  ;;  %4959 = vmatprep.subr.msk.mxu0 %vm594_vm0, %v309_v21  ;;  %v301_v53 = vld [vmem:[%s5621_s25 + $0x98] sm:$0xff]  ;;  %v300_v59 = vld [vmem:[%s5621_s25 + $0x90] sm:$0xff]  ;;  %v299_v63 = vld [vmem:[%s5621_s25 + $0x88] sm:$0xff] }
  0x2b   : > { %5007 = vmatprep.subr.msk.mxu1 %vm594_vm0, %v341_v22  ;;  %v333_v54 = vld [vmem:[%s5621_s25 + $0x198] sm:$0xff]  ;;  %v332_v60 = vld [vmem:[%s5621_s25 + $0x190] sm:$0xff]  ;;  %v331_v0 = vld [vmem:[%s5621_s25 + $0x188] sm:$0xff] }
  0x2c   : > { %v285_v57 = vld [vmem:[%s5621_s25 + $0x18] sm:$0xff]  ;;  %v284_v61 = vld [vmem:[%s5621_s25 + $0x10] sm:$0xff]  ;;  %v283_v3 = vld [vmem:[%s5621_s25 + $0x8] sm:$0xff] }
  0x2d   : > { %4960 = vmatpush3.xpose.msk.msra.mxu0 %vm594_vm0, %v293_v23  ;;  %v317_v58 = vld [vmem:[%s5621_s25 + $0x118] sm:$0xff]  ;;  %v316_v62 = vld [vmem:[%s5621_s25 + $0x110] sm:$0xff]  ;;  %v315_v4 = vld [vmem:[%s5621_s25 + $0x108] sm:$0xff] }
  0x2e   : > { %5008 = vmatpush3.xpose.msk.msra.mxu1 %vm594_vm0, %v325_v24  ;;  %4961 = vmatprep.subr.msk.mxu0 %vm594_vm0, %v308_v25  ;;  %v298_v5 = vld [vmem:[%s5621_s25 + $0x80] sm:$0xff]  ;;  %v552_v7 = vld [vmem:[%s7570_s2 + $0x30] sm:$0xff]  ;;  %v377_v10 = vld [vmem:[%s5621_s25 + $0x2f8] sm:$0xff] }
  0x2f   : > { %5009 = vmatprep.subr.msk.mxu1 %vm594_vm0, %v340_v26  ;;  %v330_v6 = vld [vmem:[%s5621_s25 + $0x180] sm:$0xff]  ;;  %v409_v11 = vld [vmem:[%s5621_s25 + $0x3f8] sm:$0xff]  ;;  %586 = vperm.xlu0 %5377, %v552_v7   ;;  %v5775_v15 = vld [vmem:[%s7569_s1 + $0x8] sm:$0xff] }
  0x30   : > { %v282_v8 = vld [vmem:[%s5621_s25] sm:$0xff]  ;;  %v549_v12 = vld [vmem:[%s7570_s2 + $0x18] sm:$0xff]  ;;  %v376_v16 = vld [vmem:[%s5621_s25 + $0x2f0] sm:$0xff] }
  0x31   : > { %4962 = vmatpush3.xpose.msk.msra.mxu0 %vm594_vm0, %v292_v27  ;;  %v314_v9 = vld [vmem:[%s5621_s25 + $0x100] sm:$0xff]  ;;  %v361_v13 = vld [vmem:[%s5621_s25 + $0x278] sm:$0xff]  ;;  %v408_v17 = vld [vmem:[%s5621_s25 + $0x3f0] sm:$0xff] }
  0x32   : > { %5010 = vmatpush3.xpose.msk.msra.mxu1 %vm594_vm0, %v324_v28  ;;  %4963 = vmatprep.subr.msk.mxu0 %vm594_vm0, %v307_v29  ;;  %v393_v14 = vld [vmem:[%s5621_s25 + $0x378] sm:$0xff]  ;;  %v360_v18 = vld [vmem:[%s5621_s25 + $0x270] sm:$0xff]  ;;  %v375_v21 = vld [vmem:[%s5621_s25 + $0x2e8] sm:$0xff] }
  0x33   : > { %5011 = vmatprep.subr.msk.mxu1 %vm594_vm0, %v339_v30  ;;  %571 = vperm.xlu0 %5377, %v549_v12   ;;  %v392_v19 = vld [vmem:[%s5621_s25 + $0x370] sm:$0xff]  ;;  %v407_v22 = vld [vmem:[%s5621_s25 + $0x3e8] sm:$0xff]  ;;  %v5817_v25 = vld [vmem:[%s7569_s1 + $0x18] sm:$0xff] }
  0x34   : > { %v5796_v20 = vld [vmem:[%s7569_s1 + $0x10] sm:$0xff]  ;;  %v359_v23 = vld [vmem:[%s5621_s25 + $0x268] sm:$0xff]  ;;  %v374_v26 = vld [vmem:[%s5621_s25 + $0x2e0] sm:$0xff] }
  0x35   : > { %4964 = vmatpush3.xpose.msk.msra.mxu0 %vm594_vm0, %v291_v31  ;;  %v391_v24 = vld [vmem:[%s5621_s25 + $0x368] sm:$0xff]  ;;  %v406_v27 = vld [vmem:[%s5621_s25 + $0x3e0] sm:$0xff]  ;;  %v373_v31 = vld [vmem:[%s5621_s25 + $0x2d8] sm:$0xff] }
  0x36   : > { %5012 = vmatpush3.xpose.msk.msra.mxu1 %vm594_vm0, %v323_v32  ;;  %4965 = vmatprep.subr.msk.mxu0 %vm594_vm0, %v306_v33  ;;  %v358_v28 = vld [vmem:[%s5621_s25 + $0x260] sm:$0xff]  ;;  %v405_v32 = vld [vmem:[%s5621_s25 + $0x3d8] sm:$0xff]  ;;  %v368_v55 = vld [vmem:[%s5621_s25 + $0x2b0] sm:$0xff] }
  0x37   : > { %5013 = vmatprep.subr.msk.mxu1 %vm594_vm0, %v338_v34  ;;  %v390_v29 = vld [vmem:[%s5621_s25 + $0x360] sm:$0xff]  ;;  %v357_v33 = vld [vmem:[%s5621_s25 + $0x258] sm:$0xff]  ;;  %v400_v56 = vld [vmem:[%s5621_s25 + $0x3b0] sm:$0xff] }
  0x38   : > { %v5838_v30 = vld [vmem:[%s7569_s1 + $0x20] sm:$0xff]  ;;  %v389_v34 = vld [vmem:[%s5621_s25 + $0x358] sm:$0xff]  ;;  %v380_v12 = vld [vmem:[%s5621_s25 + $0x310] sm:$0xff] }
  0x39   : > { %4966 = vmatpush3.xpose.msk.msra.mxu0 %vm594_vm0, %v290_v35  ;;  %v5859_v35 = vld [vmem:[%s7569_s1 + $0x28] sm:$0xff]  ;;  %v350_v2 = vld [vmem:[%s5621_s25 + $0x220] sm:$0xff]  ;;  %v381_v7 = vld [vmem:[%s5621_s25 + $0x318] sm:$0xff] }
  0x3a   : > { %5014 = vmatpush3.xpose.msk.msra.mxu1 %vm594_vm0, %v322_v36  ;;  %4967 = vmatprep.subr.msk.mxu0 %vm594_vm0, %v305_v37  ;;  %v372_v36 = vld [vmem:[%s5621_s25 + $0x2d0] sm:$0xff] }
  0x3b   : > { %5015 = vmatprep.subr.msk.mxu1 %vm594_vm0, %v337_v38  ;;  %v404_v37 = vld [vmem:[%s5621_s25 + $0x3d0] sm:$0xff] }
  0x3c   : > { %v356_v38 = vld [vmem:[%s5621_s25 + $0x250] sm:$0xff] }
  0x3d   : > { %4968 = vmatpush3.xpose.msk.msra.mxu0 %vm594_vm0, %v289_v39  ;;  %v388_v39 = vld [vmem:[%s5621_s25 + $0x350] sm:$0xff] }
  0x3e   : > { %5016 = vmatpush3.xpose.msk.msra.mxu1 %vm594_vm0, %v321_v40  ;;  %4969 = vmatprep.subr.msk.mxu0 %vm594_vm0, %v304_v41  ;;  %v5880_v40 = vld [vmem:[%s7569_s1 + $0x30] sm:$0xff]  ;;  %v371_v41 = vld [vmem:[%s5621_s25 + $0x2c8] sm:$0xff] }
  0x3f   : > { %5017 = vmatprep.subr.msk.mxu1 %vm594_vm0, %v336_v42  ;;  %v403_v42 = vld [vmem:[%s5621_s25 + $0x3c8] sm:$0xff] }
  0x41   : > { %4970 = vmatpush3.xpose.msk.msra.mxu0 %vm594_vm0, %v288_v43  ;;  %v355_v43 = vld [vmem:[%s5621_s25 + $0x248] sm:$0xff] }
  0x42   : > { %5018 = vmatpush3.xpose.msk.msra.mxu1 %vm594_vm0, %v320_v44  ;;  %4971 = vmatprep.subr.msk.mxu0 %vm594_vm0, %v303_v45  ;;  %v387_v44 = vld [vmem:[%s5621_s25 + $0x348] sm:$0xff]  ;;  %v5901_v45 = vld [vmem:[%s7569_s1 + $0x38] sm:$0xff] }
  0x43   : > { %5019 = vmatprep.subr.msk.mxu1 %vm594_vm0, %v335_v46  ;;  %v370_v46 = vld [vmem:[%s5621_s25 + $0x2c0] sm:$0xff] }
  0x45   : > { %4972 = vmatpush3.xpose.msk.msra.mxu0 %vm594_vm0, %v287_v47  ;;  %v402_v47 = vld [vmem:[%s5621_s25 + $0x3c0] sm:$0xff] }
  0x46   : > { %5020 = vmatpush3.xpose.msk.msra.mxu1 %vm594_vm0, %v319_v48  ;;  %4973 = vmatprep.subr.msk.mxu0 %vm594_vm0, %v302_v49  ;;  %v354_v48 = vld [vmem:[%s5621_s25 + $0x240] sm:$0xff] }
  0x47   : > { %5021 = vmatprep.subr.msk.mxu1 %vm594_vm0, %v334_v50  ;;  %v386_v49 = vld [vmem:[%s5621_s25 + $0x340] sm:$0xff]  ;;  %v369_v50 = vld [vmem:[%s5621_s25 + $0x2b8] sm:$0xff] }
  0x49   : > { %4974 = vmatpush3.xpose.msk.msra.mxu0 %vm594_vm0, %v286_v51  ;;  %v401_v51 = vld [vmem:[%s5621_s25 + $0x3b8] sm:$0xff] }
  0x4a   : > { %5022 = vmatpush3.xpose.msk.msra.mxu1 %vm594_vm0, %v318_v52  ;;  %4975 = vmatprep.subr.msk.mxu0 %vm594_vm0, %v301_v53  ;;  %v547_v52 = vld [vmem:[%s7570_s2 + $0x8] sm:$0xff]  ;;  %v353_v53 = vld [vmem:[%s5621_s25 + $0x238] sm:$0xff] }
  0x4b   : > { %5023 = vmatprep.subr.msk.mxu1 %vm594_vm0, %v333_v54  ;;  %v385_v54 = vld [vmem:[%s5621_s25 + $0x338] sm:$0xff]  ;;  %561 = vperm.xlu0 %5377, %v547_v52  }
  0x4c   : > { %v453_v52 = vld [vmem:[%s5621_s25 + $0x558] sm:$0xff] }
  0x4d   : > { %4976 = vmatpush3.xpose.msk.msra.mxu0 %vm594_vm0, %v285_v57  ;;  %v352_v57 = vld [vmem:[%s5621_s25 + $0x230] sm:$0xff] }
  0x4e   : > { %5024 = vmatpush3.xpose.msk.msra.mxu1 %vm594_vm0, %v317_v58  ;;  %4977 = vmatprep.subr.msk.mxu0 %vm594_vm0, %v300_v59  ;;  %v384_v58 = vld [vmem:[%s5621_s25 + $0x330] sm:$0xff]  ;;  %v367_v59 = vld [vmem:[%s5621_s25 + $0x2a8] sm:$0xff] }
  0x4f   : > { %5025 = vmatprep.subr.msk.mxu1 %vm594_vm0, %v332_v60  ;;  %v399_v60 = vld [vmem:[%s5621_s25 + $0x3a8] sm:$0xff] }
  0x51   : > { %4978 = vmatpush3.xpose.msk.msra.mxu0 %vm594_vm0, %v284_v61  ;;  %v351_v61 = vld [vmem:[%s5621_s25 + $0x228] sm:$0xff] }
  0x52   : > { %5026 = vmatpush3.xpose.msk.msra.mxu1 %vm594_vm0, %v316_v62  ;;  %4979 = vmatprep.subr.msk.mxu0 %vm594_vm0, %v299_v63  ;;  %v383_v62 = vld [vmem:[%s5621_s25 + $0x328] sm:$0xff]  ;;  %v366_v63 = vld [vmem:[%s5621_s25 + $0x2a0] sm:$0xff] }
  0x53   : > { %5027 = vmatprep.subr.msk.mxu1 %vm594_vm0, %v331_v0  ;;  %v398_v0 = vld [vmem:[%s5621_s25 + $0x3a0] sm:$0xff] }
  0x55   : > { %4980 = vmatpush3.xpose.msk.msra.mxu0 %vm594_vm0, %v283_v3  ;;  %v382_v3 = vld [vmem:[%s5621_s25 + $0x320] sm:$0xff] }
  0x56   : > { %5028 = vmatpush3.xpose.msk.msra.mxu1 %vm594_vm0, %v315_v4  ;;  %4981 = vmatprep.subr.msk.mxu0 %vm594_vm0, %v298_v5  ;;  %v365_v4 = vld [vmem:[%s5621_s25 + $0x298] sm:$0xff] }
  0x57   : > { %5029 = vmatprep.subr.msk.mxu1 %vm594_vm0, %v330_v6  ;;  %v397_v5 = vld [vmem:[%s5621_s25 + $0x398] sm:$0xff] }
  0x58   : > { %v349_v6 = vld [vmem:[%s5621_s25 + $0x218] sm:$0xff] }
  0x59   : > { %4982 = vmatpush3.xpose.msk.msra.mxu0 %vm594_vm0, %v282_v8  ;;  %v364_v8 = vld [vmem:[%s5621_s25 + $0x290] sm:$0xff] }
  0x5a   : > { %5030 = vmatpush3.xpose.msk.msra.mxu1 %vm594_vm0, %v314_v9  ;;  %5047 = vmatprep.subr.msk.mxu0 %vm594_vm0, %v377_v10  ;;  %v396_v9 = vld [vmem:[%s5621_s25 + $0x390] sm:$0xff]  ;;  %v2434_v10 = vld [vmem:[%s7572_s4 + $0x38] sm:$0xff] }
  0x5b   : > { %5095 = vmatprep.subr.msk.mxu1 %vm594_vm0, %v409_v11  ;;  %v348_v11 = vld [vmem:[%s5621_s25 + $0x210] sm:$0xff]  ;;  %2472 = vperm.xlu0 %5377, %v2434_v10   ;;  %v2427_v10 = vld [vmem:[%s7572_s4] sm:$0xff] }
  0x5c   : > { %4984 = vmatmul.mubr.msk.f32.vlgmr.msra.gmra.mxu0 %vm594_vm0, %v5604_v1 }
  0x5d   : > { %5032 = vmatmul.mubr.msk.f32.vlgmr.msra.gmra.mxu1 %vm594_vm0, %v5604_v1  ;;  %5048 = vmatpush3.xpose.msk.msra.mxu0 %vm594_vm0, %v361_v13  ;;  %v363_v13 = vld [vmem:[%s5621_s25 + $0x288] sm:$0xff] }
  0x5e   : > { %5096 = vmatpush3.xpose.msk.msra.mxu1 %vm594_vm0, %v393_v14  ;;  %4985 = vmatprep.mubr.msk.f32.mxu0 %vm594_vm0, %v5775_v15  ;;  %v395_v14 = vld [vmem:[%s5621_s25 + $0x388] sm:$0xff] }
  0x5f   : > { %5033 = vmatprep.mubr.msk.f32.mxu1 %vm594_vm0, %v5775_v15  ;;  %5049 = vmatprep.subr.msk.mxu0 %vm594_vm0, %v376_v16  ;;  %v2432_v16 = vld [vmem:[%s7572_s4 + $0x28] sm:$0xff] }
  0x60   : > { %5097 = vmatprep.subr.msk.mxu1 %vm594_vm0, %v408_v17  ;;  %4986 = vmatmul.mubr.msk.f32.gmra.mxu0 %vm594_vm0, %v5775_v15  ;;  %v347_v17 = vld [vmem:[%s5621_s25 + $0x208] sm:$0xff] }
  0x61   : > { %5034 = vmatmul.mubr.msk.f32.gmra.mxu1 %vm594_vm0, %v5775_v15  ;;  %5050 = vmatpush3.xpose.msk.msra.mxu0 %vm594_vm0, %v360_v18  ;;  %v379_v18 = vld [vmem:[%s5621_s25 + $0x308] sm:$0xff] }
  0x62   : > { %5098 = vmatpush3.xpose.msk.msra.mxu1 %vm594_vm0, %v392_v19  ;;  %4987 = vmatprep.mubr.msk.f32.mxu0 %vm594_vm0, %v5796_v20  ;;  %v362_v19 = vld [vmem:[%s5621_s25 + $0x280] sm:$0xff] }
  0x63   : > { %5035 = vmatprep.mubr.msk.f32.mxu1 %vm594_vm0, %v5796_v20  ;;  %5051 = vmatprep.subr.msk.mxu0 %vm594_vm0, %v375_v21  ;;  %v394_v21 = vld [vmem:[%s5621_s25 + $0x380] sm:$0xff] }
  0x64   : > { %5099 = vmatprep.subr.msk.mxu1 %vm594_vm0, %v407_v22  ;;  %4988 = vmatmul.mubr.msk.f32.gmra.mxu0 %vm594_vm0, %v5796_v20  ;;  %v2430_v22 = vld [vmem:[%s7572_s4 + $0x18] sm:$0xff] }
  0x65   : > { %5036 = vmatmul.mubr.msk.f32.gmra.mxu1 %vm594_vm0, %v5796_v20  ;;  %5052 = vmatpush3.xpose.msk.msra.mxu0 %vm594_vm0, %v359_v23  ;;  %v2433_v23 = vld [vmem:[%s7572_s4 + $0x30] sm:$0xff] }
  0x66   : > { %5100 = vmatpush3.xpose.msk.msra.mxu1 %vm594_vm0, %v391_v24  ;;  %4989 = vmatprep.mubr.msk.f32.mxu0 %vm594_vm0, %v5817_v25  ;;  %v346_v24 = vld [vmem:[%s5621_s25 + $0x200] sm:$0xff] }
  0x67   : > { %5037 = vmatprep.mubr.msk.f32.mxu1 %vm594_vm0, %v5817_v25  ;;  %5053 = vmatprep.subr.msk.mxu0 %vm594_vm0, %v374_v26  ;;  %v378_v26 = vld [vmem:[%s5621_s25 + $0x300] sm:$0xff] }
  0x68   : > { %5101 = vmatprep.subr.msk.mxu1 %vm594_vm0, %v406_v27  ;;  %4990 = vmatmul.mubr.msk.f32.gmra.mxu0 %vm594_vm0, %v5817_v25  ;;  %v441_v27 = vld [vmem:[%s5621_s25 + $0x4f8] sm:$0xff] }
  0x69   : > { %5038 = vmatmul.mubr.msk.f32.gmra.mxu1 %vm594_vm0, %v5817_v25  ;;  %5054 = vmatpush3.xpose.msk.msra.mxu0 %vm594_vm0, %v358_v28  ;;  %v473_v28 = vld [vmem:[%s5621_s25 + $0x5f8] sm:$0xff] }
  0x6a   : > { %5102 = vmatpush3.xpose.msk.msra.mxu1 %vm594_vm0, %v390_v29  ;;  %4991 = vmatprep.mubr.msk.f32.mxu0 %vm594_vm0, %v5838_v30  ;;  %v2428_v29 = vld [vmem:[%s7572_s4 + $0x8] sm:$0xff] }
  0x6b   : > { %5039 = vmatprep.mubr.msk.f32.mxu1 %vm594_vm0, %v5838_v30  ;;  %5055 = vmatprep.subr.msk.mxu0 %vm594_vm0, %v373_v31  ;;  %v2431_v31 = vld [vmem:[%s7572_s4 + $0x20] sm:$0xff] }
  0x6c   : > { %5103 = vmatprep.subr.msk.mxu1 %vm594_vm0, %v405_v32  ;;  %4992 = vmatmul.mubr.msk.f32.gmra.mxu0 %vm594_vm0, %v5838_v30  ;;  %v425_v32 = vld [vmem:[%s5621_s25 + $0x478] sm:$0xff] }
  0x6d   : > { %5040 = vmatmul.mubr.msk.f32.gmra.mxu1 %vm594_vm0, %v5838_v30  ;;  %5056 = vmatpush3.xpose.msk.msra.mxu0 %vm594_vm0, %v357_v33  ;;  %v457_v33 = vld [vmem:[%s5621_s25 + $0x578] sm:$0xff] }
  0x6e   : > { %5104 = vmatpush3.xpose.msk.msra.mxu1 %vm594_vm0, %v389_v34  ;;  %4993 = vmatprep.mubr.msk.f32.mxu0 %vm594_vm0, %v5859_v35  ;;  %v440_v34 = vld [vmem:[%s5621_s25 + $0x4f0] sm:$0xff] }
  0x6f   : > { %5041 = vmatprep.mubr.msk.f32.mxu1 %vm594_vm0, %v5859_v35  ;;  %5057 = vmatprep.subr.msk.mxu0 %vm594_vm0, %v372_v36  ;;  %v472_v36 = vld [vmem:[%s5621_s25 + $0x5f0] sm:$0xff] }
  0x70   : > { %5105 = vmatprep.subr.msk.mxu1 %vm594_vm0, %v404_v37  ;;  %4994 = vmatmul.mubr.msk.f32.gmra.mxu0 %vm594_vm0, %v5859_v35  ;;  %v424_v37 = vld [vmem:[%s5621_s25 + $0x470] sm:$0xff] }
  0x71   : > { %5042 = vmatmul.mubr.msk.f32.gmra.mxu1 %vm594_vm0, %v5859_v35  ;;  %5058 = vmatpush3.xpose.msk.msra.mxu0 %vm594_vm0, %v356_v38  ;;  %v456_v38 = vld [vmem:[%s5621_s25 + $0x570] sm:$0xff] }
  0x72   : > { %5106 = vmatpush3.xpose.msk.msra.mxu1 %vm594_vm0, %v388_v39  ;;  %4995 = vmatprep.mubr.msk.f32.mxu0 %vm594_vm0, %v5880_v40  ;;  %v439_v39 = vld [vmem:[%s5621_s25 + $0x4e8] sm:$0xff] }
  0x73   : > { %5043 = vmatprep.mubr.msk.f32.mxu1 %vm594_vm0, %v5880_v40  ;;  %5059 = vmatprep.subr.msk.mxu0 %vm594_vm0, %v371_v41  ;;  %v471_v41 = vld [vmem:[%s5621_s25 + $0x5e8] sm:$0xff] }
  0x74   : > { %5107 = vmatprep.subr.msk.mxu1 %vm594_vm0, %v403_v42  ;;  %4996 = vmatmul.mubr.msk.f32.gmra.mxu0 %vm594_vm0, %v5880_v40  ;;  %v423_v42 = vld [vmem:[%s5621_s25 + $0x468] sm:$0xff] }
  0x75   : > { %5044 = vmatmul.mubr.msk.f32.gmra.mxu1 %vm594_vm0, %v5880_v40  ;;  %5060 = vmatpush3.xpose.msk.msra.mxu0 %vm594_vm0, %v355_v43  ;;  %v455_v43 = vld [vmem:[%s5621_s25 + $0x568] sm:$0xff] }
  0x76   : > { %5108 = vmatpush3.xpose.msk.msra.mxu1 %vm594_vm0, %v387_v44  ;;  %4997 = vmatprep.mubr.msk.f32.mxu0 %vm594_vm0, %v5901_v45  ;;  %v438_v44 = vld [vmem:[%s5621_s25 + $0x4e0] sm:$0xff] }
  0x77   : > { %5045 = vmatprep.mubr.msk.f32.mxu1 %vm594_vm0, %v5901_v45  ;;  %5061 = vmatprep.subr.msk.mxu0 %vm594_vm0, %v370_v46  ;;  %v470_v46 = vld [vmem:[%s5621_s25 + $0x5e0] sm:$0xff] }
  0x78   : > { %5109 = vmatprep.subr.msk.mxu1 %vm594_vm0, %v402_v47  ;;  %4998 = vmatmul.mubr.msk.f32.gmra.mxu0 %vm594_vm0, %v5901_v45  ;;  %v422_v47 = vld [vmem:[%s5621_s25 + $0x460] sm:$0xff] }
  0x79   : > { %5046 = vmatmul.mubr.msk.f32.gmra.mxu1 %vm594_vm0, %v5901_v45  ;;  %5062 = vmatpush3.xpose.msk.msra.mxu0 %vm594_vm0, %v354_v48  ;;  %v454_v48 = vld [vmem:[%s5621_s25 + $0x560] sm:$0xff] }
  0x7a   : > { %5110 = vmatpush3.xpose.msk.msra.mxu1 %vm594_vm0, %v386_v49  ;;  %5063 = vmatprep.subr.msk.mxu0 %vm594_vm0, %v369_v50  ;;  %v437_v49 = vld [vmem:[%s5621_s25 + $0x4d8] sm:$0xff] }
  0x7b   : > { %5111 = vmatprep.subr.msk.mxu1 %vm594_vm0, %v401_v51  ;;  %5079 = vmatprep.mubr.msk.f32.mxu0 %vm594_vm0, %v5604_v1  ;;  %v469_v50 = vld [vmem:[%s5621_s25 + $0x5d8] sm:$0xff] }
  0x7c   : > { %5127 = vmatprep.mubr.msk.f32.mxu1 %vm594_vm0, %v5604_v1  ;;  %2462 = vperm.xlu0 %5377, %v2432_v16   ;;  %v421_v51 = vld [vmem:[%s5621_s25 + $0x458] sm:$0xff]  ;;  %v415_v16 = vld [vmem:[%s5621_s25 + $0x428] sm:$0xff] }
  0x7d   : > { %5064 = vmatpush3.xpose.msk.msra.mxu0 %vm594_vm0, %v353_v53  ;;  %2467 = vperm.xlu1 %5378, %v2433_v23   ;;  %v436_v53 = vld [vmem:[%s5621_s25 + $0x4d0] sm:$0xff]  ;;  %v429_v23 = vld [vmem:[%s5621_s25 + $0x498] sm:$0xff] }
  0x7e   : > { %5112 = vmatpush3.xpose.msk.msra.mxu1 %vm594_vm0, %v385_v54  ;;  %5065 = vmatprep.subr.msk.mxu0 %vm594_vm0, %v368_v55  ;;  %v468_v54 = vld [vmem:[%s5621_s25 + $0x5d0] sm:$0xff] }
  0x7f   : > { %5113 = vmatprep.subr.msk.mxu1 %vm594_vm0, %v400_v56  ;;  %v420_v55 = vld [vmem:[%s5621_s25 + $0x450] sm:$0xff] }
  0x80   : > { %2452 = vperm.xlu0 %5377, %v2430_v22   ;;  %v452_v56 = vld [vmem:[%s5621_s25 + $0x550] sm:$0xff]  ;;  %v446_v22 = vld [vmem:[%s5621_s25 + $0x520] sm:$0xff] }
  0x81   : > { %5066 = vmatpush3.xpose.msk.msra.mxu0 %vm594_vm0, %v352_v57  ;;  %2457 = vperm.xlu1 %5378, %v2431_v31   ;;  %v435_v57 = vld [vmem:[%s5621_s25 + $0x4c8] sm:$0xff]  ;;  %v412_v31 = vld [vmem:[%s5621_s25 + $0x410] sm:$0xff] }
  0x82   : > { %5114 = vmatpush3.xpose.msk.msra.mxu1 %vm594_vm0, %v384_v58  ;;  %5067 = vmatprep.subr.msk.mxu0 %vm594_vm0, %v367_v59  ;;  %v467_v58 = vld [vmem:[%s5621_s25 + $0x5c8] sm:$0xff] }
  0x83   : > { %5115 = vmatprep.subr.msk.mxu1 %vm594_vm0, %v399_v60  ;;  %v419_v59 = vld [vmem:[%s5621_s25 + $0x448] sm:$0xff] }
  0x84   : > { %2442 = vperm.xlu0 %5377, %v2428_v29   ;;  %v451_v60 = vld [vmem:[%s5621_s25 + $0x548] sm:$0xff]  ;;  %v460_v29 = vld [vmem:[%s5621_s25 + $0x590] sm:$0xff] }
  0x85   : > { %5068 = vmatpush3.xpose.msk.msra.mxu0 %vm594_vm0, %v351_v61  ;;  %v434_v61 = vld [vmem:[%s5621_s25 + $0x4c0] sm:$0xff] }
  0x86   : > { %5116 = vmatpush3.xpose.msk.msra.mxu1 %vm594_vm0, %v383_v62  ;;  %5069 = vmatprep.subr.msk.mxu0 %vm594_vm0, %v366_v63  ;;  %v466_v62 = vld [vmem:[%s5621_s25 + $0x5c0] sm:$0xff] }
  0x87   : > { %5117 = vmatprep.subr.msk.mxu1 %vm594_vm0, %v398_v0  ;;  %v418_v63 = vld [vmem:[%s5621_s25 + $0x440] sm:$0xff] }
  0x88   : > { %v450_v0 = vld [vmem:[%s5621_s25 + $0x540] sm:$0xff] }
  0x89   : > { %5070 = vmatpush3.xpose.msk.msra.mxu0 %vm594_vm0, %v350_v2  ;;  %v433_v2 = vld [vmem:[%s5621_s25 + $0x4b8] sm:$0xff] }
  0x8a   : > { %5118 = vmatpush3.xpose.msk.msra.mxu1 %vm594_vm0, %v382_v3  ;;  %5071 = vmatprep.subr.msk.mxu0 %vm594_vm0, %v365_v4  ;;  %v465_v3 = vld [vmem:[%s5621_s25 + $0x5b8] sm:$0xff]  ;;  %v3533_v4 = vld [vmem:[#allocation2] sm:$0x1] }
  0x8b   : > { %5119 = vmatprep.subr.msk.mxu1 %vm594_vm0, %v397_v5  ;;  %v2429_v5 = vld [vmem:[%s7572_s4 + $0x10] sm:$0xff]  ;;  %3536 = vperm.xlu0 %5377, %v3533_v4   ;;  %v499_v4 = vld [vmem:[%s5621_s25 + $0x6c8] sm:$0xff] }
  0x8c   : > { %2447 = vperm.xlu1 %5378, %v2429_v5   ;;  %v531_v5 = vld [vmem:[%s5621_s25 + $0x7c8] sm:$0xff] }
  0x8d   : > { %5072 = vmatpush3.xpose.msk.msra.mxu0 %vm594_vm0, %v349_v6  ;;  %v417_v6 = vld [vmem:[%s5621_s25 + $0x438] sm:$0xff] }
  0x8e   : > { %5120 = vmatpush3.xpose.msk.msra.mxu1 %vm594_vm0, %v381_v7  ;;  %5073 = vmatprep.subr.msk.mxu0 %vm594_vm0, %v364_v8  ;;  %v449_v7 = vld [vmem:[%s5621_s25 + $0x538] sm:$0xff]  ;;  %v432_v8 = vld [vmem:[%s5621_s25 + $0x4b0] sm:$0xff] }
  0x8f   : > { %5121 = vmatprep.subr.msk.mxu1 %vm594_vm0, %v396_v9  ;;  %v464_v9 = vld [vmem:[%s5621_s25 + $0x5b0] sm:$0xff] }
  0x90   : > { %2437 = vperm.xlu1 %5378, %v2427_v10   ;;  %v482_v10 = vld [vmem:[%s5621_s25 + $0x640] sm:$0xff] }
  0x91   : > { %5074 = vmatpush3.xpose.msk.msra.mxu0 %vm594_vm0, %v348_v11  ;;  %v416_v11 = vld [vmem:[%s5621_s25 + $0x430] sm:$0xff] }
  0x92   : > { %5122 = vmatpush3.xpose.msk.msra.mxu1 %vm594_vm0, %v380_v12  ;;  %5075 = vmatprep.subr.msk.mxu0 %vm594_vm0, %v363_v13  ;;  %v448_v12 = vld [vmem:[%s5621_s25 + $0x530] sm:$0xff]  ;;  %v431_v13 = vld [vmem:[%s5621_s25 + $0x4a8] sm:$0xff] }
  0x93   : > { %5123 = vmatprep.subr.msk.mxu1 %vm594_vm0, %v395_v14  ;;  %v463_v14 = vld [vmem:[%s5621_s25 + $0x5a8] sm:$0xff] }
  0x95   : > { %5076 = vmatpush3.xpose.msk.msra.mxu0 %vm594_vm0, %v347_v17  ;;  %v447_v17 = vld [vmem:[%s5621_s25 + $0x528] sm:$0xff] }
  0x96   : > { %5124 = vmatpush3.xpose.msk.msra.mxu1 %vm594_vm0, %v379_v18  ;;  %5077 = vmatprep.subr.msk.mxu0 %vm594_vm0, %v362_v19  ;;  %v430_v18 = vld [vmem:[%s5621_s25 + $0x4a0] sm:$0xff] }
  0x97   : > { %5125 = vmatprep.subr.msk.mxu1 %vm594_vm0, %v394_v21  ;;  %v462_v19 = vld [vmem:[%s5621_s25 + $0x5a0] sm:$0xff] }
  0x98   : > { %v414_v21 = vld [vmem:[%s5621_s25 + $0x420] sm:$0xff] }
  0x99   : > { %5078 = vmatpush3.xpose.msk.msra.mxu0 %vm594_vm0, %v346_v24  ;;  %v461_v24 = vld [vmem:[%s5621_s25 + $0x598] sm:$0xff] }
  0x9a   : > { %5126 = vmatpush3.xpose.msk.msra.mxu1 %vm594_vm0, %v378_v26  ;;  %5143 = vmatprep.subr.msk.mxu0 %vm594_vm0, %v441_v27  ;;  %v413_v26 = vld [vmem:[%s5621_s25 + $0x418] sm:$0xff] }
  0x9b   : > { %5191 = vmatprep.subr.msk.mxu1 %vm594_vm0, %v473_v28  ;;  %v445_v27 = vld [vmem:[%s5621_s25 + $0x518] sm:$0xff]  ;;  %v428_v28 = vld [vmem:[%s5621_s25 + $0x490] sm:$0xff] }
  0x9c   : > { %5080 = vmatmul.mubr.msk.f32.vlgmr.msra.gmra.mxu0 %vm594_vm0, %v5604_v1 }
  0x9d   : > { %5128 = vmatmul.mubr.msk.f32.vlgmr.msra.gmra.mxu1 %vm594_vm0, %v5604_v1  ;;  %5144 = vmatpush3.xpose.msk.msra.mxu0 %vm594_vm0, %v425_v32  ;;  %v444_v32 = vld [vmem:[%s5621_s25 + $0x510] sm:$0xff] }
  0x9e   : > { %5192 = vmatpush3.xpose.msk.msra.mxu1 %vm594_vm0, %v457_v33  ;;  %5081 = vmatprep.mubr.msk.f32.mxu0 %vm594_vm0, %v5775_v15  ;;  %v427_v33 = vld [vmem:[%s5621_s25 + $0x488] sm:$0xff] }
  0x9f   : > { %5129 = vmatprep.mubr.msk.f32.mxu1 %vm594_vm0, %v5775_v15  ;;  %5145 = vmatprep.subr.msk.mxu0 %vm594_vm0, %v440_v34  ;;  %v459_v34 = vld [vmem:[%s5621_s25 + $0x588] sm:$0xff] }
  0xa0   : > { %5193 = vmatprep.subr.msk.mxu1 %vm594_vm0, %v472_v36  ;;  %5082 = vmatmul.mubr.msk.f32.gmra.mxu0 %vm594_vm0, %v5775_v15  ;;  %v411_v36 = vld [vmem:[%s5621_s25 + $0x408] sm:$0xff] }
  0xa1   : > { %5130 = vmatmul.mubr.msk.f32.gmra.mxu1 %vm594_vm0, %v5775_v15  ;;  %5146 = vmatpush3.xpose.msk.msra.mxu0 %vm594_vm0, %v424_v37  ;;  %v443_v37 = vld [vmem:[%s5621_s25 + $0x508] sm:$0xff] }
  0xa2   : > { %5194 = vmatpush3.xpose.msk.msra.mxu1 %vm594_vm0, %v456_v38  ;;  %5083 = vmatprep.mubr.msk.f32.mxu0 %vm594_vm0, %v5796_v20  ;;  %v426_v38 = vld [vmem:[%s5621_s25 + $0x480] sm:$0xff] }
  0xa3   : > { %5131 = vmatprep.mubr.msk.f32.mxu1 %vm594_vm0, %v5796_v20  ;;  %5147 = vmatprep.subr.msk.mxu0 %vm594_vm0, %v439_v39  ;;  %v458_v39 = vld [vmem:[%s5621_s25 + $0x580] sm:$0xff] }
  0xa4   : > { %5195 = vmatprep.subr.msk.mxu1 %vm594_vm0, %v471_v41  ;;  %5084 = vmatmul.mubr.msk.f32.gmra.mxu0 %vm594_vm0, %v5796_v20  ;;  %v410_v41 = vld [vmem:[%s5621_s25 + $0x400] sm:$0xff] }
  0xa5   : > { %5132 = vmatmul.mubr.msk.f32.gmra.mxu1 %vm594_vm0, %v5796_v20  ;;  %5148 = vmatpush3.xpose.msk.msra.mxu0 %vm594_vm0, %v423_v42  ;;  %v442_v42 = vld [vmem:[%s5621_s25 + $0x500] sm:$0xff] }
  0xa6   : > { %5196 = vmatpush3.xpose.msk.msra.mxu1 %vm594_vm0, %v455_v43  ;;  %5085 = vmatprep.mubr.msk.f32.mxu0 %vm594_vm0, %v5817_v25  ;;  %v505_v43 = vld [vmem:[%s5621_s25 + $0x6f8] sm:$0xff] }
  0xa7   : > { %5133 = vmatprep.mubr.msk.f32.mxu1 %vm594_vm0, %v5817_v25  ;;  %5149 = vmatprep.subr.msk.mxu0 %vm594_vm0, %v438_v44  ;;  %v537_v44 = vld [vmem:[%s5621_s25 + $0x7f8] sm:$0xff] }
  0xa8   : > { %5197 = vmatprep.subr.msk.mxu1 %vm594_vm0, %v470_v46  ;;  %5086 = vmatmul.mubr.msk.f32.gmra.mxu0 %vm594_vm0, %v5817_v25  ;;  %v489_v46 = vld [vmem:[%s5621_s25 + $0x678] sm:$0xff] }
  0xa9   : > { %5134 = vmatmul.mubr.msk.f32.gmra.mxu1 %vm594_vm0, %v5817_v25  ;;  %5150 = vmatpush3.xpose.msk.msra.mxu0 %vm594_vm0, %v422_v47  ;;  %v521_v47 = vld [vmem:[%s5621_s25 + $0x778] sm:$0xff] }
  0xaa   : > { %5198 = vmatpush3.xpose.msk.msra.mxu1 %vm594_vm0, %v454_v48  ;;  %5087 = vmatprep.mubr.msk.f32.mxu0 %vm594_vm0, %v5838_v30  ;;  %v504_v48 = vld [vmem:[%s5621_s25 + $0x6f0] sm:$0xff] }
  0xab   : > { %5135 = vmatprep.mubr.msk.f32.mxu1 %vm594_vm0, %v5838_v30  ;;  %5151 = vmatprep.subr.msk.mxu0 %vm594_vm0, %v437_v49  ;;  %v536_v49 = vld [vmem:[%s5621_s25 + $0x7f0] sm:$0xff] }
  0xac   : > { %5199 = vmatprep.subr.msk.mxu1 %vm594_vm0, %v469_v50  ;;  %5088 = vmatmul.mubr.msk.f32.gmra.mxu0 %vm594_vm0, %v5838_v30  ;;  %v488_v50 = vld [vmem:[%s5621_s25 + $0x670] sm:$0xff] }
  0xad   : > { %5136 = vmatmul.mubr.msk.f32.gmra.mxu1 %vm594_vm0, %v5838_v30  ;;  %5152 = vmatpush3.xpose.msk.msra.mxu0 %vm594_vm0, %v421_v51  ;;  %v520_v51 = vld [vmem:[%s5621_s25 + $0x770] sm:$0xff] }
  0xae   : > { %5200 = vmatpush3.xpose.msk.msra.mxu1 %vm594_vm0, %v453_v52  ;;  %5089 = vmatprep.mubr.msk.f32.mxu0 %vm594_vm0, %v5859_v35  ;;  %v535_v52 = vld [vmem:[%s5621_s25 + $0x7e8] sm:$0xff] }
  0xaf   : > { %5137 = vmatprep.mubr.msk.f32.mxu1 %vm594_vm0, %v5859_v35  ;;  %5153 = vmatprep.subr.msk.mxu0 %vm594_vm0, %v436_v53  ;;  %v487_v53 = vld [vmem:[%s5621_s25 + $0x668] sm:$0xff] }
  0xb0   : > { %5201 = vmatprep.subr.msk.mxu1 %vm594_vm0, %v468_v54  ;;  %5090 = vmatmul.mubr.msk.f32.gmra.mxu0 %vm594_vm0, %v5859_v35  ;;  %v519_v54 = vld [vmem:[%s5621_s25 + $0x768] sm:$0xff] }
  0xb1   : > { %5138 = vmatmul.mubr.msk.f32.gmra.mxu1 %vm594_vm0, %v5859_v35  ;;  %5154 = vmatpush3.xpose.msk.msra.mxu0 %vm594_vm0, %v420_v55  ;;  %v502_v55 = vld [vmem:[%s5621_s25 + $0x6e0] sm:$0xff] }
  0xb2   : > { %5202 = vmatpush3.xpose.msk.msra.mxu1 %vm594_vm0, %v452_v56  ;;  %5091 = vmatprep.mubr.msk.f32.mxu0 %vm594_vm0, %v5880_v40  ;;  %v534_v56 = vld [vmem:[%s5621_s25 + $0x7e0] sm:$0xff] }
  0xb3   : > { %5139 = vmatprep.mubr.msk.f32.mxu1 %vm594_vm0, %v5880_v40  ;;  %5155 = vmatprep.subr.msk.mxu0 %vm594_vm0, %v435_v57  ;;  %v486_v57 = vld [vmem:[%s5621_s25 + $0x660] sm:$0xff] }
  0xb4   : > { %5203 = vmatprep.subr.msk.mxu1 %vm594_vm0, %v467_v58  ;;  %5092 = vmatmul.mubr.msk.f32.gmra.mxu0 %vm594_vm0, %v5880_v40  ;;  %v518_v58 = vld [vmem:[%s5621_s25 + $0x760] sm:$0xff] }
  0xb5   : > { %5140 = vmatmul.mubr.msk.f32.gmra.mxu1 %vm594_vm0, %v5880_v40  ;;  %5156 = vmatpush3.xpose.msk.msra.mxu0 %vm594_vm0, %v419_v59  ;;  %v501_v59 = vld [vmem:[%s5621_s25 + $0x6d8] sm:$0xff] }
  0xb6   : > { %5204 = vmatpush3.xpose.msk.msra.mxu1 %vm594_vm0, %v451_v60  ;;  %5093 = vmatprep.mubr.msk.f32.mxu0 %vm594_vm0, %v5901_v45  ;;  %v533_v60 = vld [vmem:[%s5621_s25 + $0x7d8] sm:$0xff] }
  0xb7   : > { %5141 = vmatprep.mubr.msk.f32.mxu1 %vm594_vm0, %v5901_v45  ;;  %5157 = vmatprep.subr.msk.mxu0 %vm594_vm0, %v434_v61  ;;  %v485_v61 = vld [vmem:[%s5621_s25 + $0x658] sm:$0xff] }
  0xb8   : > { %5205 = vmatprep.subr.msk.mxu1 %vm594_vm0, %v466_v62  ;;  %5094 = vmatmul.mubr.msk.f32.gmra.mxu0 %vm594_vm0, %v5901_v45  ;;  %v517_v62 = vld [vmem:[%s5621_s25 + $0x758] sm:$0xff] }
  0xb9   : > { %5142 = vmatmul.mubr.msk.f32.gmra.mxu1 %vm594_vm0, %v5901_v45  ;;  %5158 = vmatpush3.xpose.msk.msra.mxu0 %vm594_vm0, %v418_v63  ;;  %v500_v63 = vld [vmem:[%s5621_s25 + $0x6d0] sm:$0xff] }
  0xba   : > { %5206 = vmatpush3.xpose.msk.msra.mxu1 %vm594_vm0, %v450_v0  ;;  %5159 = vmatprep.subr.msk.mxu0 %vm594_vm0, %v433_v2  ;;  %v532_v0 = vld [vmem:[%s5621_s25 + $0x7d0] sm:$0xff] }
  0xbb   : > { %5207 = vmatprep.subr.msk.mxu1 %vm594_vm0, %v465_v3  ;;  %5175 = vmatprep.mubr.msk.f32.mxu0 %vm594_vm0, %v5604_v1  ;;  %v484_v2 = vld [vmem:[%s5621_s25 + $0x650] sm:$0xff] }
  0xbc   : > { %5223 = vmatprep.mubr.msk.f32.mxu1 %vm594_vm0, %v5604_v1  ;;  %v516_v3 = vld [vmem:[%s5621_s25 + $0x750] sm:$0xff] }
  0xbd   : > { %5160 = vmatpush3.xpose.msk.msra.mxu0 %vm594_vm0, %v417_v6  ;;  %v483_v6 = vld [vmem:[%s5621_s25 + $0x648] sm:$0xff] }
  0xbe   : > { %5208 = vmatpush3.xpose.msk.msra.mxu1 %vm594_vm0, %v449_v7  ;;  %5161 = vmatprep.subr.msk.mxu0 %vm594_vm0, %v432_v8  ;;  %v515_v7 = vld [vmem:[%s5621_s25 + $0x748] sm:$0xff]  ;;  %v498_v8 = vld [vmem:[%s5621_s25 + $0x6c0] sm:$0xff] }
  0xbf   : > { %5209 = vmatprep.subr.msk.mxu1 %vm594_vm0, %v464_v9  ;;  %v530_v9 = vld [vmem:[%s5621_s25 + $0x7c0] sm:$0xff] }
  0xc1   : > { %5162 = vmatpush3.xpose.msk.msra.mxu0 %vm594_vm0, %v416_v11  ;;  %v514_v11 = vld [vmem:[%s5621_s25 + $0x740] sm:$0xff] }
  0xc2   : > { %5210 = vmatpush3.xpose.msk.msra.mxu1 %vm594_vm0, %v448_v12  ;;  %5163 = vmatprep.subr.msk.mxu0 %vm594_vm0, %v431_v13  ;;  %v497_v12 = vld [vmem:[%s5621_s25 + $0x6b8] sm:$0xff] }
  0xc3   : > { %5211 = vmatprep.subr.msk.mxu1 %vm594_vm0, %v463_v14  ;;  %v529_v13 = vld [vmem:[%s5621_s25 + $0x7b8] sm:$0xff] }
  0xc4   : > { %v481_v14 = vld [vmem:[%s5621_s25 + $0x638] sm:$0xff] }
  0xc5   : > { %5164 = vmatpush3.xpose.msk.msra.mxu0 %vm594_vm0, %v415_v16  ;;  %v513_v16 = vld [vmem:[%s5621_s25 + $0x738] sm:$0xff] }
  0xc6   : > { %5212 = vmatpush3.xpose.msk.msra.mxu1 %vm594_vm0, %v447_v17  ;;  %5165 = vmatprep.subr.msk.mxu0 %vm594_vm0, %v430_v18  ;;  %v496_v17 = vld [vmem:[%s5621_s25 + $0x6b0] sm:$0xff] }
  0xc7   : > { %5213 = vmatprep.subr.msk.mxu1 %vm594_vm0, %v462_v19  ;;  %v528_v18 = vld [vmem:[%s5621_s25 + $0x7b0] sm:$0xff]  ;;  %v5443_v19 = vld [vmem:[%s7569_s1] sm:$0xff] }
  0xc9   : > { %5166 = vmatpush3.xpose.msk.msra.mxu0 %vm594_vm0, %v414_v21  ;;  %v480_v21 = vld [vmem:[%s5621_s25 + $0x630] sm:$0xff] }
  0xca   : > { %5214 = vmatpush3.xpose.msk.msra.mxu1 %vm594_vm0, %v446_v22  ;;  %5167 = vmatprep.subr.msk.mxu0 %vm594_vm0, %v429_v23  ;;  %v512_v22 = vld [vmem:[%s5621_s25 + $0x730] sm:$0xff]  ;;  %v495_v23 = vld [vmem:[%s5621_s25 + $0x6a8] sm:$0xff] }
  0xcb   : > { %5215 = vmatprep.subr.msk.mxu1 %vm594_vm0, %v461_v24  ;;  %v527_v24 = vld [vmem:[%s5621_s25 + $0x7a8] sm:$0xff] }
  0xcd   : > { %5168 = vmatpush3.xpose.msk.msra.mxu0 %vm594_vm0, %v413_v26  ;;  %v479_v26 = vld [vmem:[%s5621_s25 + $0x628] sm:$0xff] }
  0xce   : > { %5216 = vmatpush3.xpose.msk.msra.mxu1 %vm594_vm0, %v445_v27  ;;  %5169 = vmatprep.subr.msk.mxu0 %vm594_vm0, %v428_v28  ;;  %v511_v27 = vld [vmem:[%s5621_s25 + $0x728] sm:$0xff]  ;;  %v494_v28 = vld [vmem:[%s5621_s25 + $0x6a0] sm:$0xff] }
  0xcf   : > { %5217 = vmatprep.subr.msk.mxu1 %vm594_vm0, %v460_v29  ;;  %v526_v29 = vld [vmem:[%s5621_s25 + $0x7a0] sm:$0xff] }
  0xd1   : > { %5170 = vmatpush3.xpose.msk.msra.mxu0 %vm594_vm0, %v412_v31  ;;  %v478_v31 = vld [vmem:[%s5621_s25 + $0x620] sm:$0xff] }
  0xd2   : > { %5218 = vmatpush3.xpose.msk.msra.mxu1 %vm594_vm0, %v444_v32  ;;  %5171 = vmatprep.subr.msk.mxu0 %vm594_vm0, %v427_v33  ;;  %v510_v32 = vld [vmem:[%s5621_s25 + $0x720] sm:$0xff]  ;;  %v493_v33 = vld [vmem:[%s5621_s25 + $0x698] sm:$0xff] }
  0xd3   : > { %5219 = vmatprep.subr.msk.mxu1 %vm594_vm0, %v459_v34  ;;  %v525_v34 = vld [vmem:[%s5621_s25 + $0x798] sm:$0xff] }
  0xd5   : > { %5172 = vmatpush3.xpose.msk.msra.mxu0 %vm594_vm0, %v411_v36  ;;  %v477_v36 = vld [vmem:[%s5621_s25 + $0x618] sm:$0xff] }
  0xd6   : > { %5220 = vmatpush3.xpose.msk.msra.mxu1 %vm594_vm0, %v443_v37  ;;  %5173 = vmatprep.subr.msk.mxu0 %vm594_vm0, %v426_v38  ;;  %v509_v37 = vld [vmem:[%s5621_s25 + $0x718] sm:$0xff]  ;;  %v492_v38 = vld [vmem:[%s5621_s25 + $0x690] sm:$0xff] }
  0xd7   : > { %5221 = vmatprep.subr.msk.mxu1 %vm594_vm0, %v458_v39  ;;  %v524_v39 = vld [vmem:[%s5621_s25 + $0x790] sm:$0xff] }
  0xd9   : > { %5174 = vmatpush3.xpose.msk.msra.mxu0 %vm594_vm0, %v410_v41  ;;  %v476_v41 = vld [vmem:[%s5621_s25 + $0x610] sm:$0xff] }
  0xda   : > { %5222 = vmatpush3.xpose.msk.msra.mxu1 %vm594_vm0, %v442_v42  ;;  %5239 = vmatprep.subr.msk.mxu0 %vm594_vm0, %v505_v43  ;;  %v508_v42 = vld [vmem:[%s5621_s25 + $0x710] sm:$0xff]  ;;  %v491_v43 = vld [vmem:[%s5621_s25 + $0x688] sm:$0xff] }
  0xdb   : > { %5287 = vmatprep.subr.msk.mxu1 %vm594_vm0, %v537_v44  ;;  %v523_v44 = vld [vmem:[%s5621_s25 + $0x788] sm:$0xff] }
  0xdc   : > { %5176 = vmatmul.mubr.msk.f32.vlgmr.msra.gmra.mxu0 %vm594_vm0, %v5604_v1 }
  0xdd   : > { %5224 = vmatmul.mubr.msk.f32.vlgmr.msra.gmra.mxu1 %vm594_vm0, %v5604_v1  ;;  %5240 = vmatpush3.xpose.msk.msra.mxu0 %vm594_vm0, %v489_v46  ;;  %v503_v1 = vld [vmem:[%s5621_s25 + $0x6e8] sm:$0xff] }
  0xde   : > { %5288 = vmatpush3.xpose.msk.msra.mxu1 %vm594_vm0, %v521_v47  ;;  %5177 = vmatprep.mubr.msk.f32.mxu0 %vm594_vm0, %v5775_v15  ;;  %v475_v46 = vld [vmem:[%s5621_s25 + $0x608] sm:$0xff] }
  0xdf   : > { %5225 = vmatprep.mubr.msk.f32.mxu1 %vm594_vm0, %v5775_v15  ;;  %5241 = vmatprep.subr.msk.mxu0 %vm594_vm0, %v504_v48  ;;  %v507_v47 = vld [vmem:[%s5621_s25 + $0x708] sm:$0xff]  ;;  %v490_v48 = vld [vmem:[%s5621_s25 + $0x680] sm:$0xff] }
  0xe0   : > { %5289 = vmatprep.subr.msk.mxu1 %vm594_vm0, %v536_v49  ;;  %5178 = vmatmul.mubr.msk.f32.gmra.mxu0 %vm594_vm0, %v5775_v15  ;;  %v522_v49 = vld [vmem:[%s5621_s25 + $0x780] sm:$0xff] }
  0xe1   : > { %5226 = vmatmul.mubr.msk.f32.gmra.mxu1 %vm594_vm0, %v5775_v15  ;;  %5242 = vmatpush3.xpose.msk.msra.mxu0 %vm594_vm0, %v488_v50  ;;  %v474_v50 = vld [vmem:[%s5621_s25 + $0x600] sm:$0xff] }
  0xe2   : > { %5290 = vmatpush3.xpose.msk.msra.mxu1 %vm594_vm0, %v520_v51  ;;  %5179 = vmatprep.mubr.msk.f32.mxu0 %vm594_vm0, %v5796_v20  ;;  %v506_v51 = vld [vmem:[%s5621_s25 + $0x700] sm:$0xff]  ;;  %s5449_s25 = sshll.u32 %s5510_s30, 4  ;;  %s5450_s25 = int_to_ptr.vmem [resolvable:$false] %s5449_s25 }
  0xe3   : > { %5227 = vmatprep.mubr.msk.f32.mxu1 %vm594_vm0, %v5796_v20  ;;  %5243 = vmatprep.subr.msk.mxu0 %vm594_vm0, %v503_v1  ;;  %s5451_s9 = scalar_lea.vmem %s5450_s25, 512  ;;  %p5452_p0 = scmp.lt.s32.totalorder %s4488_s20, %s5450_s25 }
  0xe4   : > { %5291 = vmatprep.subr.msk.mxu1 %vm594_vm0, %v535_v52  ;;  %5180 = vmatmul.mubr.msk.f32.gmra.mxu0 %vm594_vm0, %v5796_v20  ;;  %p5453_p1 = scmp.lt.s32.totalorder %s5451_s9, %s5445_s6 }
  0xe5   : > { %5228 = vmatmul.mubr.msk.f32.gmra.mxu1 %vm594_vm0, %v5796_v20  ;;  %5244 = vmatpush3.xpose.msk.msra.mxu0 %vm594_vm0, %v487_v53 }
  0xe6   : > { %5292 = vmatpush3.xpose.msk.msra.mxu1 %vm594_vm0, %v519_v54  ;;  %5181 = vmatprep.mubr.msk.f32.mxu0 %vm594_vm0, %v5817_v25  ;;  %p5454_p2 = por %p5453_p1, %p5452_p0 }
  0xe7   : > { %5229 = vmatprep.mubr.msk.f32.mxu1 %vm594_vm0, %v5817_v25  ;;  %5245 = vmatprep.subr.msk.mxu0 %vm594_vm0, %v502_v55 }
  0xe8   : > { %5293 = vmatprep.subr.msk.mxu1 %vm594_vm0, %v534_v56  ;;  %5182 = vmatmul.mubr.msk.f32.gmra.mxu0 %vm594_vm0, %v5817_v25  ;;  %p5455_p3 = pnand %p5454_p2, %p5448_p13 }
  0xe9   : > { %5230 = vmatmul.mubr.msk.f32.gmra.mxu1 %vm594_vm0, %v5817_v25  ;;  %5246 = vmatpush3.xpose.msk.msra.mxu0 %vm594_vm0, %v486_v57  ;;  %v5444_v57 = vld [vmem:[%s7569_s1 + $0x8] sm:$0xff] }
  0xea   : > { %5294 = vmatpush3.xpose.msk.msra.mxu1 %vm594_vm0, %v518_v58  ;;  %5183 = vmatprep.mubr.msk.f32.mxu0 %vm594_vm0, %v5838_v30 }
  0xeb   : > { %5231 = vmatprep.mubr.msk.f32.mxu1 %vm594_vm0, %v5838_v30  ;;  %5247 = vmatprep.subr.msk.mxu0 %vm594_vm0, %v501_v59 }
  0xec   : > { %5295 = vmatprep.subr.msk.mxu1 %vm594_vm0, %v533_v60  ;;  %5184 = vmatmul.mubr.msk.f32.gmra.mxu0 %vm594_vm0, %v5838_v30 }
  0xed   : > { %5232 = vmatmul.mubr.msk.f32.gmra.mxu1 %vm594_vm0, %v5838_v30  ;;  %5248 = vmatpush3.xpose.msk.msra.mxu0 %vm594_vm0, %v485_v61 }
  0xee   : > { %5296 = vmatpush3.xpose.msk.msra.mxu1 %vm594_vm0, %v517_v62  ;;  %5185 = vmatprep.mubr.msk.f32.mxu0 %vm594_vm0, %v5859_v35 }
  0xef   : > { %5233 = vmatprep.mubr.msk.f32.mxu1 %vm594_vm0, %v5859_v35  ;;  %5249 = vmatprep.subr.msk.mxu0 %vm594_vm0, %v500_v63 }
  0xf0   : > { %5297 = vmatprep.subr.msk.mxu1 %vm594_vm0, %v532_v0  ;;  %5186 = vmatmul.mubr.msk.f32.gmra.mxu0 %vm594_vm0, %v5859_v35 }
  0xf1   : > { %5234 = vmatmul.mubr.msk.f32.gmra.mxu1 %vm594_vm0, %v5859_v35  ;;  %5250 = vmatpush3.xpose.msk.msra.mxu0 %vm594_vm0, %v484_v2 }
  0xf2   : > { %5298 = vmatpush3.xpose.msk.msra.mxu1 %vm594_vm0, %v516_v3  ;;  %5187 = vmatprep.mubr.msk.f32.mxu0 %vm594_vm0, %v5880_v40 }
  0xf3   : > { %5235 = vmatprep.mubr.msk.f32.mxu1 %vm594_vm0, %v5880_v40  ;;  %5251 = vmatprep.subr.msk.mxu0 %vm594_vm0, %v499_v4 }
  0xf4   : > { %5299 = vmatprep.subr.msk.mxu1 %vm594_vm0, %v531_v5  ;;  %5188 = vmatmul.mubr.msk.f32.gmra.mxu0 %vm594_vm0, %v5880_v40 }
  0xf5   : > { %5236 = vmatmul.mubr.msk.f32.gmra.mxu1 %vm594_vm0, %v5880_v40  ;;  %5252 = vmatpush3.xpose.msk.msra.mxu0 %vm594_vm0, %v483_v6  ;;  %v6476_v6 = vpop.permute.xlu0 %591 }
  0xf6   : > { %5300 = vmatpush3.xpose.msk.msra.mxu1 %vm594_vm0, %v515_v7  ;;  %5189 = vmatprep.mubr.msk.f32.mxu0 %vm594_vm0, %v5901_v45 }
  0xf7   : > { %5237 = vmatprep.mubr.msk.f32.mxu1 %vm594_vm0, %v5901_v45  ;;  %5253 = vmatprep.subr.msk.mxu0 %vm594_vm0, %v498_v8 }
  0xf8   : > { %5301 = vmatprep.subr.msk.mxu1 %vm594_vm0, %v530_v9  ;;  %5190 = vmatmul.mubr.msk.f32.gmra.mxu0 %vm594_vm0, %v5901_v45  ;;  %v6482_v9 = vpop.permute.xlu1 %581 }
  0xf9   : > { %5238 = vmatmul.mubr.msk.f32.gmra.mxu1 %vm594_vm0, %v5901_v45  ;;  %5254 = vmatpush3.xpose.msk.msra.mxu0 %vm594_vm0, %v482_v10 }
  0xfa   : > { %5302 = vmatpush3.xpose.msk.msra.mxu1 %vm594_vm0, %v514_v11  ;;  %5255 = vmatprep.subr.msk.mxu0 %vm594_vm0, %v497_v12 }
  0xfb   : > { %5303 = vmatprep.subr.msk.mxu1 %vm594_vm0, %v529_v13  ;;  %5271 = vmatprep.mubr.msk.f32.mxu0 %vm594_vm0, %v5443_v19 }
  0xfc   : > { %5319 = vmatprep.mubr.msk.f32.mxu1 %vm594_vm0, %v5443_v19 }
  0xfd   : > { %5256 = vmatpush3.xpose.msk.msra.mxu0 %vm594_vm0, %v481_v14 }
  0xfe   : > { %5304 = vmatpush3.xpose.msk.msra.mxu1 %vm594_vm0, %v513_v16  ;;  %5257 = vmatprep.subr.msk.mxu0 %vm594_vm0, %v496_v17  ;;  %v6498_v16 = vpop.permute.xlu1 %576 }
  0xff   : > { %5305 = vmatprep.subr.msk.mxu1 %vm594_vm0, %v528_v18 }
 0x101   : > { %5258 = vmatpush3.xpose.msk.msra.mxu0 %vm594_vm0, %v480_v21 }
 0x102   : > { %5306 = vmatpush3.xpose.msk.msra.mxu1 %vm594_vm0, %v512_v22  ;;  %5259 = vmatprep.subr.msk.mxu0 %vm594_vm0, %v495_v23  ;;  %v5508_v23 = vmov 0.0  }
 0x103   : > { %5307 = vmatprep.subr.msk.mxu1 %vm594_vm0, %v527_v24 }
 0x105   : > { %5260 = vmatpush3.xpose.msk.msra.mxu0 %vm594_vm0, %v479_v26 }
 0x106   : > { %5308 = vmatpush3.xpose.msk.msra.mxu1 %vm594_vm0, %v511_v27  ;;  %5261 = vmatprep.subr.msk.mxu0 %vm594_vm0, %v494_v28 }
 0x107   : > { %5309 = vmatprep.subr.msk.mxu1 %vm594_vm0, %v526_v29 }
 0x109   : > { %5262 = vmatpush3.xpose.msk.msra.mxu0 %vm594_vm0, %v478_v31 }
 0x10a   : > { %5310 = vmatpush3.xpose.msk.msra.mxu1 %vm594_vm0, %v510_v32  ;;  %5263 = vmatprep.subr.msk.mxu0 %vm594_vm0, %v493_v33 }
 0x10b   : > { %5311 = vmatprep.subr.msk.mxu1 %vm594_vm0, %v525_v34 }
 0x10d   : > { %5264 = vmatpush3.xpose.msk.msra.mxu0 %vm594_vm0, %v477_v36 }
 0x10e   : > { %5312 = vmatpush3.xpose.msk.msra.mxu1 %vm594_vm0, %v509_v37  ;;  %5265 = vmatprep.subr.msk.mxu0 %vm594_vm0, %v492_v38 }
 0x10f   : > { %5313 = vmatprep.subr.msk.mxu1 %vm594_vm0, %v524_v39 }
 0x111   : > { %5266 = vmatpush3.xpose.msk.msra.mxu0 %vm594_vm0, %v476_v41 }
 0x112   : > { %5314 = vmatpush3.xpose.msk.msra.mxu1 %vm594_vm0, %v508_v42  ;;  %5267 = vmatprep.subr.msk.mxu0 %vm594_vm0, %v491_v43 }
 0x113   : > { %5315 = vmatprep.subr.msk.mxu1 %vm594_vm0, %v523_v44 }
 0x115   : > { %5268 = vmatpush3.xpose.msk.msra.mxu0 %vm594_vm0, %v475_v46 }
 0x116   : > { %5316 = vmatpush3.xpose.msk.msra.mxu1 %vm594_vm0, %v507_v47  ;;  %5269 = vmatprep.subr.msk.mxu0 %vm594_vm0, %v490_v48  ;;  %v6522_v47 = vpop.permute.xlu1 %566 }
 0x117   : > { %5317 = vmatprep.subr.msk.mxu1 %vm594_vm0, %v522_v49 }
 0x119   : > { %5270 = vmatpush3.xpose.msk.msra.mxu0 %vm594_vm0, %v474_v50 }
 0x11a   : > { %5318 = vmatpush3.xpose.msk.msra.mxu1 %vm594_vm0, %v506_v51 }
 0x11c   : > { %v6405_v1 = vpop.f32.mrf.mxu0  ;;  %5272 = vmatmul.mubr.msk.f32.vlgmr.msra.gmra.mxu0 %vm594_vm0, %v5443_v19 }
 0x11d   : > { %v6407_v52 = vpop.f32.mrf.mxu1  ;;  %5320 = vmatmul.mubr.msk.f32.vlgmr.msra.gmra.mxu1 %vm594_vm0, %v5443_v19  ;;  %5273 = vmatprep.mubr.msk.f32.mxu0 %vm594_vm0, %v5775_v15 }
 0x11e   : > { %5321 = vmatprep.mubr.msk.f32.mxu1 %vm594_vm0, %v5775_v15  ;;  %v6415_v53 = vpop.f32.mrf.mxu0 }
 0x11f   : > { %v6417_v54 = vpop.f32.mrf.mxu1 }
 0x120   : > { %v6419_v55 = vpop.f32.mrf.mxu0  ;;  %5274 = vmatmul.mubr.msk.f32.gmra.mxu0 %vm594_vm0, %v5444_v57 }
 0x121   : > { %v6421_v56 = vpop.f32.mrf.mxu1  ;;  %5322 = vmatmul.mubr.msk.f32.gmra.mxu1 %vm594_vm0, %v5444_v57  ;;  %5275 = vmatprep.mubr.msk.f32.mxu0 %vm594_vm0, %v5796_v20 }
 0x122   : > { %5323 = vmatprep.mubr.msk.f32.mxu1 %vm594_vm0, %v5796_v20  ;;  %v6432_v15 = vpop.f32.mrf.mxu0 }
 0x123   : > { %v6434_v58 = vpop.f32.mrf.mxu1 }
 0x124   : > { %v6436_v59 = vpop.f32.mrf.mxu0  ;;  %5276 = vmatmul.mubr.msk.f32.gmra.mxu0 %vm594_vm0, %v5796_v20 }
 0x125   : > { %v6438_v60 = vpop.f32.mrf.mxu1  ;;  %5324 = vmatmul.mubr.msk.f32.gmra.mxu1 %vm594_vm0, %v5796_v20  ;;  %5277 = vmatprep.mubr.msk.f32.mxu0 %vm594_vm0, %v5817_v25 }
 0x126   : > { %5325 = vmatprep.mubr.msk.f32.mxu1 %vm594_vm0, %v5817_v25  ;;  %v6448_v61 = vpop.f32.mrf.mxu0 }
 0x127   : > { %v6450_v62 = vpop.f32.mrf.mxu1 }
 0x128   : > { %v6452_v63 = vpop.f32.mrf.mxu0  ;;  %5278 = vmatmul.mubr.msk.f32.gmra.mxu0 %vm594_vm0, %v5817_v25 }
 0x129   : > { %v6454_v0 = vpop.f32.mrf.mxu1  ;;  %5326 = vmatmul.mubr.msk.f32.gmra.mxu1 %vm594_vm0, %v5817_v25  ;;  %5279 = vmatprep.mubr.msk.f32.mxu0 %vm594_vm0, %v5838_v30 }
 0x12a   : > { %5327 = vmatprep.mubr.msk.f32.mxu1 %vm594_vm0, %v5838_v30  ;;  %v6464_v20 = vpop.f32.mrf.mxu0 }
 0x12b   : > { %v6466_v2 = vpop.f32.mrf.mxu1 }
 0x12c   : > { %v1477_v3 = vpop.f32.mrf.mxu0  ;;  %5280 = vmatmul.mubr.msk.f32.gmra.mxu0 %vm594_vm0, %v5838_v30 }
 0x12d   : > { %v1590_v4 = vpop.f32.mrf.mxu1  ;;  %5328 = vmatmul.mubr.msk.f32.gmra.mxu1 %vm594_vm0, %v5838_v30  ;;  %5281 = vmatprep.mubr.msk.f32.mxu0 %vm594_vm0, %v5859_v35  ;;  %v1478_v48 = vadd.f32 %v1477_v3, %v6498_v16 }
 0x12e   : > { %5329 = vmatprep.mubr.msk.f32.mxu1 %vm594_vm0, %v5859_v35  ;;  %v1479_v25 = vpop.f32.mrf.mxu0  ;;  %v1591_v49 = vadd.f32 %v1590_v4, %v6498_v16 }
 0x12f   : > { %v1592_v5 = vpop.f32.mrf.mxu1  ;;  %v1480_v24 = vadd.f32 %v1479_v25, %v6498_v16 }
 0x130   : > { %v1483_v7 = vpop.f32.mrf.mxu0  ;;  %5282 = vmatmul.mubr.msk.f32.gmra.mxu0 %vm594_vm0, %v5859_v35  ;;  %v1593_v26 = vadd.f32 %v1592_v5, %v6498_v16 }
 0x131   : > { %v1596_v8 = vpop.f32.mrf.mxu1  ;;  %5330 = vmatmul.mubr.msk.f32.gmra.mxu1 %vm594_vm0, %v5859_v35  ;;  %5283 = vmatprep.mubr.msk.f32.mxu0 %vm594_vm0, %v5880_v40  ;;  %v6496_v35 = vpop.permute.xlu0 %586  ;;  %v1484_v36 = vadd.f32 %v1483_v7, %v6482_v9 }
 0x132   : > { %5331 = vmatprep.mubr.msk.f32.mxu1 %vm594_vm0, %v5880_v40  ;;  %v1485_v30 = vpop.f32.mrf.mxu0  ;;  %v1597_v37 = vadd.f32 %v1596_v8, %v6482_v9 }
 0x133   : > { %v1598_v10 = vpop.f32.mrf.mxu1  ;;  %v1486_v31 = vadd.f32 %v1485_v30, %v6482_v9  ;;  %v2371_v8 = vmax.f32 %v1484_v36, 0.0  ;;  %v6598_v36 = vld [vmem:[%s7571_s3 + $0x18] sm:$0xff] }
 0x134   : > { %v1489_v11 = vpop.f32.mrf.mxu0  ;;  %5284 = vmatmul.mubr.msk.f32.gmra.mxu0 %vm594_vm0, %v5880_v40  ;;  %v1599_v32 = vadd.f32 %v1598_v10, %v6482_v9  ;;  %v2373_v30 = vmax.f32 %v1597_v37, 0.0  ;;  %v1468_v10 = vadd.f32 %v6448_v61, %v6522_v47 }
 0x135   : > { %v1602_v12 = vpop.f32.mrf.mxu1  ;;  %5332 = vmatmul.mubr.msk.f32.gmra.mxu1 %vm594_vm0, %v5880_v40  ;;  %5285 = vmatprep.mubr.msk.f32.mxu0 %vm594_vm0, %v5901_v45  ;;  %v6520_v41 = vpop.permute.xlu0 %571  ;;  %v2372_v57 = vmax.f32 %v1486_v31, 0.0 }
 0x136   : > { %5333 = vmatprep.mubr.msk.f32.mxu1 %vm594_vm0, %v5901_v45  ;;  %v1491_v13 = vpop.f32.mrf.mxu0  ;;  %v1603_v29 = vadd.f32 %v1602_v12, %v6496_v35  ;;  %v2374_v25 = vmax.f32 %v1599_v32, 0.0  ;;  %v1474_v5 = vadd.f32 %v6464_v20, %v6520_v41  ;;  %v1587_v7 = vadd.f32 %v6466_v2, %v6520_v41 }
 0x137   : > { %v1604_v14 = vpop.f32.mrf.mxu1  ;;  %v1492_v40 = vadd.f32 %v1491_v13, %v6496_v35  ;;  %v1472_v3 = vadd.f32 %v6452_v63, %v6520_v41  ;;  %v1585_v4 = vadd.f32 %v6454_v0, %v6520_v41  ;;  %v2356_v20 = vmax.f32 %v1480_v24, 0.0  ;;  %v6544_v0 = vpop.permute.xlu1 %556 }
 0x138   : > { %v1495_v17 = vpop.f32.mrf.mxu0  ;;  %5286 = vmatmul.mubr.msk.f32.gmra.mxu0 %vm594_vm0, %v5901_v45  ;;  %v1605_v22 = vadd.f32 %v1604_v14, %v6496_v35  ;;  %v2389_v51 = vmax.f32 %v1603_v29, 0.0  ;;  %v2358_v12 = vmax.f32 %v1593_v26, 0.0  ;;  %v1466_v2 = vadd.f32 %v6436_v59, %v6522_v47 }
 0x139   : > { %v1608_v18 = vpop.f32.mrf.mxu1  ;;  %5334 = vmatmul.mubr.msk.f32.gmra.mxu1 %vm594_vm0, %v5901_v45  ;;  %v1496_v19 = vadd.f32 %v1495_v17, %v6476_v6  ;;  %2564 = vmatprep.mubr.f32.mxu0 %v5508_v23  ;;  %v1490_v45 = vadd.f32 %v1489_v11, %v6496_v35  ;;  %v2388_v44 = vmax.f32 %v1492_v40, 0.0  ;;  %v1581_v11 = vadd.f32 %v6450_v62, %v6522_v47  ;;  %v6542_v17 = vpop.permute.xlu0 %561 }
 0x13a   : > { %v1609_v21 = vadd.f32 %v1608_v18, %v6476_v6  ;;  %2677 = vmatprep.mubr.f32.mxu1 %v5508_v23  ;;  %v1497_v27 = vpop.f32.mrf.mxu0  ;;  %v2390_v46 = vmax.f32 %v1605_v22, 0.0  ;;  %v1579_v13 = vadd.f32 %v6438_v60, %v6522_v47  ;;  %v2355_v63 = vmax.f32 %v1478_v48, 0.0  ;;  %v6632_v48 = vld [vmem:[%s7571_s3 + $0x28] sm:$0xff] }
 0x13b   : > { %v1610_v28 = vpop.f32.mrf.mxu1  ;;  %v1498_v33 = vadd.f32 %v1497_v27, %v6476_v6  ;;  %v2403_v38 = vmax.f32 %v1496_v19, 0.0  ;;  %v2387_v50 = vmax.f32 %v1490_v45, 0.0  ;;  %v2357_v14 = vmax.f32 %v1591_v49, 0.0 }
 0x13c   : > { %v1611_v34 = vadd.f32 %v1610_v28, %v6476_v6  ;;  %v2405_v39 = vmax.f32 %v1609_v21, 0.0  ;;  %v2340_v61 = vmax.f32 %v1474_v5, 0.0  ;;  %v2342_v62 = vmax.f32 %v1587_v7, 0.0 }
 0x13d   : > { %v2404_v42 = vmax.f32 %v1498_v33, 0.0  ;;  %v2339_v18 = vmax.f32 %v1472_v3, 0.0  ;;  %v2341_v40 = vmax.f32 %v1585_v4, 0.0  ;;  %v2324_v59 = vmax.f32 %v1468_v10, 0.0  ;;  %v6666_v3 = vld [vmem:[%s7571_s3 + $0x38] sm:$0xff] }
 0x13e   : > { %v2406_v43 = vmax.f32 %v1611_v34, 0.0  ;;  %v2326_v19 = vmax.f32 %v1581_v11, 0.0  ;;  %v1462_v60 = vadd.f32 %v6432_v15, %v6542_v17  ;;  %v1575_v21 = vadd.f32 %v6434_v58, %v6542_v17  ;;  %v6587_v34 = vld [vmem:[%s7571_s3 + $0x10] sm:$0xff] }
 0x13f   : > { %2516 = vmatprep.subr.mxu0 %v2404_v42  ;;  %v2323_v22 = vmax.f32 %v1466_v2, 0.0  ;;  %v2325_v24 = vmax.f32 %v1579_v13, 0.0  ;;  %v1460_v26 = vadd.f32 %v6419_v55, %v6542_v17  ;;  %v1573_v27 = vadd.f32 %v6421_v56, %v6542_v17 }
 0x140   : > { %2629 = vmatprep.subr.mxu1 %v2406_v43  ;;  %2517 = vmatpush1.msra.mxu0 %v2403_v38  ;;  %v1456_v28 = vadd.f32 %v6415_v53, %v6544_v0  ;;  %v1569_v45 = vadd.f32 %v6417_v54, %v6544_v0  ;;  %v1454_v15 = vadd.f32 %v6405_v1, %v6544_v0  ;;  %v2308_v55 = vmax.f32 %v1462_v60, 0.0  ;;  %v6565_v1 = vld [vmem:[%s7571_s3] sm:$0xff] }
 0x141   : > { %2630 = vmatpush1.msra.mxu1 %v2405_v39  ;;  %2518 = vmatprep.subr.mxu0 %v2388_v44  ;;  %v1567_v58 = vadd.f32 %v6407_v52, %v6544_v0  ;;  %v2310_v56 = vmax.f32 %v1575_v21, 0.0  ;;  %v2307_v53 = vmax.f32 %v1460_v26, 0.0  ;;  %v2309_v29 = vmax.f32 %v1573_v27, 0.0  ;;  %v6576_v52 = vld [vmem:[%s7571_s3 + $0x8] sm:$0xff]  ;;  %v6613_v39 = vld [vmem:[%s7571_s3 + $0x20] sm:$0xff] }
 0x142   : > { %2631 = vmatprep.subr.mxu1 %v2390_v46  ;;  %2519 = vmatpush1.msra.mxu0 %v2387_v50  ;;  %v2292_v31 = vmax.f32 %v1456_v28, 0.0  ;;  %v2294_v54 = vmax.f32 %v1569_v45, 0.0  ;;  %v2291_v32 = vmax.f32 %v1454_v15, 0.0 }
 0x143   : > { %2632 = vmatpush1.msra.mxu1 %v2389_v51  ;;  %2520 = vmatprep.subr.mxu0 %v2372_v57  ;;  %v2293_v33 = vmax.f32 %v1567_v58, 0.0 }
 0x144   : > { %2633 = vmatprep.subr.mxu1 %v2374_v25  ;;  %2521 = vmatpush1.msra.mxu0 %v2371_v8  ;;  %v6651_v25 = vld [vmem:[%s7571_s3 + $0x30] sm:$0xff] }
 0x145   : > { %2634 = vmatpush1.msra.mxu1 %v2373_v30  ;;  %2522 = vmatprep.subr.mxu0 %v2356_v20 }
 0x146   : > { %2635 = vmatprep.subr.mxu1 %v2358_v12  ;;  %2523 = vmatpush1.msra.mxu0 %v2355_v63 }
 0x147   : > { %2636 = vmatpush1.msra.mxu1 %v2357_v14  ;;  %2524 = vmatprep.subr.mxu0 %v2340_v61 }
 0x148   : > { %2637 = vmatprep.subr.mxu1 %v2342_v62  ;;  %2525 = vmatpush1.msra.mxu0 %v2339_v18 }
 0x149   : > { %2638 = vmatpush1.msra.mxu1 %v2341_v40  ;;  %2526 = vmatprep.subr.mxu0 %v2324_v59 }
 0x14a   : > { %2639 = vmatprep.subr.mxu1 %v2326_v19  ;;  %2527 = vmatpush1.msra.mxu0 %v2323_v22 }
 0x14b   : > { %2640 = vmatpush1.msra.mxu1 %v2325_v24  ;;  %2528 = vmatprep.subr.mxu0 %v2308_v55 }
 0x14c   : > { %2641 = vmatprep.subr.mxu1 %v2310_v56  ;;  %2529 = vmatpush1.msra.mxu0 %v2307_v53 }
 0x14d   : > { %2642 = vmatpush1.msra.mxu1 %v2309_v29  ;;  %2530 = vmatprep.subr.mxu0 %v2292_v31 }
 0x14e   : > { %2643 = vmatprep.subr.mxu1 %v2294_v54  ;;  %2531 = vmatpush1.msra.mxu0 %v2291_v32 }
 0x14f   : > { %2644 = vmatpush1.msra.mxu1 %v2293_v33  ;;  %4873 = vmatmul.mubr.msk.f32.vlgmr.msra.gmra.mxu0 %vm2475_vm1, %v6565_v1 }
 0x150   : > { %4881 = vmatmul.mubr.msk.f32.vlgmr.msra.gmra.mxu1 %vm2475_vm1, %v6565_v1  ;;  %2570 = vmatprep.mubr.f32.mxu0 %v5508_v23 }
 0x151   : > { %2683 = vmatprep.mubr.f32.mxu1 %v5508_v23 }
 0x153   : > { %4874 = vmatmul.mubr.msk.f32.gmra.mxu0 %vm2475_vm1, %v6576_v52 }
 0x154   : > { %4882 = vmatmul.mubr.msk.f32.gmra.mxu1 %vm2475_vm1, %v6576_v52  ;;  %2576 = vmatprep.mubr.f32.mxu0 %v5508_v23 }
 0x155   : > { %2689 = vmatprep.mubr.f32.mxu1 %v5508_v23 }
 0x157   : > { %4875 = vmatmul.mubr.msk.f32.gmra.mxu0 %vm2475_vm1, %v6587_v34 }
 0x158   : > { %4883 = vmatmul.mubr.msk.f32.gmra.mxu1 %vm2475_vm1, %v6587_v34  ;;  %2582 = vmatprep.mubr.f32.mxu0 %v5508_v23 }
 0x159   : > { %2695 = vmatprep.mubr.f32.mxu1 %v5508_v23 }
 0x15b   : > { %4876 = vmatmul.mubr.msk.f32.gmra.mxu0 %vm2475_vm1, %v6598_v36 }
 0x15c   : > { %4884 = vmatmul.mubr.msk.f32.gmra.mxu1 %vm2475_vm1, %v6598_v36  ;;  %v6604_v37 = vpop.f32.mrf.mxu0  ;;  %2588 = vmatprep.mubr.f32.mxu0 %v5508_v23 }
 0x15d   : > { %v6606_v38 = vpop.f32.mrf.mxu1  ;;  %2701 = vmatprep.mubr.f32.mxu1 %v5508_v23 }
 0x15e   : > { %v6615_v42 = vpop.f32.mrf.mxu0 }
 0x15f   : > { %v6617_v43 = vpop.f32.mrf.mxu1  ;;  %4877 = vmatmul.mubr.msk.f32.gmra.mxu0 %vm2475_vm1, %v6613_v39 }
 0x160   : > { %4885 = vmatmul.mubr.msk.f32.gmra.mxu1 %vm2475_vm1, %v6613_v39  ;;  %v6623_v44 = vpop.f32.mrf.mxu0  ;;  %2594 = vmatprep.mubr.f32.mxu0 %v5508_v23 }
 0x161   : > { %v6625_v46 = vpop.f32.mrf.mxu1  ;;  %2707 = vmatprep.mubr.f32.mxu1 %v5508_v23 }
 0x162   : > { %v6634_v49 = vpop.f32.mrf.mxu0 }
 0x163   : > { %v6636_v50 = vpop.f32.mrf.mxu1  ;;  %4878 = vmatmul.mubr.msk.f32.gmra.mxu0 %vm2475_vm1, %v6632_v48 }
 0x164   : > { %4886 = vmatmul.mubr.msk.f32.gmra.mxu1 %vm2475_vm1, %v6632_v48  ;;  %v6642_v51 = vpop.f32.mrf.mxu0  ;;  %2600 = vmatprep.mubr.f32.mxu0 %v5508_v23 }
 0x165   : > { %v6644_v57 = vpop.f32.mrf.mxu1  ;;  %2713 = vmatprep.mubr.f32.mxu1 %v5508_v23 }
 0x166   : > { %v6653_v5 = vpop.f32.mrf.mxu0 }
 0x167   : > { %v6655_v7 = vpop.f32.mrf.mxu1  ;;  %4879 = vmatmul.mubr.msk.f32.gmra.mxu0 %vm2475_vm1, %v6651_v25 }
 0x168   : > { %4887 = vmatmul.mubr.msk.f32.gmra.mxu1 %vm2475_vm1, %v6651_v25  ;;  %v1697_v8 = vpop.f32.mrf.mxu0  ;;  %2606 = vmatprep.mubr.f32.mxu0 %v5508_v23 }
 0x169   : > { %v1810_v30 = vpop.f32.mrf.mxu1  ;;  %2719 = vmatprep.mubr.f32.mxu1 %v5508_v23 }
 0x16a   : > { %v1699_v4 = vpop.f32.mrf.mxu0 }
 0x16b   : > { %v1812_v10 = vpop.f32.mrf.mxu1  ;;  %4880 = vmatmul.mubr.msk.f32.gmra.mxu0 %vm2475_vm1, %v6666_v3 }
 0x16c   : > { %4888 = vmatmul.mubr.msk.f32.gmra.mxu1 %vm2475_vm1, %v6666_v3  ;;  %v1703_v11 = vpop.f32.mrf.mxu0  ;;  %2790 = vmatprep.mubr.f32.mxu0 %v5508_v23 }
 0x16d   : > { %v1816_v20 = vpop.f32.mrf.mxu1  ;;  %2903 = vmatprep.mubr.f32.mxu1 %v5508_v23 }
 0x16e   : > { %v1705_v12 = vpop.f32.mrf.mxu0 }
 0x16f   : > { %v1818_v2 = vpop.f32.mrf.mxu1  ;;  %v1706_v27 = vadd.f32 %v1705_v12, %v6498_v16 }
 0x170   : > { %v1709_v13 = vpop.f32.mrf.mxu0  ;;  %v1819_v28 = vadd.f32 %v1818_v2, %v6498_v16 }
 0x171   : > { %v1822_v63 = vpop.f32.mrf.mxu1  ;;  %v1710_v54 = vadd.f32 %v1709_v13, %v6482_v9 }
 0x172   : > { %v1711_v14 = vpop.f32.mrf.mxu0  ;;  %v1823_v32 = vadd.f32 %v1822_v63, %v6482_v9  ;;  %v1698_v63 = vadd.f32 %v1697_v8, %v6520_v41  ;;  %v1805_v8 = vadd.f32 %v6644_v57, %v6522_v47 }
 0x173   : > { %v1824_v61 = vpop.f32.mrf.mxu1  ;;  %v1712_v56 = vadd.f32 %v1711_v14, %v6482_v9  ;;  %v1817_v14 = vadd.f32 %v1816_v20, %v6498_v16  ;;  %v2360_v20 = vmax.f32 %v1706_v27, 0.0  ;;  %v1688_v27 = vadd.f32 %v6634_v49, %v6542_v17 }
 0x174   : > { %v1715_v62 = vpop.f32.mrf.mxu0  ;;  %v1825_v53 = vadd.f32 %v1824_v61, %v6482_v9  ;;  %v1682_v49 = vadd.f32 %v6615_v42, %v6544_v0 }
 0x175   : > { %v1828_v18 = vpop.f32.mrf.mxu1  ;;  %v1716_v45 = vadd.f32 %v1715_v62, %v6496_v35 }
 0x176   : > { %v1717_v40 = vpop.f32.mrf.mxu0  ;;  %v1829_v15 = vadd.f32 %v1828_v18, %v6496_v35  ;;  %v2378_v13 = vmax.f32 %v1825_v53, 0.0  ;;  %v1686_v53 = vadd.f32 %v6623_v44, %v6542_v17  ;;  %v1793_v44 = vadd.f32 %v6606_v38, %v6544_v0 }
 0x177   : > { %v1830_v59 = vpop.f32.mrf.mxu1  ;;  %v1718_v21 = vadd.f32 %v1717_v40, %v6496_v35  ;;  %v2296_v42 = vmax.f32 %v1682_v49, 0.0 }
 0x178   : > { %v1721_v19 = vpop.f32.mrf.mxu0  ;;  %v1831_v22 = vadd.f32 %v1830_v59, %v6496_v35  ;;  %v1704_v59 = vadd.f32 %v1703_v11, %v6498_v16  ;;  %v2393_v61 = vmax.f32 %v1829_v15, 0.0  ;;  %v1694_v11 = vadd.f32 %v6653_v5, %v6522_v47 }
 0x179   : > { %v1834_v60 = vpop.f32.mrf.mxu1  ;;  %v1722_v24 = vadd.f32 %v1721_v19, %v6476_v6  ;;  %v2392_v2 = vmax.f32 %v1718_v21, 0.0  ;;  %v2391_v19 = vmax.f32 %v1716_v45, 0.0  ;;  %v1811_v21 = vadd.f32 %v1810_v30, %v6520_v41 }
 0x17a   : > { %v1835_v26 = vadd.f32 %v1834_v60, %v6476_v6  ;;  %v1723_v58 = vpop.f32.mrf.mxu0  ;;  %v2394_v62 = vmax.f32 %v1831_v22, 0.0  ;;  %v1700_v60 = vadd.f32 %v1699_v4, %v6520_v41  ;;  %v2375_v22 = vmax.f32 %v1710_v54, 0.0 }
 0x17b   : > { %v1836_v55 = vpop.f32.mrf.mxu1  ;;  %v1724_v29 = vadd.f32 %v1723_v58, %v6476_v6  ;;  %v2407_v33 = vmax.f32 %v1722_v24, 0.0  ;;  %v1813_v58 = vadd.f32 %v1812_v10, %v6520_v41  ;;  %v2377_v24 = vmax.f32 %v1823_v32, 0.0 }
 0x17c   : > { %v1837_v31 = vadd.f32 %v1836_v55, %v6476_v6  ;;  %v2409_v12 = vmax.f32 %v1835_v26, 0.0  ;;  %v2376_v55 = vmax.f32 %v1712_v56, 0.0  ;;  %v1807_v4 = vadd.f32 %v6655_v7, %v6522_v47 }
 0x17d   : > { %v2408_v40 = vmax.f32 %v1724_v29, 0.0  ;;  %v2362_v10 = vmax.f32 %v1819_v28, 0.0  ;;  %v1692_v26 = vadd.f32 %v6642_v51, %v6522_v47  ;;  %v2359_v30 = vmax.f32 %v1704_v59, 0.0 }
 0x17e   : > { %v2410_v18 = vmax.f32 %v1837_v31, 0.0  ;;  %v2361_v45 = vmax.f32 %v1817_v14, 0.0  ;;  %v2344_v15 = vmax.f32 %v1700_v60, 0.0  ;;  %v2346_v56 = vmax.f32 %v1813_v58, 0.0 }
 0x17f   : > { %2742 = vmatprep.subr.mxu0 %v2408_v40  ;;  %v2343_v5 = vmax.f32 %v1698_v63, 0.0  ;;  %v2345_v7 = vmax.f32 %v1811_v21, 0.0  ;;  %v1801_v51 = vadd.f32 %v6636_v50, %v6542_v17  ;;  %v2328_v28 = vmax.f32 %v1694_v11, 0.0 }
 0x180   : > { %2855 = vmatprep.subr.mxu1 %v2410_v18  ;;  %2743 = vmatpush1.msra.mxu0 %v2407_v33  ;;  %v2330_v57 = vmax.f32 %v1807_v4, 0.0  ;;  %v1799_v29 = vadd.f32 %v6625_v46, %v6542_v17  ;;  %v2327_v31 = vmax.f32 %v1692_v26, 0.0  ;;  %v2329_v54 = vmax.f32 %v1805_v8, 0.0 }
 0x181   : > { %2856 = vmatpush1.msra.mxu1 %v2409_v12  ;;  %2744 = vmatprep.subr.mxu0 %v2392_v2  ;;  %v1795_v50 = vadd.f32 %v6617_v43, %v6544_v0  ;;  %v1680_v32 = vadd.f32 %v6604_v37, %v6544_v0  ;;  %v2312_v46 = vmax.f32 %v1688_v27, 0.0  ;;  %v2314_v33 = vmax.f32 %v1801_v51, 0.0 }
 0x182   : > { %2857 = vmatprep.subr.mxu1 %v2394_v62  ;;  %2745 = vmatpush1.msra.mxu0 %v2391_v19  ;;  %v2311_v12 = vmax.f32 %v1686_v53, 0.0  ;;  %v2313_v2 = vmax.f32 %v1799_v29, 0.0  ;;  %v2297_v40 = vmax.f32 %v1793_v44, 0.0 }
 0x183   : > { %2858 = vmatpush1.msra.mxu1 %v2393_v61  ;;  %2746 = vmatprep.subr.mxu0 %v2376_v55  ;;  %v2298_v43 = vmax.f32 %v1795_v50, 0.0  ;;  %v2295_v62 = vmax.f32 %v1680_v32, 0.0 }
 0x184   : > { %2859 = vmatprep.subr.mxu1 %v2378_v13  ;;  %2747 = vmatpush1.msra.mxu0 %v2375_v22 }
 0x185   : > { %2860 = vmatpush1.msra.mxu1 %v2377_v24  ;;  %2748 = vmatprep.subr.mxu0 %v2360_v20 }
 0x186   : > { %2861 = vmatprep.subr.mxu1 %v2362_v10  ;;  %2749 = vmatpush1.msra.mxu0 %v2359_v30 }
 0x187   : > { %2862 = vmatpush1.msra.mxu1 %v2361_v45  ;;  %2750 = vmatprep.subr.mxu0 %v2344_v15 }
 0x188   : > { %2863 = vmatprep.subr.mxu1 %v2346_v56  ;;  %2751 = vmatpush1.msra.mxu0 %v2343_v5 }
 0x189   : > { %2864 = vmatpush1.msra.mxu1 %v2345_v7  ;;  %2752 = vmatprep.subr.mxu0 %v2328_v28 }
 0x18a   : > { %2865 = vmatprep.subr.mxu1 %v2330_v57  ;;  %2753 = vmatpush1.msra.mxu0 %v2327_v31 }
 0x18b   : > { %2866 = vmatpush1.msra.mxu1 %v2329_v54  ;;  %2754 = vmatprep.subr.mxu0 %v2312_v46 }
 0x18c   : > { %2867 = vmatprep.subr.mxu1 %v2314_v33  ;;  %2755 = vmatpush1.msra.mxu0 %v2311_v12 }
 0x18d   : > { %2868 = vmatpush1.msra.mxu1 %v2313_v2  ;;  %2756 = vmatprep.subr.mxu0 %v2296_v42 }
 0x18e   : > { %2869 = vmatprep.subr.mxu1 %v2298_v43  ;;  %2757 = vmatpush1.msra.mxu0 %v2295_v62 }
 0x18f   : > { %2870 = vmatpush1.msra.mxu1 %v2297_v40  ;;  %4889 = vmatmul.mubr.msk.f32.vlgmr.msra.gmra.mxu0 %vm2475_vm1, %v6565_v1 }
 0x190   : > { %4897 = vmatmul.mubr.msk.f32.vlgmr.msra.gmra.mxu1 %vm2475_vm1, %v6565_v1  ;;  %2796 = vmatprep.mubr.f32.mxu0 %v5508_v23 }
 0x191   : > { %2909 = vmatprep.mubr.f32.mxu1 %v5508_v23 }
 0x193   : > { %4890 = vmatmul.mubr.msk.f32.gmra.mxu0 %vm2475_vm1, %v6576_v52 }
 0x194   : > { %4898 = vmatmul.mubr.msk.f32.gmra.mxu1 %vm2475_vm1, %v6576_v52  ;;  %2802 = vmatprep.mubr.f32.mxu0 %v5508_v23 }
 0x195   : > { %2915 = vmatprep.mubr.f32.mxu1 %v5508_v23 }
 0x197   : > { %4891 = vmatmul.mubr.msk.f32.gmra.mxu0 %vm2475_vm1, %v6587_v34 }
 0x198   : > { %4899 = vmatmul.mubr.msk.f32.gmra.mxu1 %vm2475_vm1, %v6587_v34  ;;  %2808 = vmatprep.mubr.f32.mxu0 %v5508_v23 }
 0x199   : > { %2921 = vmatprep.mubr.f32.mxu1 %v5508_v23 }
 0x19b   : > { %4892 = vmatmul.mubr.msk.f32.gmra.mxu0 %vm2475_vm1, %v6598_v36 }
 0x19c   : > { %4900 = vmatmul.mubr.msk.f32.gmra.mxu1 %vm2475_vm1, %v6598_v36  ;;  %v6740_v37 = vpop.f32.mrf.mxu0  ;;  %2814 = vmatprep.mubr.f32.mxu0 %v5508_v23 }
 0x19d   : > { %v6742_v38 = vpop.f32.mrf.mxu1  ;;  %2927 = vmatprep.mubr.f32.mxu1 %v5508_v23 }
 0x19e   : > { %v6746_v18 = vpop.f32.mrf.mxu0 }
 0x19f   : > { %v6748_v59 = vpop.f32.mrf.mxu1  ;;  %4893 = vmatmul.mubr.msk.f32.gmra.mxu0 %vm2475_vm1, %v6613_v39 }
 0x1a0   : > { %4901 = vmatmul.mubr.msk.f32.gmra.mxu1 %vm2475_vm1, %v6613_v39  ;;  %v6754_v14 = vpop.f32.mrf.mxu0  ;;  %2820 = vmatprep.mubr.f32.mxu0 %v5508_v23 }
 0x1a1   : > { %v6756_v19 = vpop.f32.mrf.mxu1  ;;  %2933 = vmatprep.mubr.f32.mxu1 %v5508_v23 }
 0x1a2   : > { %v6760_v61 = vpop.f32.mrf.mxu0 }
 0x1a3   : > { %v6762_v60 = vpop.f32.mrf.mxu1  ;;  %4894 = vmatmul.mubr.msk.f32.gmra.mxu0 %vm2475_vm1, %v6632_v48 }
 0x1a4   : > { %4902 = vmatmul.mubr.msk.f32.gmra.mxu1 %vm2475_vm1, %v6632_v48  ;;  %v6768_v58 = vpop.f32.mrf.mxu0  ;;  %2826 = vmatprep.mubr.f32.mxu0 %v5508_v23 }
 0x1a5   : > { %v6770_v55 = vpop.f32.mrf.mxu1  ;;  %2939 = vmatprep.mubr.f32.mxu1 %v5508_v23 }
 0x1a6   : > { %v6774_v13 = vpop.f32.mrf.mxu0 }
 0x1a7   : > { %v6776_v63 = vpop.f32.mrf.mxu1  ;;  %4895 = vmatmul.mubr.msk.f32.gmra.mxu0 %vm2475_vm1, %v6651_v25 }
 0x1a8   : > { %4903 = vmatmul.mubr.msk.f32.gmra.mxu1 %vm2475_vm1, %v6651_v25  ;;  %v1923_v21 = vpop.f32.mrf.mxu0  ;;  %2832 = vmatprep.mubr.f32.mxu0 %v5508_v23 }
 0x1a9   : > { %v2036_v22 = vpop.f32.mrf.mxu1  ;;  %2945 = vmatprep.mubr.f32.mxu1 %v5508_v23 }
 0x1aa   : > { %v1925_v24 = vpop.f32.mrf.mxu0 }
 0x1ab   : > { %v2038_v11 = vpop.f32.mrf.mxu1  ;;  %4896 = vmatmul.mubr.msk.f32.gmra.mxu0 %vm2475_vm1, %v6666_v3 }
 0x1ac   : > { %4904 = vmatmul.mubr.msk.f32.gmra.mxu1 %vm2475_vm1, %v6666_v3  ;;  %v1929_v4 = vpop.f32.mrf.mxu0  ;;  %3016 = vmatprep.mubr.f32.mxu0 %v5508_v23 }
 0x1ad   : > { %v2042_v20 = vpop.f32.mrf.mxu1  ;;  %3129 = vmatprep.mubr.f32.mxu1 %v5508_v23 }
 0x1ae   : > { %v1931_v10 = vpop.f32.mrf.mxu0 }
 0x1af   : > { %v2044_v26 = vpop.f32.mrf.mxu1 }
 0x1b0   : > { %v1935_v8 = vpop.f32.mrf.mxu0 }
 0x1b1   : > { %v2048_v30 = vpop.f32.mrf.mxu1  ;;  %v1936_v43 = vadd.f32 %v1935_v8, %v6482_v9  ;;  %v1926_v8 = vadd.f32 %v1925_v24, %v6520_v41  ;;  %v2033_v24 = vadd.f32 %v6776_v63, %v6522_v47  ;;  %v2027_v63 = vadd.f32 %v6762_v60, %v6542_v17 }
 0x1b2   : > { %v1937_v45 = vpop.f32.mrf.mxu0  ;;  %v2049_v62 = vadd.f32 %v2048_v30, %v6482_v9  ;;  %v2039_v30 = vadd.f32 %v2038_v11, %v6520_v41  ;;  %v2021_v60 = vadd.f32 %v6748_v59, %v6544_v0 }
 0x1b3   : > { %v2050_v15 = vpop.f32.mrf.mxu1  ;;  %v1938_v33 = vadd.f32 %v1937_v45, %v6482_v9  ;;  %v1930_v45 = vadd.f32 %v1929_v4, %v6498_v16 }
 0x1b4   : > { %v1941_v56 = vpop.f32.mrf.mxu0  ;;  %v2051_v12 = vadd.f32 %v2050_v15, %v6482_v9  ;;  %v2043_v15 = vadd.f32 %v2042_v20, %v6498_v16  ;;  %v2381_v4 = vmax.f32 %v2049_v62, 0.0  ;;  %v1920_v20 = vadd.f32 %v6774_v13, %v6522_v47 }
 0x1b5   : > { %v2054_v5 = vpop.f32.mrf.mxu1  ;;  %v1942_v44 = vadd.f32 %v1941_v56, %v6496_v35  ;;  %v1914_v13 = vadd.f32 %v6760_v61, %v6542_v17  ;;  %v1908_v61 = vadd.f32 %v6746_v18, %v6544_v0 }
 0x1b6   : > { %v1943_v7 = vpop.f32.mrf.mxu0  ;;  %v2055_v46 = vadd.f32 %v2054_v5, %v6496_v35 }
 0x1b7   : > { %v2056_v27 = vpop.f32.mrf.mxu1  ;;  %v1944_v54 = vadd.f32 %v1943_v7, %v6496_v35  ;;  %v2395_v5 = vmax.f32 %v1942_v44, 0.0  ;;  %v2350_v44 = vmax.f32 %v2039_v30, 0.0  ;;  %v2316_v62 = vmax.f32 %v1914_v13, 0.0 }
 0x1b8   : > { %v1947_v51 = vpop.f32.mrf.mxu0  ;;  %v2057_v49 = vadd.f32 %v2056_v27, %v6496_v35  ;;  %v1932_v27 = vadd.f32 %v1931_v10, %v6498_v16  ;;  %v2382_v10 = vmax.f32 %v2051_v12, 0.0  ;;  %v2332_v12 = vmax.f32 %v1920_v20, 0.0 }
 0x1b9   : > { %v2060_v28 = vpop.f32.mrf.mxu1  ;;  %v1948_v57 = vadd.f32 %v1947_v51, %v6476_v6  ;;  %v2045_v51 = vadd.f32 %v2044_v26, %v6498_v16  ;;  %v1924_v26 = vadd.f32 %v1923_v21, %v6520_v41  ;;  %v2031_v21 = vadd.f32 %v6770_v55, %v6522_v47 }
 0x1ba   : > { %v2061_v53 = vadd.f32 %v2060_v28, %v6476_v6  ;;  %v1949_v29 = vpop.f32.mrf.mxu0  ;;  %v2396_v28 = vmax.f32 %v1944_v54, 0.0  ;;  %v2398_v56 = vmax.f32 %v2057_v49, 0.0  ;;  %v2364_v54 = vmax.f32 %v1932_v27, 0.0 }
 0x1bb   : > { %v2062_v31 = vpop.f32.mrf.mxu1  ;;  %v1950_v50 = vadd.f32 %v1949_v29, %v6476_v6  ;;  %v2411_v40 = vmax.f32 %v1948_v57, 0.0  ;;  %v2397_v29 = vmax.f32 %v2055_v46, 0.0  ;;  %v2380_v57 = vmax.f32 %v1938_v33, 0.0 }
 0x1bc   : > { %v2063_v32 = vadd.f32 %v2062_v31, %v6476_v6  ;;  %v2413_v7 = vmax.f32 %v2061_v53, 0.0  ;;  %v2037_v53 = vadd.f32 %v2036_v22, %v6520_v41  ;;  %v2379_v31 = vmax.f32 %v1936_v43, 0.0 }
 0x1bd   : > { %v2412_v2 = vmax.f32 %v1950_v50, 0.0  ;;  %v2366_v11 = vmax.f32 %v2045_v51, 0.0  ;;  %v1918_v49 = vadd.f32 %v6768_v58, %v6522_v47  ;;  %v2363_v22 = vmax.f32 %v1930_v45, 0.0 }
 0x1be   : > { %v2414_v42 = vmax.f32 %v2063_v32, 0.0  ;;  %v2365_v50 = vmax.f32 %v2043_v15, 0.0  ;;  %v2348_v32 = vmax.f32 %v1926_v8, 0.0  ;;  %v1912_v58 = vadd.f32 %v6754_v14, %v6542_v17 }
 0x1bf   : > { %2968 = vmatprep.subr.mxu0 %v2412_v2  ;;  %v2025_v55 = vadd.f32 %v6756_v19, %v6542_v17  ;;  %v2347_v46 = vmax.f32 %v1924_v26, 0.0  ;;  %v2349_v33 = vmax.f32 %v2037_v53, 0.0  ;;  %v2334_v2 = vmax.f32 %v2033_v24, 0.0 }
 0x1c0   : > { %3081 = vmatprep.subr.mxu1 %v2414_v42  ;;  %2969 = vmatpush1.msra.mxu0 %v2411_v40  ;;  %v1906_v14 = vadd.f32 %v6740_v37, %v6544_v0  ;;  %v2019_v19 = vadd.f32 %v6742_v38, %v6544_v0  ;;  %v2331_v42 = vmax.f32 %v1918_v49, 0.0  ;;  %v2333_v43 = vmax.f32 %v2031_v21, 0.0 }
 0x1c1   : > { %3082 = vmatpush1.msra.mxu1 %v2413_v7  ;;  %2970 = vmatprep.subr.mxu0 %v2396_v28  ;;  %v2318_v40 = vmax.f32 %v2027_v63, 0.0  ;;  %v2315_v18 = vmax.f32 %v1912_v58, 0.0  ;;  %v2317_v59 = vmax.f32 %v2025_v55, 0.0  ;;  %v2300_v7 = vmax.f32 %v1908_v61, 0.0 }
 0x1c2   : > { %3083 = vmatprep.subr.mxu1 %v2398_v56  ;;  %2971 = vmatpush1.msra.mxu0 %v2395_v5  ;;  %v2302_v27 = vmax.f32 %v2021_v60, 0.0  ;;  %v2299_v37 = vmax.f32 %v1906_v14, 0.0  ;;  %v2301_v51 = vmax.f32 %v2019_v19, 0.0 }
 0x1c3   : > { %3084 = vmatpush1.msra.mxu1 %v2397_v29  ;;  %2972 = vmatprep.subr.mxu0 %v2380_v57 }
 0x1c4   : > { %3085 = vmatprep.subr.mxu1 %v2382_v10  ;;  %2973 = vmatpush1.msra.mxu0 %v2379_v31 }
 0x1c5   : > { %3086 = vmatpush1.msra.mxu1 %v2381_v4  ;;  %2974 = vmatprep.subr.mxu0 %v2364_v54 }
 0x1c6   : > { %3087 = vmatprep.subr.mxu1 %v2366_v11  ;;  %2975 = vmatpush1.msra.mxu0 %v2363_v22 }
 0x1c7   : > { %3088 = vmatpush1.msra.mxu1 %v2365_v50  ;;  %2976 = vmatprep.subr.mxu0 %v2348_v32 }
 0x1c8   : > { %3089 = vmatprep.subr.mxu1 %v2350_v44  ;;  %2977 = vmatpush1.msra.mxu0 %v2347_v46 }
 0x1c9   : > { %3090 = vmatpush1.msra.mxu1 %v2349_v33  ;;  %2978 = vmatprep.subr.mxu0 %v2332_v12 }
 0x1ca   : > { %3091 = vmatprep.subr.mxu1 %v2334_v2  ;;  %2979 = vmatpush1.msra.mxu0 %v2331_v42 }
 0x1cb   : > { %3092 = vmatpush1.msra.mxu1 %v2333_v43  ;;  %2980 = vmatprep.subr.mxu0 %v2316_v62 }
 0x1cc   : > { %3093 = vmatprep.subr.mxu1 %v2318_v40  ;;  %2981 = vmatpush1.msra.mxu0 %v2315_v18 }
 0x1cd   : > { %3094 = vmatpush1.msra.mxu1 %v2317_v59  ;;  %2982 = vmatprep.subr.mxu0 %v2300_v7 }
 0x1ce   : > { %3095 = vmatprep.subr.mxu1 %v2302_v27  ;;  %2983 = vmatpush1.msra.mxu0 %v2299_v37 }
 0x1cf   : > { %3096 = vmatpush1.msra.mxu1 %v2301_v51  ;;  %4905 = vmatmul.mubr.msk.f32.vlgmr.msra.gmra.mxu0 %vm2475_vm1, %v6565_v1 }
 0x1d0   : > { %4913 = vmatmul.mubr.msk.f32.vlgmr.msra.gmra.mxu1 %vm2475_vm1, %v6565_v1  ;;  %3022 = vmatprep.mubr.f32.mxu0 %v5508_v23 }
 0x1d1   : > { %3135 = vmatprep.mubr.f32.mxu1 %v5508_v23 }
 0x1d3   : > { %4906 = vmatmul.mubr.msk.f32.gmra.mxu0 %vm2475_vm1, %v6576_v52 }
 0x1d4   : > { %4914 = vmatmul.mubr.msk.f32.gmra.mxu1 %vm2475_vm1, %v6576_v52  ;;  %3028 = vmatprep.mubr.f32.mxu0 %v5508_v23 }
 0x1d5   : > { %3141 = vmatprep.mubr.f32.mxu1 %v5508_v23 }
 0x1d7   : > { %4907 = vmatmul.mubr.msk.f32.gmra.mxu0 %vm2475_vm1, %v6587_v34 }
 0x1d8   : > { %4915 = vmatmul.mubr.msk.f32.gmra.mxu1 %vm2475_vm1, %v6587_v34  ;;  %3034 = vmatprep.mubr.f32.mxu0 %v5508_v23 }
 0x1d9   : > { %3147 = vmatprep.mubr.f32.mxu1 %v5508_v23 }
 0x1db   : > { %4908 = vmatmul.mubr.msk.f32.gmra.mxu0 %vm2475_vm1, %v6598_v36 }
 0x1dc   : > { %4916 = vmatmul.mubr.msk.f32.gmra.mxu1 %vm2475_vm1, %v6598_v36  ;;  %v6856_v38 = vpop.f32.mrf.mxu0  ;;  %3040 = vmatprep.mubr.f32.mxu0 %v5508_v23 }
 0x1dd   : > { %v6858_v28 = vpop.f32.mrf.mxu1  ;;  %3153 = vmatprep.mubr.f32.mxu1 %v5508_v23 }
 0x1de   : > { %v6862_v56 = vpop.f32.mrf.mxu0 }
 0x1df   : > { %v6864_v45 = vpop.f32.mrf.mxu1  ;;  %4909 = vmatmul.mubr.msk.f32.gmra.mxu0 %vm2475_vm1, %v6613_v39 }
 0x1e0   : > { %4917 = vmatmul.mubr.msk.f32.gmra.mxu1 %vm2475_vm1, %v6613_v39  ;;  %v6870_v15 = vpop.f32.mrf.mxu0  ;;  %3046 = vmatprep.mubr.f32.mxu0 %v5508_v23 }
 0x1e1   : > { %v6872_v5 = vpop.f32.mrf.mxu1  ;;  %3159 = vmatprep.mubr.f32.mxu1 %v5508_v23 }
 0x1e2   : > { %v6876_v29 = vpop.f32.mrf.mxu0 }
 0x1e3   : > { %v6878_v8 = vpop.f32.mrf.mxu1  ;;  %4910 = vmatmul.mubr.msk.f32.gmra.mxu0 %vm2475_vm1, %v6632_v48 }
 0x1e4   : > { %4918 = vmatmul.mubr.msk.f32.gmra.mxu1 %vm2475_vm1, %v6632_v48  ;;  %v6884_v30 = vpop.f32.mrf.mxu0  ;;  %3052 = vmatprep.mubr.f32.mxu0 %v5508_v23 }
 0x1e5   : > { %v6886_v57 = vpop.f32.mrf.mxu1  ;;  %3165 = vmatprep.mubr.f32.mxu1 %v5508_v23 }
 0x1e6   : > { %v6890_v10 = vpop.f32.mrf.mxu0 }
 0x1e7   : > { %v6892_v26 = vpop.f32.mrf.mxu1  ;;  %4911 = vmatmul.mubr.msk.f32.gmra.mxu0 %vm2475_vm1, %v6651_v25 }
 0x1e8   : > { %4919 = vmatmul.mubr.msk.f32.gmra.mxu1 %vm2475_vm1, %v6651_v25  ;;  %v2149_v53 = vpop.f32.mrf.mxu0  ;;  %3058 = vmatprep.mubr.f32.mxu0 %v5508_v23 }
 0x1e9   : > { %v2262_v31 = vpop.f32.mrf.mxu1  ;;  %3171 = vmatprep.mubr.f32.mxu1 %v5508_v23 }
 0x1ea   : > { %v2151_v4 = vpop.f32.mrf.mxu0 }
 0x1eb   : > { %v2264_v20 = vpop.f32.mrf.mxu1  ;;  %4912 = vmatmul.mubr.msk.f32.gmra.mxu0 %vm2475_vm1, %v6666_v3 }
 0x1ec   : > { %4920 = vmatmul.mubr.msk.f32.gmra.mxu1 %vm2475_vm1, %v6666_v3  ;;  %v2155_v24 = vpop.f32.mrf.mxu0  ;;  %3242 = vmatprep.mubr.f32.mxu0 %v5508_v23 }
 0x1ed   : > { %v2268_v54 = vpop.f32.mrf.mxu1  ;;  %3355 = vmatprep.mubr.f32.mxu1 %v5508_v23 }
 0x1ee   : > { %v2157_v11 = vpop.f32.mrf.mxu0 }
 0x1ef   : > { %v2270_v49 = vpop.f32.mrf.mxu1 }
 0x1f0   : > { %v2161_v21 = vpop.f32.mrf.mxu0 }
 0x1f1   : > { %v2274_v22 = vpop.f32.mrf.mxu1  ;;  %v2162_v27 = vadd.f32 %v2161_v21, %v6482_v9  ;;  %v2265_v21 = vadd.f32 %v2264_v20, %v6520_v41 }
 0x1f2   : > { %v2163_v50 = vpop.f32.mrf.mxu0  ;;  %v2275_v37 = vadd.f32 %v2274_v22, %v6482_v9 }
 0x1f3   : > { %v2276_v13 = vpop.f32.mrf.mxu1  ;;  %v2164_v40 = vadd.f32 %v2163_v50, %v6482_v9  ;;  %v2269_v50 = vadd.f32 %v2268_v54, %v6498_v16 }
 0x1f4   : > { %v2167_v63 = vpop.f32.mrf.mxu0  ;;  %v2277_v18 = vadd.f32 %v2276_v13, %v6482_v9  ;;  %v2152_v9 = vadd.f32 %v2151_v4, %v6520_v41  ;;  %v2259_v4 = vadd.f32 %v6892_v26, %v6522_v47  ;;  %v2253_v26 = vadd.f32 %v6878_v8, %v6542_v17 }
 0x1f5   : > { %v2280_v32 = vpop.f32.mrf.mxu1  ;;  %v2168_v43 = vadd.f32 %v2167_v63, %v6496_v35  ;;  %v2384_v22 = vmax.f32 %v2164_v40, 0.0  ;;  %v2247_v8 = vadd.f32 %v6864_v45, %v6544_v0 }
 0x1f6   : > { %v2169_v44 = vpop.f32.mrf.mxu0  ;;  %v2281_v62 = vadd.f32 %v2280_v32, %v6496_v35 }
 0x1f7   : > { %v2282_v58 = vpop.f32.mrf.mxu1  ;;  %v2170_v2 = vadd.f32 %v2169_v44, %v6496_v35  ;;  %v2399_v13 = vmax.f32 %v2168_v43, 0.0 }
 0x1f8   : > { %v2173_v55 = vpop.f32.mrf.mxu0  ;;  %v2283_v14 = vadd.f32 %v2282_v58, %v6496_v35  ;;  %v2158_v58 = vadd.f32 %v2157_v11, %v6498_v16  ;;  %v2156_v35 = vadd.f32 %v2155_v24, %v6498_v16  ;;  %v2401_v32 = vmax.f32 %v2281_v62, 0.0 }
 0x1f9   : > { %v2286_v46 = vpop.f32.mrf.mxu1  ;;  %v2174_v33 = vadd.f32 %v2173_v55, %v6476_v6  ;;  %v2400_v55 = vmax.f32 %v2170_v2, 0.0  ;;  %v2386_v11 = vmax.f32 %v2277_v18, 0.0  ;;  %v2385_v24 = vmax.f32 %v2275_v37, 0.0 }
 0x1fa   : > { %v2287_v61 = vadd.f32 %v2286_v46, %v6476_v6  ;;  %v2175_v60 = vpop.f32.mrf.mxu0  ;;  %v2402_v63 = vmax.f32 %v2283_v14, 0.0  ;;  %v2263_v46 = vadd.f32 %v2262_v31, %v6520_v41  ;;  %v2368_v54 = vmax.f32 %v2158_v58, 0.0 }
 0x1fb   : > { %v2288_v12 = vpop.f32.mrf.mxu1  ;;  %v2176_v19 = vadd.f32 %v2175_v60, %v6476_v6  ;;  %v2415_v51 = vmax.f32 %v2174_v33, 0.0  ;;  %v2383_v33 = vmax.f32 %v2162_v27, 0.0  ;;  %v2369_v31 = vmax.f32 %v2269_v50, 0.0 }
 0x1fc   : > { %v2289_v42 = vadd.f32 %v2288_v12, %v6476_v6  ;;  %v2417_v44 = vmax.f32 %v2287_v61, 0.0  ;;  %v2271_v6 = vadd.f32 %v2270_v49, %v6498_v16  ;;  %v2150_v49 = vadd.f32 %v2149_v53, %v6520_v41 }
 0x1fd   : > { %v2416_v59 = vmax.f32 %v2176_v19, 0.0  ;;  %v2146_v16 = vadd.f32 %v6890_v10, %v6522_v47  ;;  %v2144_v61 = vadd.f32 %v6884_v30, %v6522_v47  ;;  %v2257_v41 = vadd.f32 %v6886_v57, %v6522_v47 }
 0x1fe   : > { %v2418_v7 = vmax.f32 %v2289_v42, 0.0  ;;  %v2370_v20 = vmax.f32 %v2271_v6, 0.0  ;;  %v2367_v53 = vmax.f32 %v2156_v35, 0.0  ;;  %v2140_v10 = vadd.f32 %v6876_v29, %v6542_v17 }
 0x1ff   : > { %3194 = vmatprep.subr.mxu0 %v2416_v59  ;;  %v2352_v60 = vmax.f32 %v2152_v9, 0.0  ;;  %v2354_v12 = vmax.f32 %v2265_v21, 0.0  ;;  %v2138_v30 = vadd.f32 %v6870_v15, %v6542_v17  ;;  %v2251_v47 = vadd.f32 %v6872_v5, %v6542_v17 }
 0x200   : > { %3307 = vmatprep.subr.mxu1 %v2418_v7  ;;  %3195 = vmatpush1.msra.mxu0 %v2415_v51  ;;  %v2351_v57 = vmax.f32 %v2150_v49, 0.0  ;;  %v2353_v2 = vmax.f32 %v2263_v46, 0.0  ;;  %v2134_v29 = vadd.f32 %v6862_v56, %v6544_v0  ;;  %v2336_v14 = vmax.f32 %v2146_v16, 0.0  ;;  %v7020_v46 = vpop.permute.xlu1 %2467 }
 0x201   : > { %3308 = vmatpush1.msra.mxu1 %v2417_v44  ;;  %3196 = vmatprep.subr.mxu0 %v2400_v55  ;;  %v2338_v19 = vmax.f32 %v2259_v4, 0.0  ;;  %v2132_v15 = vadd.f32 %v6856_v38, %v6544_v0  ;;  %v2245_v17 = vadd.f32 %v6858_v28, %v6544_v0  ;;  %v2335_v5 = vmax.f32 %v2144_v61, 0.0 }
 0x202   : > { %3309 = vmatprep.subr.mxu1 %v2402_v63  ;;  %3197 = vmatpush1.msra.mxu0 %v2399_v13  ;;  %v2337_v42 = vmax.f32 %v2257_v41, 0.0  ;;  %v2320_v43 = vmax.f32 %v2140_v10, 0.0  ;;  %v2322_v62 = vmax.f32 %v2253_v26, 0.0  ;;  %v2319_v56 = vmax.f32 %v2138_v30, 0.0 }
 0x203   : > { %3310 = vmatpush1.msra.mxu1 %v2401_v32  ;;  %3198 = vmatprep.subr.mxu0 %v2384_v22  ;;  %v2321_v45 = vmax.f32 %v2251_v47, 0.0  ;;  %v2304_v40 = vmax.f32 %v2134_v29, 0.0  ;;  %v2306_v18 = vmax.f32 %v2247_v8, 0.0  ;;  %v2303_v38 = vmax.f32 %v2132_v15, 0.0 }
 0x204   : > { %3311 = vmatprep.subr.mxu1 %v2386_v11  ;;  %3199 = vmatpush1.msra.mxu0 %v2383_v33  ;;  %v2305_v59 = vmax.f32 %v2245_v17, 0.0  ;;  %v7016_v11 = vpop.permute.xlu0 %2472  ;;  %v7034_v61 = vpop.permute.xlu1 %2457 }
 0x205   : > { %3312 = vmatpush1.msra.mxu1 %v2385_v24  ;;  %3200 = vmatprep.subr.mxu0 %v2368_v54 }
 0x206   : > { %3313 = vmatprep.subr.mxu1 %v2370_v20  ;;  %3201 = vmatpush1.msra.mxu0 %v2367_v53 }
 0x207   : > { %3314 = vmatpush1.msra.mxu1 %v2369_v31  ;;  %3202 = vmatprep.subr.mxu0 %v2352_v60 }
 0x208   : > { %3315 = vmatprep.subr.mxu1 %v2354_v12  ;;  %3203 = vmatpush1.msra.mxu0 %v2351_v57  ;;  %v7028_v4 = vpop.permute.xlu0 %2462 }
 0x209   : > { %3316 = vmatpush1.msra.mxu1 %v2353_v2  ;;  %3204 = vmatprep.subr.mxu0 %v2336_v14 }
 0x20a   : > { %3317 = vmatprep.subr.mxu1 %v2338_v19  ;;  %3205 = vmatpush1.msra.mxu0 %v2335_v5 }
 0x20b   : > { %3318 = vmatpush1.msra.mxu1 %v2337_v42  ;;  %3206 = vmatprep.subr.mxu0 %v2320_v43 }
 0x20c   : > { %3319 = vmatprep.subr.mxu1 %v2322_v62  ;;  %3207 = vmatpush1.msra.mxu0 %v2319_v56  ;;  %v7048_v8 = vpop.permute.xlu0 %2452  ;;  %v7054_v56 = vpop.permute.xlu1 %2447 }
 0x20d   : > { %3320 = vmatpush1.msra.mxu1 %v2321_v45  ;;  %3208 = vmatprep.subr.mxu0 %v2304_v40 }
 0x20e   : > { %3321 = vmatprep.subr.mxu1 %v2306_v18  ;;  %3209 = vmatpush1.msra.mxu0 %v2303_v38 }
 0x20f   : > { %3322 = vmatpush1.msra.mxu1 %v2305_v59  ;;  %v6950_v0 = vpop.f32.mrf.mxu0  ;;  %4921 = vmatmul.mubr.msk.f32.vlgmr.msra.gmra.mxu0 %vm2475_vm1, %v6565_v1 }
 0x210   : > { %v6952_v28 = vpop.f32.mrf.mxu1  ;;  %4929 = vmatmul.mubr.msk.f32.vlgmr.msra.gmra.mxu1 %vm2475_vm1, %v6565_v1  ;;  %3248 = vmatprep.mubr.f32.mxu0 %v5508_v23 }
 0x211   : > { %3361 = vmatprep.mubr.f32.mxu1 %v5508_v23  ;;  %v6960_v7 = vpop.f32.mrf.mxu0 }
 0x212   : > { %v6962_v27 = vpop.f32.mrf.mxu1 }
 0x213   : > { %v6964_v37 = vpop.f32.mrf.mxu0  ;;  %4922 = vmatmul.mubr.msk.f32.gmra.mxu0 %vm2475_vm1, %v6576_v52 }
 0x214   : > { %v6966_v51 = vpop.f32.mrf.mxu1  ;;  %4930 = vmatmul.mubr.msk.f32.gmra.mxu1 %vm2475_vm1, %v6576_v52  ;;  %3254 = vmatprep.mubr.f32.mxu0 %v5508_v23 }
 0x215   : > { %3367 = vmatprep.mubr.f32.mxu1 %v5508_v23  ;;  %v6974_v1 = vpop.f32.mrf.mxu0 }
 0x216   : > { %v6976_v44 = vpop.f32.mrf.mxu1 }
 0x217   : > { %v6978_v58 = vpop.f32.mrf.mxu0  ;;  %4923 = vmatmul.mubr.msk.f32.gmra.mxu0 %vm2475_vm1, %v6587_v34 }
 0x218   : > { %v6980_v6 = vpop.f32.mrf.mxu1  ;;  %4931 = vmatmul.mubr.msk.f32.gmra.mxu1 %vm2475_vm1, %v6587_v34  ;;  %3260 = vmatprep.mubr.f32.mxu0 %v5508_v23 }
 0x219   : > { %3373 = vmatprep.mubr.f32.mxu1 %v5508_v23  ;;  %v6988_v52 = vpop.f32.mrf.mxu0 }
 0x21a   : > { %v6990_v55 = vpop.f32.mrf.mxu1 }
 0x21b   : > { %v6992_v63 = vpop.f32.mrf.mxu0  ;;  %4924 = vmatmul.mubr.msk.f32.gmra.mxu0 %vm2475_vm1, %v6598_v36 }
 0x21c   : > { %v6994_v35 = vpop.f32.mrf.mxu1  ;;  %4932 = vmatmul.mubr.msk.f32.gmra.mxu1 %vm2475_vm1, %v6598_v36  ;;  %3266 = vmatprep.mubr.f32.mxu0 %v5508_v23 }
 0x21d   : > { %3379 = vmatprep.mubr.f32.mxu1 %v5508_v23  ;;  %v7002_v34 = vpop.f32.mrf.mxu0 }
 0x21e   : > { %v7004_v50 = vpop.f32.mrf.mxu1  ;;  %v2587_v59 = vadd.f32 %v7002_v34, %v7048_v8  ;;  %v2581_v34 = vadd.f32 %v6988_v52, %v7054_v56 }
 0x21f   : > { %v2590_v13 = vpop.f32.mrf.mxu0  ;;  %4925 = vmatmul.mubr.msk.f32.gmra.mxu0 %vm2475_vm1, %v6613_v39 }
 0x220   : > { %v2703_v32 = vpop.f32.mrf.mxu1  ;;  %4933 = vmatmul.mubr.msk.f32.gmra.mxu1 %vm2475_vm1, %v6613_v39  ;;  %3272 = vmatprep.mubr.f32.mxu0 %v5508_v23  ;;  %v2591_v45 = vadd.f32 %v2590_v13, %v7034_v61  ;;  %v2698_v13 = vadd.f32 %v6994_v35, %v7048_v8  ;;  %v2692_v35 = vadd.f32 %v6980_v6, %v7054_v56 }
 0x221   : > { %3385 = vmatprep.mubr.f32.mxu1 %v5508_v23  ;;  %v2592_v36 = vpop.f32.mrf.mxu0  ;;  %v2704_v40 = vadd.f32 %v2703_v32, %v7034_v61 }
 0x222   : > { %v2705_v9 = vpop.f32.mrf.mxu1  ;;  %v2593_v5 = vadd.f32 %v2592_v36, %v7034_v61  ;;  %v2700_v36 = vadd.f32 %v7004_v50, %v7048_v8  ;;  %v2694_v50 = vadd.f32 %v6990_v55, %v7054_v56 }
 0x223   : > { %v2596_v21 = vpop.f32.mrf.mxu0  ;;  %4926 = vmatmul.mubr.msk.f32.gmra.mxu0 %vm2475_vm1, %v6632_v48  ;;  %v2706_v42 = vadd.f32 %v2705_v9, %v7034_v61 }
 0x224   : > { %v2709_v22 = vpop.f32.mrf.mxu1  ;;  %4934 = vmatmul.mubr.msk.f32.gmra.mxu1 %vm2475_vm1, %v6632_v48  ;;  %3278 = vmatprep.mubr.f32.mxu0 %v5508_v23  ;;  %v2597_v14 = vadd.f32 %v2596_v21, %v7028_v4 }
 0x225   : > { %3391 = vmatprep.mubr.f32.mxu1 %v5508_v23  ;;  %v2598_v39 = vpop.f32.mrf.mxu0  ;;  %v2710_v19 = vadd.f32 %v2709_v22, %v7028_v4  ;;  %v2585_v22 = vadd.f32 %v6992_v63, %v7048_v8  ;;  %v2579_v63 = vadd.f32 %v6978_v58, %v7054_v56 }
 0x226   : > { %v2711_v49 = vpop.f32.mrf.mxu1  ;;  %v2599_v47 = vadd.f32 %v2598_v39, %v7028_v4  ;;  %v3484_v32 = vmax.f32 %v2597_v14, 0.0 }
 0x227   : > { %v2602_v33 = vpop.f32.mrf.mxu0  ;;  %4927 = vmatmul.mubr.msk.f32.gmra.mxu0 %vm2475_vm1, %v6651_v25  ;;  %v2712_v57 = vadd.f32 %v2711_v49, %v7028_v4  ;;  %v3486_v39 = vmax.f32 %v2710_v19, 0.0  ;;  %v3469_v49 = vmax.f32 %v2593_v5, 0.0 }
 0x228   : > { %v2715_v24 = vpop.f32.mrf.mxu1  ;;  %4935 = vmatmul.mubr.msk.f32.gmra.mxu1 %vm2475_vm1, %v6651_v25  ;;  %3284 = vmatprep.mubr.f32.mxu0 %v5508_v23  ;;  %v2603_v12 = vadd.f32 %v2602_v33, %v7020_v46  ;;  %v3485_v9 = vmax.f32 %v2599_v47, 0.0  ;;  %v3471_v33 = vmax.f32 %v2706_v42, 0.0 }
 0x229   : > { %3397 = vmatprep.mubr.f32.mxu1 %v5508_v23  ;;  %v2604_v48 = vpop.f32.mrf.mxu0  ;;  %v2716_v30 = vadd.f32 %v2715_v24, %v7020_v46  ;;  %v3487_v21 = vmax.f32 %v2712_v57, 0.0  ;;  %v7070_v24 = vpop.permute.xlu0 %2442 }
 0x22a   : > { %v2717_v16 = vpop.f32.mrf.mxu1  ;;  %v2605_v10 = vadd.f32 %v2604_v48, %v7020_v46  ;;  %v3500_v18 = vmax.f32 %v2603_v12, 0.0  ;;  %v3468_v48 = vmax.f32 %v2591_v45, 0.0  ;;  %v2575_v52 = vadd.f32 %v6974_v1, %v7070_v24 }
 0x22b   : > { %v2608_v54 = vpop.f32.mrf.mxu0  ;;  %4928 = vmatmul.mubr.msk.f32.gmra.mxu0 %vm2475_vm1, %v6666_v3  ;;  %v2718_v26 = vadd.f32 %v2717_v16, %v7020_v46  ;;  %v3502_v38 = vmax.f32 %v2716_v30, 0.0  ;;  %v3470_v16 = vmax.f32 %v2704_v40, 0.0  ;;  %v2688_v55 = vadd.f32 %v6976_v44, %v7070_v24 }
 0x22c   : > { %v2721_v20 = vpop.f32.mrf.mxu1  ;;  %4936 = vmatmul.mubr.msk.f32.gmra.mxu1 %vm2475_vm1, %v6666_v3  ;;  %3610 = vmatprep.mubr.f32.mxu0 %v5508_v23  ;;  %v2609_v25 = vadd.f32 %v2608_v54, %v7016_v11  ;;  %v3501_v43 = vmax.f32 %v2605_v10, 0.0  ;;  %v3453_v54 = vmax.f32 %v2587_v59, 0.0  ;;  %v2573_v58 = vadd.f32 %v6964_v37, %v7070_v24 }
 0x22d   : > { %3681 = vmatprep.mubr.f32.mxu1 %v5508_v23  ;;  %v2722_v41 = vadd.f32 %v2721_v20, %v7016_v11  ;;  %v2610_v53 = vpop.f32.mrf.mxu0  ;;  %v3503_v62 = vmax.f32 %v2718_v26, 0.0  ;;  %v3455_v20 = vmax.f32 %v2700_v36, 0.0  ;;  %v2686_v6 = vadd.f32 %v6966_v51, %v7070_v24 }
 0x22e   : > { %v2723_v31 = vpop.f32.mrf.mxu1  ;;  %v2611_v60 = vadd.f32 %v2610_v53, %v7016_v11  ;;  %v3516_v15 = vmax.f32 %v2609_v25, 0.0  ;;  %v7080_v25 = vpop.permute.xlu1 %2437  ;;  %v3454_v53 = vmax.f32 %v2698_v13, 0.0  ;;  %v3439_v10 = vmax.f32 %v2694_v50, 0.0 }
 0x22f   : > { %v2724_v3 = vadd.f32 %v2723_v31, %v7016_v11  ;;  %v3518_v17 = vmax.f32 %v2722_v41, 0.0  ;;  %v3452_v41 = vmax.f32 %v2585_v22, 0.0  ;;  %v2569_v1 = vadd.f32 %v6960_v7, %v7080_v25 }
 0x230   : > { %v3517_v2 = vmax.f32 %v2611_v60, 0.0  ;;  %v2682_v44 = vadd.f32 %v6962_v27, %v7080_v25  ;;  %v3437_v31 = vmax.f32 %v2581_v34, 0.0  ;;  %v2567_v37 = vadd.f32 %v6950_v0, %v7080_v25 }
 0x231   : > { %v3519_v29 = vmax.f32 %v2724_v3, 0.0  ;;  %v2680_v51 = vadd.f32 %v6952_v28, %v7080_v25  ;;  %v3436_v26 = vmax.f32 %v2579_v63, 0.0  ;;  %v3438_v60 = vmax.f32 %v2692_v35, 0.0  ;;  %v7097_v28 = vld [vmem:[%s7573_s5] sm:$0x1] }
 0x232   : > { %3562 = vmatprep.subr.mxu0 %v3517_v2  ;;  %v3421_v3 = vmax.f32 %v2575_v52, 0.0  ;;  %v3423_v12 = vmax.f32 %v2688_v55, 0.0  ;;  %v3420_v7 = vmax.f32 %v2573_v58, 0.0  ;;  %v3422_v27 = vmax.f32 %v2686_v6, 0.0 }
 0x233   : > { %3633 = vmatprep.subr.mxu1 %v3519_v29  ;;  %3563 = vmatpush1.msra.mxu0 %v3516_v15  ;;  %v3405_v30 = vmax.f32 %v2569_v1, 0.0  ;;  %v3407_v47 = vmax.f32 %v2682_v44, 0.0  ;;  %v3404_v0 = vmax.f32 %v2567_v37, 0.0  ;;  %v3406_v57 = vmax.f32 %v2680_v51, 0.0 }
 0x234   : > { %3634 = vmatpush1.msra.mxu1 %v3518_v17  ;;  %3564 = vmatprep.subr.mxu0 %v3501_v43 }
 0x235   : > { %3635 = vmatprep.subr.mxu1 %v3503_v62  ;;  %3565 = vmatpush1.msra.mxu0 %v3500_v18 }
 0x236   : > { %3636 = vmatpush1.msra.mxu1 %v3502_v38  ;;  %3566 = vmatprep.subr.mxu0 %v3485_v9 }
 0x237   : > { %3637 = vmatprep.subr.mxu1 %v3487_v21  ;;  %3567 = vmatpush1.msra.mxu0 %v3484_v32 }
 0x238   : > { %3638 = vmatpush1.msra.mxu1 %v3486_v39  ;;  %3568 = vmatprep.subr.mxu0 %v3469_v49 }
 0x239   : > { %3639 = vmatprep.subr.mxu1 %v3471_v33  ;;  %3569 = vmatpush1.msra.mxu0 %v3468_v48 }
 0x23a   : > { %3640 = vmatpush1.msra.mxu1 %v3470_v16  ;;  %3570 = vmatprep.subr.mxu0 %v3453_v54 }
 0x23b   : > { %3641 = vmatprep.subr.mxu1 %v3455_v20  ;;  %3571 = vmatpush1.msra.mxu0 %v3452_v41 }
 0x23c   : > { %3642 = vmatpush1.msra.mxu1 %v3454_v53  ;;  %3572 = vmatprep.subr.mxu0 %v3437_v31 }
 0x23d   : > { %3643 = vmatprep.subr.mxu1 %v3439_v10  ;;  %3573 = vmatpush1.msra.mxu0 %v3436_v26 }
 0x23e   : > { %3644 = vmatpush1.msra.mxu1 %v3438_v60  ;;  %3574 = vmatprep.subr.mxu0 %v3421_v3 }
 0x23f   : > { %3645 = vmatprep.subr.mxu1 %v3423_v12  ;;  %3575 = vmatpush1.msra.mxu0 %v3420_v7 }
 0x240   : > { %3646 = vmatpush1.msra.mxu1 %v3422_v27  ;;  %3576 = vmatprep.subr.mxu0 %v3405_v30 }
 0x241   : > { %3647 = vmatprep.subr.mxu1 %v3407_v47  ;;  %3577 = vmatpush1.msra.mxu0 %v3404_v0 }
 0x242   : > { %3648 = vmatpush1.msra.mxu1 %v3406_v57  ;;  %4937 = vmatmul.mubr.msk.f32.vlgmr.msra.gmra.mxu0 %vm2475_vm1, %v7097_v28 }
 0x243   : > { %4938 = vmatmul.mubr.msk.f32.vlgmr.msra.gmra.mxu1 %vm2475_vm1, %v7097_v28  ;;  %3752 = vmatprep.mubr.f32.mxu0 %v5508_v23 }
 0x244   : > { %3823 = vmatprep.mubr.f32.mxu1 %v5508_v23 }
 0x24f   : > { %v7105_v2 = vpop.f32.mrf.mxu0 }
 0x250   : > { %v7107_v29 = vpop.f32.mrf.mxu1 }
 0x251   : > { %v7109_v14 = vpop.f32.mrf.mxu0 }
 0x252   : > { %v7111_v19 = vpop.f32.mrf.mxu1 }
 0x253   : > { %v7113_v15 = vpop.f32.mrf.mxu0 }
 0x254   : > { %v7115_v17 = vpop.f32.mrf.mxu1 }
 0x255   : > { %v7117_v5 = vpop.f32.mrf.mxu0 }
 0x256   : > { %v7119_v42 = vpop.f32.mrf.mxu1 }
 0x257   : > { %v7121_v43 = vpop.f32.mrf.mxu0 }
 0x258   : > { %v7123_v62 = vpop.f32.mrf.mxu1 }
 0x259   : > { %v2806_v45 = vpop.f32.mrf.mxu0 }
 0x25a   : > { %v2919_v40 = vpop.f32.mrf.mxu1 }
 0x25b   : > { %v2810_v18 = vpop.f32.mrf.mxu0 }
 0x25c   : > { %v2923_v38 = vpop.f32.mrf.mxu1 }
 0x25d   : > { %v2812_v59 = vpop.f32.mrf.mxu0 }
 0x25e   : > { %v2925_v36 = vpop.f32.mrf.mxu1 }
 0x25f   : > { %v2816_v9 = vpop.f32.mrf.mxu0 }
 0x260   : > { %v2929_v21 = vpop.f32.mrf.mxu1  ;;  %v2817_v0 = vadd.f32 %v2816_v9, %v7034_v61 }
 0x261   : > { %v2818_v22 = vpop.f32.mrf.mxu0  ;;  %v2930_v57 = vadd.f32 %v2929_v21, %v7034_v61  ;;  %v2807_v21 = vadd.f32 %v2806_v45, %v7054_v56  ;;  %v2914_v45 = vadd.f32 %v7119_v42, %v7070_v24  ;;  %v2908_v42 = vadd.f32 %v7111_v19, %v7080_v25 }
 0x262   : > { %v2931_v13 = vpop.f32.mrf.mxu1  ;;  %v2819_v7 = vadd.f32 %v2818_v22, %v7034_v61 }
 0x263   : > { %v2822_v32 = vpop.f32.mrf.mxu0  ;;  %v2932_v27 = vadd.f32 %v2931_v13, %v7034_v61  ;;  %v2811_v13 = vadd.f32 %v2810_v18, %v7048_v8  ;;  %v2918_v18 = vadd.f32 %v7123_v62, %v7054_v56  ;;  %v2912_v62 = vadd.f32 %v7115_v17, %v7070_v24 }
 0x264   : > { %v2935_v39 = vpop.f32.mrf.mxu1  ;;  %v2823_v26 = vadd.f32 %v2822_v32, %v7028_v4  ;;  %v2813_v32 = vadd.f32 %v2812_v59, %v7048_v8  ;;  %v2906_v17 = vadd.f32 %v7107_v29, %v7080_v25 }
 0x265   : > { %v2824_v34 = vpop.f32.mrf.mxu0  ;;  %v2936_v60 = vadd.f32 %v2935_v39, %v7028_v4  ;;  %v2926_v39 = vadd.f32 %v2925_v36, %v7048_v8  ;;  %v3475_v59 = vmax.f32 %v2932_v27, 0.0  ;;  %v2805_v36 = vadd.f32 %v7121_v43, %v7054_v56 }
 0x266   : > { %v2937_v50 = vpop.f32.mrf.mxu1  ;;  %v2825_v31 = vadd.f32 %v2824_v34, %v7028_v4  ;;  %v2799_v43 = vadd.f32 %v7113_v15, %v7070_v24  ;;  %v2793_v15 = vadd.f32 %v7105_v2, %v7080_v25  ;;  %v3426_v19 = vmax.f32 %v2912_v62, 0.0 }
 0x267   : > { %v2828_v49 = vpop.f32.mrf.mxu0  ;;  %v2938_v10 = vadd.f32 %v2937_v50, %v7028_v4  ;;  %v3490_v9 = vmax.f32 %v2936_v60, 0.0 }
 0x268   : > { %v2941_v33 = vpop.f32.mrf.mxu1  ;;  %v2829_v1 = vadd.f32 %v2828_v49, %v7020_v46  ;;  %v3489_v49 = vmax.f32 %v2825_v31, 0.0  ;;  %v3408_v2 = vmax.f32 %v2793_v15, 0.0 }
 0x269   : > { %v2830_v63 = vpop.f32.mrf.mxu0  ;;  %v2942_v44 = vadd.f32 %v2941_v33, %v7020_v46  ;;  %v3491_v22 = vmax.f32 %v2938_v10, 0.0  ;;  %v2924_v33 = vadd.f32 %v2923_v38, %v7048_v8  ;;  %v3474_v38 = vmax.f32 %v2930_v57, 0.0 }
 0x26a   : > { %v2943_v35 = vpop.f32.mrf.mxu1  ;;  %v2831_v58 = vadd.f32 %v2830_v63, %v7020_v46  ;;  %v3504_v34 = vmax.f32 %v2829_v1, 0.0  ;;  %v3488_v63 = vmax.f32 %v2823_v26, 0.0  ;;  %v3411_v10 = vmax.f32 %v2908_v42, 0.0 }
 0x26b   : > { %v2834_v48 = vpop.f32.mrf.mxu0  ;;  %v2944_v6 = vadd.f32 %v2943_v35, %v7020_v46  ;;  %v3506_v50 = vmax.f32 %v2942_v44, 0.0  ;;  %v2920_v35 = vadd.f32 %v2919_v40, %v7054_v56  ;;  %v3457_v40 = vmax.f32 %v2813_v32, 0.0 }
 0x26c   : > { %v2947_v16 = vpop.f32.mrf.mxu1  ;;  %v2835_v52 = vadd.f32 %v2834_v48, %v7016_v11  ;;  %v3505_v30 = vmax.f32 %v2831_v58, 0.0  ;;  %v3473_v48 = vmax.f32 %v2819_v7, 0.0  ;;  %v3441_v58 = vmax.f32 %v2807_v21, 0.0 }
 0x26d   : > { %v2948_v55 = vadd.f32 %v2947_v16, %v7016_v11  ;;  %v2836_v54 = vpop.f32.mrf.mxu0  ;;  %v3507_v47 = vmax.f32 %v2944_v6, 0.0  ;;  %v3472_v16 = vmax.f32 %v2817_v0, 0.0  ;;  %v3443_v6 = vmax.f32 %v2920_v35, 0.0 }
 0x26e   : > { %v2949_v20 = vpop.f32.mrf.mxu1  ;;  %v2837_v41 = vadd.f32 %v2836_v54, %v7016_v11  ;;  %v3520_v3 = vmax.f32 %v2835_v52, 0.0  ;;  %v2801_v52 = vadd.f32 %v7117_v5, %v7070_v24  ;;  %v3456_v54 = vmax.f32 %v2811_v13, 0.0 }
 0x26f   : > { %v2950_v53 = vadd.f32 %v2949_v20, %v7016_v11  ;;  %v3522_v12 = vmax.f32 %v2948_v55, 0.0  ;;  %v3459_v55 = vmax.f32 %v2926_v39, 0.0  ;;  %v3458_v20 = vmax.f32 %v2924_v33, 0.0 }
 0x270   : > { %v3521_v37 = vmax.f32 %v2837_v41, 0.0  ;;  %v2795_v5 = vadd.f32 %v7109_v14, %v7080_v25  ;;  %v3440_v41 = vmax.f32 %v2805_v36, 0.0  ;;  %v3425_v1 = vmax.f32 %v2801_v52, 0.0 }
 0x271   : > { %v3523_v51 = vmax.f32 %v2950_v53, 0.0  ;;  %v3442_v53 = vmax.f32 %v2918_v18, 0.0  ;;  %v3427_v44 = vmax.f32 %v2914_v45, 0.0  ;;  %v3424_v14 = vmax.f32 %v2799_v43, 0.0 }
 0x272   : > { %3704 = vmatprep.subr.mxu0 %v3521_v37  ;;  %v3409_v31 = vmax.f32 %v2795_v5, 0.0  ;;  %v3410_v37 = vmax.f32 %v2906_v17, 0.0 }
 0x273   : > { %3775 = vmatprep.subr.mxu1 %v3523_v51  ;;  %3705 = vmatpush1.msra.mxu0 %v3520_v3 }
 0x274   : > { %3776 = vmatpush1.msra.mxu1 %v3522_v12  ;;  %3706 = vmatprep.subr.mxu0 %v3505_v30 }
 0x275   : > { %3777 = vmatprep.subr.mxu1 %v3507_v47  ;;  %3707 = vmatpush1.msra.mxu0 %v3504_v34 }
 0x276   : > { %3778 = vmatpush1.msra.mxu1 %v3506_v50  ;;  %3708 = vmatprep.subr.mxu0 %v3489_v49 }
 0x277   : > { %3779 = vmatprep.subr.mxu1 %v3491_v22  ;;  %3709 = vmatpush1.msra.mxu0 %v3488_v63 }
 0x278   : > { %3780 = vmatpush1.msra.mxu1 %v3490_v9  ;;  %3710 = vmatprep.subr.mxu0 %v3473_v48 }
 0x279   : > { %3781 = vmatprep.subr.mxu1 %v3475_v59  ;;  %3711 = vmatpush1.msra.mxu0 %v3472_v16 }
 0x27a   : > { %3782 = vmatpush1.msra.mxu1 %v3474_v38  ;;  %3712 = vmatprep.subr.mxu0 %v3457_v40 }
 0x27b   : > { %3783 = vmatprep.subr.mxu1 %v3459_v55  ;;  %3713 = vmatpush1.msra.mxu0 %v3456_v54 }
 0x27c   : > { %3784 = vmatpush1.msra.mxu1 %v3458_v20  ;;  %3714 = vmatprep.subr.mxu0 %v3441_v58 }
 0x27d   : > { %3785 = vmatprep.subr.mxu1 %v3443_v6  ;;  %3715 = vmatpush1.msra.mxu0 %v3440_v41 }
 0x27e   : > { %3786 = vmatpush1.msra.mxu1 %v3442_v53  ;;  %3716 = vmatprep.subr.mxu0 %v3425_v1 }
 0x27f   : > { %3787 = vmatprep.subr.mxu1 %v3427_v44  ;;  %3717 = vmatpush1.msra.mxu0 %v3424_v14 }
 0x280   : > { %3788 = vmatpush1.msra.mxu1 %v3426_v19  ;;  %3718 = vmatprep.subr.mxu0 %v3409_v31 }
 0x281   : > { %3789 = vmatprep.subr.mxu1 %v3411_v10  ;;  %3719 = vmatpush1.msra.mxu0 %v3408_v2 }
 0x282   : > { %3790 = vmatpush1.msra.mxu1 %v3410_v37  ;;  %4939 = vmatmul.mubr.msk.f32.vlgmr.msra.gmra.mxu0 %vm2475_vm1, %v7097_v28 }
 0x283   : > { %4940 = vmatmul.mubr.msk.f32.vlgmr.msra.gmra.mxu1 %vm2475_vm1, %v7097_v28  ;;  %3894 = vmatprep.mubr.f32.mxu0 %v5508_v23 }
 0x284   : > { %3965 = vmatprep.mubr.f32.mxu1 %v5508_v23 }
 0x28f   : > { %v7173_v29 = vpop.f32.mrf.mxu0 }
 0x290   : > { %v7175_v51 = vpop.f32.mrf.mxu1 }
 0x291   : > { %v7177_v26 = vpop.f32.mrf.mxu0 }
 0x292   : > { %v7179_v60 = vpop.f32.mrf.mxu1 }
 0x293   : > { %v7181_v3 = vpop.f32.mrf.mxu0 }
 0x294   : > { %v7183_v12 = vpop.f32.mrf.mxu1 }
 0x295   : > { %v7185_v7 = vpop.f32.mrf.mxu0 }
 0x296   : > { %v7187_v27 = vpop.f32.mrf.mxu1 }
 0x297   : > { %v7189_v30 = vpop.f32.mrf.mxu0 }
 0x298   : > { %v7191_v47 = vpop.f32.mrf.mxu1 }
 0x299   : > { %v3032_v0 = vpop.f32.mrf.mxu0 }
 0x29a   : > { %v3145_v57 = vpop.f32.mrf.mxu1 }
 0x29b   : > { %v3036_v34 = vpop.f32.mrf.mxu0 }
 0x29c   : > { %v3149_v50 = vpop.f32.mrf.mxu1 }
 0x29d   : > { %v3038_v32 = vpop.f32.mrf.mxu0 }
 0x29e   : > { %v3151_v39 = vpop.f32.mrf.mxu1 }
 0x29f   : > { %v3042_v49 = vpop.f32.mrf.mxu0 }
 0x2a0   : > { %v3155_v22 = vpop.f32.mrf.mxu1  ;;  %v3043_v2 = vadd.f32 %v3042_v49, %v7034_v61 }
 0x2a1   : > { %v3044_v13 = vpop.f32.mrf.mxu0  ;;  %v3156_v37 = vadd.f32 %v3155_v22, %v7034_v61  ;;  %v3033_v22 = vadd.f32 %v3032_v0, %v7054_v56  ;;  %v3140_v0 = vadd.f32 %v7187_v27, %v7070_v24  ;;  %v3134_v27 = vadd.f32 %v7179_v60, %v7080_v25 }
 0x2a2   : > { %v3157_v33 = vpop.f32.mrf.mxu1  ;;  %v3045_v14 = vadd.f32 %v3044_v13, %v7034_v61 }
 0x2a3   : > { %v3048_v63 = vpop.f32.mrf.mxu0  ;;  %v3158_v19 = vadd.f32 %v3157_v33, %v7034_v61  ;;  %v3037_v33 = vadd.f32 %v3036_v34, %v7048_v8  ;;  %v3144_v34 = vadd.f32 %v7191_v47, %v7054_v56  ;;  %v3138_v47 = vadd.f32 %v7183_v12, %v7070_v24 }
 0x2a4   : > { %v3161_v9 = vpop.f32.mrf.mxu1  ;;  %v3049_v41 = vadd.f32 %v3048_v63, %v7028_v4  ;;  %v3039_v63 = vadd.f32 %v3038_v32, %v7048_v8  ;;  %v3132_v12 = vadd.f32 %v7175_v51, %v7080_v25 }
 0x2a5   : > { %v3050_v21 = vpop.f32.mrf.mxu0  ;;  %v3162_v53 = vadd.f32 %v3161_v9, %v7028_v4  ;;  %v3152_v9 = vadd.f32 %v3151_v39, %v7048_v8  ;;  %v3479_v32 = vmax.f32 %v3158_v19, 0.0  ;;  %v3031_v39 = vadd.f32 %v7189_v30, %v7054_v56 }
 0x2a6   : > { %v3163_v35 = vpop.f32.mrf.mxu1  ;;  %v3051_v58 = vadd.f32 %v3050_v21, %v7028_v4  ;;  %v3025_v30 = vadd.f32 %v7181_v3, %v7070_v24  ;;  %v3019_v3 = vadd.f32 %v7173_v29, %v7080_v25  ;;  %v3430_v60 = vmax.f32 %v3138_v47, 0.0 }
 0x2a7   : > { %v3054_v48 = vpop.f32.mrf.mxu0  ;;  %v3164_v6 = vadd.f32 %v3163_v35, %v7028_v4  ;;  %v3494_v49 = vmax.f32 %v3162_v53, 0.0 }
 0x2a8   : > { %v3167_v59 = vpop.f32.mrf.mxu1  ;;  %v3055_v5 = vadd.f32 %v3054_v48, %v7020_v46  ;;  %v3493_v48 = vmax.f32 %v3051_v58, 0.0  ;;  %v3412_v29 = vmax.f32 %v3019_v3, 0.0 }
 0x2a9   : > { %v3056_v36 = vpop.f32.mrf.mxu0  ;;  %v3168_v42 = vadd.f32 %v3167_v59, %v7020_v46  ;;  %v3495_v13 = vmax.f32 %v3164_v6, 0.0  ;;  %v3150_v59 = vadd.f32 %v3149_v50, %v7048_v8  ;;  %v3478_v50 = vmax.f32 %v3156_v37, 0.0 }
 0x2aa   : > { %v3169_v18 = vpop.f32.mrf.mxu1  ;;  %v3057_v43 = vadd.f32 %v3056_v36, %v7020_v46  ;;  %v3508_v21 = vmax.f32 %v3055_v5, 0.0  ;;  %v3492_v36 = vmax.f32 %v3049_v41, 0.0  ;;  %v3415_v6 = vmax.f32 %v3134_v27, 0.0 }
 0x2ab   : > { %v3060_v16 = vpop.f32.mrf.mxu0  ;;  %v3170_v62 = vadd.f32 %v3169_v18, %v7020_v46  ;;  %v3510_v35 = vmax.f32 %v3168_v42, 0.0  ;;  %v3146_v18 = vadd.f32 %v3145_v57, %v7054_v56  ;;  %v3461_v57 = vmax.f32 %v3039_v63, 0.0 }
 0x2ac   : > { %v3173_v38 = vpop.f32.mrf.mxu1  ;;  %v3061_v52 = vadd.f32 %v3060_v16, %v7016_v11  ;;  %v3509_v31 = vmax.f32 %v3057_v43, 0.0  ;;  %v3477_v16 = vmax.f32 %v3045_v14, 0.0  ;;  %v3445_v43 = vmax.f32 %v3033_v22, 0.0 }
 0x2ad   : > { %v3174_v45 = vadd.f32 %v3173_v38, %v7016_v11  ;;  %v3062_v40 = vpop.f32.mrf.mxu0  ;;  %v3511_v10 = vmax.f32 %v3170_v62, 0.0  ;;  %v3476_v38 = vmax.f32 %v3043_v2, 0.0  ;;  %v3447_v62 = vmax.f32 %v3146_v18, 0.0 }
 0x2ae   : > { %v3175_v55 = vpop.f32.mrf.mxu1  ;;  %v3063_v54 = vadd.f32 %v3062_v40, %v7016_v11  ;;  %v3524_v1 = vmax.f32 %v3061_v52, 0.0  ;;  %v3027_v52 = vadd.f32 %v7185_v7, %v7070_v24  ;;  %v3460_v40 = vmax.f32 %v3037_v33, 0.0 }
 0x2af   : > { %v3176_v20 = vadd.f32 %v3175_v55, %v7016_v11  ;;  %v3526_v44 = vmax.f32 %v3174_v45, 0.0  ;;  %v3463_v45 = vmax.f32 %v3152_v9, 0.0  ;;  %v3462_v55 = vmax.f32 %v3150_v59, 0.0 }
 0x2b0   : > { %v3525_v15 = vmax.f32 %v3063_v54, 0.0  ;;  %v3021_v7 = vadd.f32 %v7177_v26, %v7080_v25  ;;  %v3444_v54 = vmax.f32 %v3031_v39, 0.0  ;;  %v3429_v5 = vmax.f32 %v3027_v52, 0.0 }
 0x2b1   : > { %v3527_v17 = vmax.f32 %v3176_v20, 0.0  ;;  %v3446_v20 = vmax.f32 %v3144_v34, 0.0  ;;  %v3431_v42 = vmax.f32 %v3140_v0, 0.0  ;;  %v3428_v26 = vmax.f32 %v3025_v30, 0.0 }
 0x2b2   : > { %3846 = vmatprep.subr.mxu0 %v3525_v15  ;;  %v3413_v58 = vmax.f32 %v3021_v7, 0.0  ;;  %v3414_v15 = vmax.f32 %v3132_v12, 0.0 }
 0x2b3   : > { %3917 = vmatprep.subr.mxu1 %v3527_v17  ;;  %3847 = vmatpush1.msra.mxu0 %v3524_v1 }
 0x2b4   : > { %3918 = vmatpush1.msra.mxu1 %v3526_v44  ;;  %3848 = vmatprep.subr.mxu0 %v3509_v31 }
 0x2b5   : > { %3919 = vmatprep.subr.mxu1 %v3511_v10  ;;  %3849 = vmatpush1.msra.mxu0 %v3508_v21 }
 0x2b6   : > { %3920 = vmatpush1.msra.mxu1 %v3510_v35  ;;  %3850 = vmatprep.subr.mxu0 %v3493_v48 }
 0x2b7   : > { %3921 = vmatprep.subr.mxu1 %v3495_v13  ;;  %3851 = vmatpush1.msra.mxu0 %v3492_v36 }
 0x2b8   : > { %3922 = vmatpush1.msra.mxu1 %v3494_v49  ;;  %3852 = vmatprep.subr.mxu0 %v3477_v16 }
 0x2b9   : > { %3923 = vmatprep.subr.mxu1 %v3479_v32  ;;  %3853 = vmatpush1.msra.mxu0 %v3476_v38 }
 0x2ba   : > { %3924 = vmatpush1.msra.mxu1 %v3478_v50  ;;  %3854 = vmatprep.subr.mxu0 %v3461_v57 }
 0x2bb   : > { %3925 = vmatprep.subr.mxu1 %v3463_v45  ;;  %3855 = vmatpush1.msra.mxu0 %v3460_v40 }
 0x2bc   : > { %3926 = vmatpush1.msra.mxu1 %v3462_v55  ;;  %3856 = vmatprep.subr.mxu0 %v3445_v43 }
 0x2bd   : > { %3927 = vmatprep.subr.mxu1 %v3447_v62  ;;  %3857 = vmatpush1.msra.mxu0 %v3444_v54 }
 0x2be   : > { %3928 = vmatpush1.msra.mxu1 %v3446_v20  ;;  %3858 = vmatprep.subr.mxu0 %v3429_v5 }
 0x2bf   : > { %3929 = vmatprep.subr.mxu1 %v3431_v42  ;;  %3859 = vmatpush1.msra.mxu0 %v3428_v26 }
 0x2c0   : > { %3930 = vmatpush1.msra.mxu1 %v3430_v60  ;;  %3860 = vmatprep.subr.mxu0 %v3413_v58 }
 0x2c1   : > { %3931 = vmatprep.subr.mxu1 %v3415_v6  ;;  %3861 = vmatpush1.msra.mxu0 %v3412_v29 }
 0x2c2   : > { %3932 = vmatpush1.msra.mxu1 %v3414_v15  ;;  %4941 = vmatmul.mubr.msk.f32.vlgmr.msra.gmra.mxu0 %vm2475_vm1, %v7097_v28 }
 0x2c3   : > { %4942 = vmatmul.mubr.msk.f32.vlgmr.msra.gmra.mxu1 %vm2475_vm1, %v7097_v28  ;;  %4036 = vmatprep.mubr.f32.mxu0 %v5508_v23 }
 0x2c4   : > { %4107 = vmatprep.mubr.f32.mxu1 %v5508_v23 }
 0x2cf   : > { %v7241_v51 = vpop.f32.mrf.mxu0 }
 0x2d0   : > { %v7243_v17 = vpop.f32.mrf.mxu1 }
 0x2d1   : > { %v7245_v41 = vpop.f32.mrf.mxu0 }
 0x2d2   : > { %v7247_v53 = vpop.f32.mrf.mxu1 }
 0x2d3   : > { %v7249_v1 = vpop.f32.mrf.mxu0 }
 0x2d4   : > { %v7251_v44 = vpop.f32.mrf.mxu1 }
 0x2d5   : > { %v7253_v14 = vpop.f32.mrf.mxu0 }
 0x2d6   : > { %v7255_v19 = vpop.f32.mrf.mxu1 }
 0x2d7   : > { %v7257_v31 = vpop.f32.mrf.mxu0 }
 0x2d8   : > { %v7259_v10 = vpop.f32.mrf.mxu1 }
 0x2d9   : > { %v3258_v23 = vpop.f32.mrf.mxu0 }
 0x2da   : > { %v3371_v2 = vpop.f32.mrf.mxu1 }
 0x2db   : > { %v3262_v37 = vpop.f32.mrf.mxu0 }
 0x2dc   : > { %v3375_v21 = vpop.f32.mrf.mxu1 }
 0x2dd   : > { %v3264_v35 = vpop.f32.mrf.mxu0 }
 0x2de   : > { %v3377_v63 = vpop.f32.mrf.mxu1 }
 0x2df   : > { %v3268_v9 = vpop.f32.mrf.mxu0  ;;  %v3378_v15 = vadd.f32 %v3377_v63, %v7048_v8  ;;  %v3257_v63 = vadd.f32 %v7257_v31, %v7054_v56  ;;  %v3251_v31 = vadd.f32 %v7249_v1, %v7070_v24  ;;  %v3245_v1 = vadd.f32 %v7241_v51, %v7080_v25 }
 0x2e0   : > { %v3381_v48 = vpop.f32.mrf.mxu1 }
 0x2e1   : > { %v3270_v13 = vpop.f32.mrf.mxu0  ;;  %v3382_v58 = vadd.f32 %v3381_v48, %v7034_v61  ;;  %v3372_v48 = vadd.f32 %v3371_v2, %v7054_v56  ;;  %v3416_v51 = vmax.f32 %v3245_v1, 0.0 }
 0x2e2   : > { %v3383_v33 = vpop.f32.mrf.mxu1  ;;  %v3271_v42 = vadd.f32 %v3270_v13, %v7034_v61 }
 0x2e3   : > { %v3274_v59 = vpop.f32.mrf.mxu0 }
 0x2e4   : > { %v3387_v36 = vpop.f32.mrf.mxu1  ;;  %v3275_v12 = vadd.f32 %v3274_v59, %v7028_v4 }
 0x2e5   : > { %v3276_v49 = vpop.f32.mrf.mxu0  ;;  %v3388_v54 = vadd.f32 %v3387_v36, %v7028_v4  ;;  %v3376_v36 = vadd.f32 %v3375_v21, %v7048_v8  ;;  %v3253_v21 = vadd.f32 %v7253_v14, %v7070_v24  ;;  %v3247_v14 = vadd.f32 %v7245_v41, %v7080_v25 }
 0x2e6   : > { %v3389_v22 = vpop.f32.mrf.mxu1  ;;  %v3277_v27 = vadd.f32 %v3276_v49, %v7028_v4  ;;  %v3496_v49 = vmax.f32 %v3275_v12, 0.0  ;;  %v3432_v41 = vmax.f32 %v3251_v31, 0.0 }
 0x2e7   : > { %v3280_v18 = vpop.f32.mrf.mxu0  ;;  %v3390_v43 = vadd.f32 %v3389_v22, %v7028_v4  ;;  %v3265_v4 = vadd.f32 %v3264_v35, %v7048_v8  ;;  %v3481_v22 = vmax.f32 %v3271_v42, 0.0 }
 0x2e8   : > { %v3393_v16 = vpop.f32.mrf.mxu1  ;;  %v3281_v55 = vadd.f32 %v3280_v18, %v7020_v46  ;;  %v3497_v59 = vmax.f32 %v3277_v27, 0.0 }
 0x2e9   : > { %v3282_v32 = vpop.f32.mrf.mxu0  ;;  %v3394_v7 = vadd.f32 %v3393_v16, %v7020_v46  ;;  %v3499_v13 = vmax.f32 %v3390_v43, 0.0  ;;  %v3465_v2 = vmax.f32 %v3265_v4, 0.0  ;;  %v3467_v16 = vmax.f32 %v3378_v15, 0.0 }
 0x2ea   : > { %v3395_v39 = vpop.f32.mrf.mxu1  ;;  %v3283_v45 = vadd.f32 %v3282_v32, %v7020_v46  ;;  %v3512_v6 = vmax.f32 %v3281_v55, 0.0  ;;  %v3466_v32 = vmax.f32 %v3376_v36, 0.0 }
 0x2eb   : > { %v3286_v34 = vpop.f32.mrf.mxu0  ;;  %v3396_v30 = vadd.f32 %v3395_v39, %v7020_v46  ;;  %v3269_v46 = vadd.f32 %v3268_v9, %v7034_v61  ;;  %v3514_v29 = vmax.f32 %v3394_v7, 0.0  ;;  %v3498_v9 = vmax.f32 %v3388_v54, 0.0 }
 0x2ec   : > { %v3399_v38 = vpop.f32.mrf.mxu1  ;;  %v3287_v50 = vadd.f32 %v3286_v34, %v7016_v11  ;;  %v3513_v26 = vmax.f32 %v3283_v45, 0.0  ;;  %v3451_v34 = vmax.f32 %v3372_v48, 0.0 }
 0x2ed   : > { %v3400_v52 = vadd.f32 %v3399_v38, %v7016_v11  ;;  %v3288_v0 = vpop.f32.mrf.mxu0  ;;  %v3515_v60 = vmax.f32 %v3396_v30, 0.0  ;;  %v3480_v18 = vmax.f32 %v3269_v46, 0.0 }
 0x2ee   : > { %v3401_v57 = vpop.f32.mrf.mxu1  ;;  %v3289_v47 = vadd.f32 %v3288_v0, %v7016_v11  ;;  %v3528_v20 = vmax.f32 %v3287_v50, 0.0  ;;  %v3433_v50 = vmax.f32 %v3253_v21, 0.0  ;;  %v3417_v0 = vmax.f32 %v3247_v14, 0.0 }
 0x2ef   : > { %v3402_v40 = vadd.f32 %v3401_v57, %v7016_v11  ;;  %v3530_v5 = vmax.f32 %v3400_v52, 0.0  ;;  %v3384_v11 = vadd.f32 %v3383_v33, %v7034_v61  ;;  %v3263_v33 = vadd.f32 %v3262_v37, %v7048_v8 }
 0x2f0   : > { %v3529_v62 = vmax.f32 %v3289_v47, 0.0  ;;  %v3259_v61 = vadd.f32 %v3258_v23, %v7054_v56  ;;  %v3370_v37 = vadd.f32 %v7259_v10, %v7054_v56  ;;  %v3482_v8 = vmax.f32 %v3382_v58, 0.0  ;;  %v3537_v47 = vpop.permute.xlu0 %3536 }
 0x2f1   : > { %v3531_v3 = vmax.f32 %v3402_v40, 0.0  ;;  %v3483_v35 = vmax.f32 %v3384_v11, 0.0  ;;  %v3366_v23 = vadd.f32 %v7255_v19, %v7070_v24  ;;  %v3364_v56 = vadd.f32 %v7251_v44, %v7070_v24 }
 0x2f2   : > { %3988 = vmatprep.subr.mxu0 %v3529_v62  ;;  %v3464_v10 = vmax.f32 %v3263_v33, 0.0  ;;  %v3360_v19 = vadd.f32 %v7247_v53, %v7080_v25  ;;  %v3449_v39 = vmax.f32 %v3259_v61, 0.0  ;;  %v3358_v24 = vadd.f32 %v7243_v17, %v7080_v25 }
 0x2f3   : > { %4059 = vmatprep.subr.mxu1 %v3531_v3  ;;  %3989 = vmatpush1.msra.mxu0 %v3528_v20  ;;  %v3448_v44 = vmax.f32 %v3257_v63, 0.0  ;;  %v3450_v38 = vmax.f32 %v3370_v37, 0.0  ;;  %v3435_v52 = vmax.f32 %v3366_v23, 0.0  ;;  %v3434_v53 = vmax.f32 %v3364_v56, 0.0 }
 0x2f4   : > { %4060 = vmatpush1.msra.mxu1 %v3530_v5  ;;  %3990 = vmatprep.subr.mxu0 %v3513_v26  ;;  %v3419_v57 = vmax.f32 %v3360_v19, 0.0  ;;  %v3418_v45 = vmax.f32 %v3358_v24, 0.0  ;;  %v3539_v25 = vlaneseq }
 0x2f5   : > { %4061 = vmatprep.subr.mxu1 %v3515_v60  ;;  %3991 = vmatpush1.msra.mxu0 %v3512_v6 }
 0x2f6   : > { %4062 = vmatpush1.msra.mxu1 %v3514_v29  ;;  %3992 = vmatprep.subr.mxu0 %v3497_v59  ;;  %v7307_v17 = vshrl.u32 %v3539_v25, 7 }
 0x2f7   : > { %4063 = vmatprep.subr.mxu1 %v3499_v13  ;;  %3993 = vmatpush1.msra.mxu0 %v3496_v49 }
 0x2f8   : > { %4064 = vmatpush1.msra.mxu1 %v3498_v9  ;;  %3994 = vmatprep.subr.mxu0 %v3481_v22  ;;  %v3541_v30 = vsub.s32 0, %v7307_v17 }
 0x2f9   : > { %4065 = vmatprep.subr.mxu1 %v3483_v35  ;;  %3995 = vmatpush1.msra.mxu0 %v3480_v18 }
 0x2fa   : > { %4066 = vmatpush1.msra.mxu1 %v3482_v8  ;;  %3996 = vmatprep.subr.mxu0 %v3465_v2  ;;  %v7310_v55 = vrot.slane %v3537_v47, %v3541_v30 }
 0x2fb   : > { %4067 = vmatprep.subr.mxu1 %v3467_v16  ;;  %3997 = vmatpush1.msra.mxu0 %v3464_v10 }
 0x2fc   : > { %4068 = vmatpush1.msra.mxu1 %v3466_v32  ;;  %3998 = vmatprep.subr.mxu0 %v3449_v39 }
 0x2fd   : > { %4069 = vmatprep.subr.mxu1 %v3451_v34  ;;  %3999 = vmatpush1.msra.mxu0 %v3448_v44 }
 0x2fe   : > { %4070 = vmatpush1.msra.mxu1 %v3450_v38  ;;  %4000 = vmatprep.subr.mxu0 %v3433_v50 }
 0x2ff   : > { %4071 = vmatprep.subr.mxu1 %v3435_v52  ;;  %4001 = vmatpush1.msra.mxu0 %v3432_v41 }
 0x300   : > { %4072 = vmatpush1.msra.mxu1 %v3434_v53  ;;  %4002 = vmatprep.subr.mxu0 %v3417_v0 }
 0x301   : > { %4073 = vmatprep.subr.mxu1 %v3419_v57  ;;  %4003 = vmatpush1.msra.mxu0 %v3416_v51 }
 0x302   : > { %4074 = vmatpush1.msra.mxu1 %v3418_v45  ;;  %4943 = vmatmul.mubr.msk.f32.vlgmr.msra.gmra.mxu0 %vm2475_vm1, %v7097_v28  ;;  %v3612_v40 = vpop.f32.mrf.mxu0 }
 0x303   : > { %4944 = vmatmul.mubr.msk.f32.vlgmr.msra.gmra.mxu1 %vm2475_vm1, %v7097_v28  ;;  %v3683_v7 = vpop.f32.mrf.mxu1  ;;  %v7313_v43 = vadd.f32 %v3612_v40, %v7310_v55 }
 0x304   : > { %v3614_v27 = vpop.f32.mrf.mxu0  ;;  %v7316_v62 = vadd.f32 %v3683_v7, %v7310_v55 }
 0x305   : > { %v7319_v3 = vadd.f32 %v3614_v27, %v7310_v55  ;;  %v3685_v28 = vpop.f32.mrf.mxu1  ;;  %v4130_v12 = vmin.f32 %v7313_v43, 20.0  ;;  %vm4114_vm7 = vcmp.gt.f32.partialorder %v7313_v43, 20.0 }
 0x306   : > { %v4132_v54 = vmin.f32 %v7316_v62, 20.0  ;;  %v7324_v20 = vadd.f32 %v3685_v28, %v7310_v55  ;;  %vm4116_vm9 = vcmp.gt.f32.partialorder %v7316_v62, 20.0 }
 0x307   : > { %v4131_v5 = vmin.f32 %v7319_v3, 20.0  ;;  %v4146_v42 = vmul.f32 1.442695, %v4130_v12  ;;  %vm4115_vm4 = vcmp.gt.f32.partialorder %v7319_v3, 20.0 }
 0x308   : > { %v4150_v11 = vmul.f32 1.442695, %v4132_v54  ;;  %v4133_v26 = vmin.f32 %v7324_v20, 20.0  ;;  %vm4117_vm8 = vcmp.gt.f32.partialorder %v7324_v20, 20.0 }
 0x309   : > { %v4148_v60 = vmul.f32 1.442695, %v4131_v5  ;;  %5379 = vpow2.f32 %v4146_v42 }
 0x30a   : > { %5381 = vpow2.f32 %v4150_v11  ;;  %v4152_v46 = vmul.f32 1.442695, %v4133_v26 }
 0x30b   : > { %5383 = vpow2.f32 %v4148_v60 }
 0x30c   : > { %5385 = vpow2.f32 %v4152_v46  ;;  %v5509_v46 = vmov 1966171168  }
 0x316   : > { %v7328_v58 = vpop.eup %5379 }
 0x317   : > { %v7330_v6 = vpop.eup %5381  ;;  %v4178_v4 = vadd.f32 1.0, %v7328_v58  ;;  %v4181_v14 = vmul.f32 -0.5, %v7328_v58  ;;  %v4184_v38 = vand.u32 2147483647, %v7328_v58 }
 0x318   : > { %v5384_v29 = vpop.eup %5383  ;;  %v4196_v13 = vadd.f32 1.0, %v7330_v6  ;;  %v4199_v39 = vmul.f32 -0.5, %v7330_v6  ;;  %v4202_v0 = vand.u32 2147483647, %v7330_v6 }
 0x319   : > { %v7340_v49 = vpop.eup %5385  ;;  %v4187_v9 = vadd.f32 1.0, %v5384_v29  ;;  %5387 = vlog2.f32 %v4178_v4  ;;  %v4190_v56 = vmul.f32 -0.5, %v5384_v29  ;;  %v4193_v50 = vand.u32 2147483647, %v5384_v29 }
 0x31a   : > { %5389 = vlog2.f32 %v4196_v13  ;;  %v4205_v18 = vadd.f32 1.0, %v7340_v49  ;;  %v4208_v34 = vmul.f32 -0.5, %v7340_v49  ;;  %v4182_v53 = vadd.f32 1.0, %v4181_v14 }
 0x31b   : > { %5391 = vlog2.f32 %v4187_v9  ;;  %v4191_v24 = vadd.f32 1.0, %v4190_v56  ;;  %v4200_v25 = vadd.f32 1.0, %v4199_v39  ;;  %v4211_v47 = vand.u32 2147483647, %v7340_v49 }
 0x31c   : > { %v4209_v30 = vadd.f32 1.0, %v4208_v34  ;;  %vm7370_vm2 = vcmp.lt.f32.partialorder %v4193_v50, 0.0004427343  ;;  %v4183_v42 = vmul.f32 %v7328_v58, %v4182_v53  ;;  %vm7378_vm3 = vcmp.lt.f32.partialorder %v4184_v38, 0.0004427343 }
 0x31d   : > { %v4192_v27 = vmul.f32 %v5384_v29, %v4191_v24  ;;  %v4375_v29 = vunpack.c.l.s4 %v5509_v46  ;;  %vm4212_vm5 = vcmp.lt.f32.partialorder %v4211_v47, 0.0004427343  ;;  %vm4203_vm6 = vcmp.lt.f32.partialorder %v4202_v0, 0.0004427343 }
 0x31e   : > { %v4210_v4 = vmul.f32 %v7340_v49, %v4209_v30 }
 0x326   : > { %v5388_v10 = vpop.eup %5387 }
 0x327   : > { %v5390_v32 = vpop.eup %5389  ;;  %v4180_v7 = vmul.f32 0.6931472, %v5388_v10 }
 0x328   : > { %v5392_v19 = vpop.eup %5391  ;;  %v4198_v11 = vmul.f32 0.6931472, %v5390_v32 }
 0x329   : > { %v4189_v57 = vmul.f32 0.6931472, %v5392_v19 }
 0x32b   : > { %v4195_v26 = vsel %vm7370_vm2, %v4192_v27, %v4189_v57 }
 0x32c   : > { %v4323_v58 = vsel %vm4115_vm4, %v7319_v3, %v4195_v26 }
 0x342   : > { %v3754_v15 = vpop.f32.mrf.mxu0 }
 0x343   : > { %v3825_v59 = vpop.f32.mrf.mxu1  ;;  %v7335_v33 = vadd.f32 %v3754_v15, %v7310_v55  ;;  %v4186_v15 = vsel %vm7378_vm3, %v4183_v42, %v4180_v7 }
 0x344   : > { %v7338_v36 = vadd.f32 %v3825_v59, %v7310_v55  ;;  %v3756_v61 = vpop.f32.mrf.mxu0  ;;  %v4201_v59 = vmul.f32 %v7330_v6, %v4200_v25  ;;  %v4339_v6 = vadd.f32 1e-06, %v4323_v58 }
 0x345   : > { %v3827_v48 = vpop.f32.mrf.mxu1  ;;  %v4134_v22 = vmin.f32 %v7335_v33, 20.0  ;;  %v7345_v63 = vadd.f32 %v3756_v61, %v7310_v55  ;;  %vm4118_vm11 = vcmp.gt.f32.partialorder %v7335_v33, 20.0 }
 0x346   : > { %v4136_v35 = vmin.f32 %v7338_v36, 20.0  ;;  %v7348_v37 = vadd.f32 %v3827_v48, %v7310_v55  ;;  %v4204_v61 = vsel %vm4203_vm6, %v4201_v59, %v4198_v11  ;;  %v4322_v48 = vsel %vm4114_vm7, %v7313_v43, %v4186_v15 }
 0x347   : > { %v4154_v8 = vmul.f32 1.442695, %v4134_v22  ;;  %v4135_v23 = vmin.f32 %v7345_v63, 20.0  ;;  %v4376_v22 = vunpack.c.0.s8 %v4375_v29  ;;  %vm4120_vm13 = vcmp.gt.f32.partialorder %v7338_v36, 20.0 }
 0x348   : > { %v4158_v21 = vmul.f32 1.442695, %v4136_v35  ;;  %v4137_v2 = vmin.f32 %v7348_v37, 20.0  ;;  %vm4119_vm15 = vcmp.gt.f32.partialorder %v7345_v63, 20.0  ;;  %vm4121_vm1 = vcmp.gt.f32.partialorder %v7348_v37, 20.0 }
 0x349   : > { %5393 = vpow2.f32 %v4154_v8  ;;  %v4156_v16 = vmul.f32 1.442695, %v4135_v23  ;;  %v4338_v23 = vadd.f32 1e-06, %v4322_v48  ;;  %v7401_v14 = vsub.s32 %v4376_v22, %v7307_v17 }
 0x34a   : > { %5395 = vpow2.f32 %v4158_v21  ;;  %v4160_v31 = vmul.f32 1.442695, %v4137_v2 }
 0x34b   : > { %5397 = vlog2.f32 %v4205_v18  ;;  %v4324_v18 = vsel %vm4116_vm9, %v7316_v62, %v4204_v61  ;;  %v4370_v32 = vcombine.low %v4338_v23, %v4339_v6 }
 0x34c   : > { %5399 = vpow2.f32 %v4156_v16  ;;  %v4340_v10 = vadd.f32 1e-06, %v4324_v18 }
 0x34d   : > { %5401 = vpow2.f32 %v4160_v31 }
 0x356   : > { %v7356_v1 = vpop.eup %5393 }
 0x357   : > { %v7358_v44 = vpop.eup %5395  ;;  %v4214_v52 = vadd.f32 1.0, %v7356_v1  ;;  %v4217_v9 = vmul.f32 -0.5, %v7356_v1  ;;  %v4220_v2 = vand.u32 2147483647, %v7356_v1 }
 0x358   : > { %v5398_v41 = vpop.eup %5397  ;;  %v4232_v51 = vadd.f32 1.0, %v7358_v44  ;;  %v4235_v49 = vmul.f32 -0.5, %v7358_v44  ;;  %v4238_v31 = vand.u32 2147483647, %v7358_v44 }
 0x359   : > { %v7364_v45 = vpop.eup %5399  ;;  %5403 = vlog2.f32 %v4214_v52  ;;  %v4207_v54 = vmul.f32 0.6931472, %v5398_v41  ;;  %v4218_v8 = vadd.f32 1.0, %v4217_v9  ;;  %vm4221_vm10 = vcmp.lt.f32.partialorder %v4220_v2, 0.0004427343 }
 0x35a   : > { %v7367_v40 = vpop.eup %5401  ;;  %5405 = vlog2.f32 %v4232_v51  ;;  %v4223_v28 = vadd.f32 1.0, %v7364_v45  ;;  %v4226_v3 = vmul.f32 -0.5, %v7364_v45  ;;  %v4236_v16 = vadd.f32 1.0, %v4235_v49 }
 0x35b   : > { %v4241_v5 = vadd.f32 1.0, %v7367_v40  ;;  %v4213_v13 = vsel %vm4212_vm5, %v4210_v4, %v4207_v54  ;;  %v4244_v21 = vmul.f32 -0.5, %v7367_v40  ;;  %v4219_v62 = vmul.f32 %v7356_v1, %v4218_v8 }
 0x35c   : > { %5407 = vlog2.f32 %v4223_v28  ;;  %v4325_v35 = vsel %vm4117_vm8, %v7324_v20, %v4213_v13  ;;  %v4227_v20 = vadd.f32 1.0, %v4226_v3  ;;  %v4229_v34 = vand.u32 2147483647, %v7364_v45 }
 0x35d   : > { %5409 = vlog2.f32 %v4241_v5  ;;  %v4341_v43 = vadd.f32 1e-06, %v4325_v35  ;;  %v4245_v24 = vadd.f32 1.0, %v4244_v21  ;;  %v4237_v50 = vmul.f32 %v7358_v44, %v4236_v16 }
 0x35e   : > { %v4247_v52 = vand.u32 2147483647, %v7367_v40  ;;  %vm4239_vm12 = vcmp.lt.f32.partialorder %v4238_v31, 0.0004427343  ;;  %v4228_v51 = vmul.f32 %v7364_v45, %v4227_v20  ;;  %vm4230_vm14 = vcmp.lt.f32.partialorder %v4229_v34, 0.0004427343 }
 0x35f   : > { %v4371_v53 = vcombine.low %v4340_v10, %v4341_v43  ;;  %v4246_v44 = vmul.f32 %v7367_v40, %v4245_v24  ;;  %v4380_v54 = vrot.slane %v4370_v32, %v7401_v14 }
 0x360   : > { %vm4248_vm0 = vcmp.lt.f32.partialorder %v4247_v52, 0.0004427343 }
 0x361   : > { %v4387_v40 = vrot.slane %v4371_v53, %v7401_v14 }
 0x366   : > { %v5404_v56 = vpop.eup %5403 }
 0x367   : > { %v5406_v19 = vpop.eup %5405  ;;  %v4216_v39 = vmul.f32 0.6931472, %v5404_v56 }
 0x368   : > { %v4234_v38 = vmul.f32 0.6931472, %v5406_v19 }
 0x369   : > { %v5408_v41 = vpop.eup %5407  ;;  %v4222_v17 = vsel %vm4221_vm10, %v4219_v62, %v4216_v39 }
 0x36a   : > { %v5410_v0 = vpop.eup %5409  ;;  %v4240_v57 = vsel %vm4239_vm12, %v4237_v50, %v4234_v38  ;;  %v4225_v1 = vmul.f32 0.6931472, %v5408_v41  ;;  %v4326_v25 = vsel %vm4118_vm11, %v7335_v33, %v4222_v17 }
 0x36b   : > { %v4243_v30 = vmul.f32 0.6931472, %v5410_v0  ;;  %v4328_v47 = vsel %vm4120_vm13, %v7338_v36, %v4240_v57  ;;  %v4342_v45 = vadd.f32 1e-06, %v4326_v25 }
 0x36c   : > { %v4231_v7 = vsel %vm4230_vm14, %v4228_v51, %v4225_v1  ;;  %v4344_v36 = vadd.f32 1e-06, %v4328_v47 }
 0x36d   : > { %v4327_v27 = vsel %vm4119_vm15, %v7345_v63, %v4231_v7  ;;  %v4249_v28 = vsel %vm4248_vm0, %v4246_v44, %v4243_v30  ;;  %v4402_v63 = vcombine.low %v4380_v54, %v4387_v40 }
 0x36e   : > { %v4343_v12 = vadd.f32 1e-06, %v4327_v27  ;;  %v4329_v33 = vsel %vm4121_vm1, %v7348_v37, %v4249_v28 }
 0x36f   : > { %v4345_v5 = vadd.f32 1e-06, %v4329_v33  ;;  %v4410_v29 = vrot.slane %v4402_v63, %v7401_v14 }
 0x370   : > { %v4372_v42 = vcombine.low %v4342_v45, %v4343_v12 }
 0x371   : > { %v4373_v11 = vcombine.low %v4344_v36, %v4345_v5 }
 0x372   : > { %v4394_v26 = vrot.slane %v4372_v42, %v7401_v14 }
 0x373   : > { %v4401_v60 = vrot.slane %v4373_v11, %v7401_v14 }
 0x375   : > { %v4403_v46 = vcombine.low %v4394_v26, %v4401_v60 }
 0x377   : > { %v4417_v37 = vrot.slane %v4403_v46, %v7401_v14 }
 0x379   : > { %v4418_v4 = vcombine.low %v4410_v29, %v4417_v37 }
 0x37b   : > { %4470 = vst [vmem:[%s7426_s19] sm:$0xff] %v4418_v4 }
 0x382   : > { %v3896_v15 = vpop.f32.mrf.mxu0 }
 0x383   : > { %v3967_v59 = vpop.f32.mrf.mxu1  ;;  %v7430_v13 = vadd.f32 %v3896_v15, %v7310_v55 }
 0x384   : > { %v3898_v58 = vpop.f32.mrf.mxu0  ;;  %v7433_v9 = vadd.f32 %v3967_v59, %v7310_v55 }
 0x385   : > { %v7436_v61 = vadd.f32 %v3898_v58, %v7310_v55  ;;  %v3969_v49 = vpop.f32.mrf.mxu1  ;;  %v4138_v48 = vmin.f32 %v7430_v13, 20.0  ;;  %vm4122_vm7 = vcmp.gt.f32.partialorder %v7430_v13, 20.0 }
 0x386   : > { %v4140_v22 = vmin.f32 %v7433_v9, 20.0  ;;  %v7441_v6 = vadd.f32 %v3969_v49, %v7310_v55  ;;  %vm4124_vm9 = vcmp.gt.f32.partialorder %v7433_v9, 20.0 }
 0x387   : > { %v4139_v35 = vmin.f32 %v7436_v61, 20.0  ;;  %v4162_v3 = vmul.f32 1.442695, %v4138_v48  ;;  %vm4123_vm4 = vcmp.gt.f32.partialorder %v7436_v61, 20.0 }
 0x388   : > { %v4166_v18 = vmul.f32 1.442695, %v4140_v22  ;;  %v4141_v8 = vmin.f32 %v7441_v6, 20.0  ;;  %vm4125_vm8 = vcmp.gt.f32.partialorder %v7441_v6, 20.0 }
 0x389   : > { %v4164_v21 = vmul.f32 1.442695, %v4139_v35  ;;  %5411 = vpow2.f32 %v4162_v3 }
 0x38a   : > { %5413 = vpow2.f32 %v4166_v18  ;;  %v4168_v23 = vmul.f32 1.442695, %v4141_v8 }
 0x38b   : > { %5415 = vpow2.f32 %v4164_v21 }
 0x38c   : > { %5417 = vpow2.f32 %v4168_v23 }
 0x396   : > { %v7445_v2 = vpop.eup %5411 }
 0x397   : > { %v7447_v16 = vpop.eup %5413  ;;  %v4250_v31 = vadd.f32 1.0, %v7445_v2  ;;  %v4253_v47 = vmul.f32 -0.5, %v7445_v2  ;;  %v4256_v54 = vand.u32 2147483647, %v7445_v2 }
 0x398   : > { %v5416_v43 = vpop.eup %5415  ;;  %v4268_v32 = vadd.f32 1.0, %v7447_v16  ;;  %v4271_v27 = vmul.f32 -0.5, %v7447_v16  ;;  %v4274_v11 = vand.u32 2147483647, %v7447_v16 }
 0x399   : > { %v7457_v39 = vpop.eup %5417  ;;  %v4259_v62 = vadd.f32 1.0, %v5416_v43  ;;  %5419 = vlog2.f32 %v4250_v31  ;;  %v4262_v30 = vmul.f32 -0.5, %v5416_v43  ;;  %v4265_v40 = vand.u32 2147483647, %v5416_v43 }
 0x39a   : > { %5421 = vlog2.f32 %v4268_v32  ;;  %v4277_v53 = vadd.f32 1.0, %v7457_v39  ;;  %v4280_v28 = vmul.f32 -0.5, %v7457_v39  ;;  %v4254_v42 = vadd.f32 1.0, %v4253_v47 }
 0x39b   : > { %5423 = vlog2.f32 %v4259_v62  ;;  %v4263_v12 = vadd.f32 1.0, %v4262_v30  ;;  %v4272_v46 = vadd.f32 1.0, %v4271_v27  ;;  %v4283_v37 = vand.u32 2147483647, %v7457_v39 }
 0x39c   : > { %v4281_v29 = vadd.f32 1.0, %v4280_v28  ;;  %vm7487_vm2 = vcmp.lt.f32.partialorder %v4265_v40, 0.0004427343  ;;  %v4255_v35 = vmul.f32 %v7445_v2, %v4254_v42  ;;  %vm4257_vm3 = vcmp.lt.f32.partialorder %v4256_v54, 0.0004427343 }
 0x39d   : > { %v4264_v59 = vmul.f32 %v5416_v43, %v4263_v12  ;;  %v4273_v23 = vmul.f32 %v7447_v16, %v4272_v46  ;;  %vm4284_vm5 = vcmp.lt.f32.partialorder %v4283_v37, 0.0004427343  ;;  %vm4275_vm6 = vcmp.lt.f32.partialorder %v4274_v11, 0.0004427343 }
 0x39e   : > { %v4282_v8 = vmul.f32 %v7457_v39, %v4281_v29 }
 0x3c2   : > { %v4038_v56 = vpop.f32.mrf.mxu0 }
 0x3c3   : > { %v4109_v10 = vpop.f32.mrf.mxu1  ;;  %v7452_v20 = vadd.f32 %v4038_v56, %v7310_v55 }
 0x3c4   : > { %v7455_v19 = vadd.f32 %v4109_v10, %v7310_v55  ;;  %v4040_v34 = vpop.f32.mrf.mxu0 }
 0x3c5   : > { %v4111_v24 = vpop.f32.mrf.mxu1  ;;  %v4142_v38 = vmin.f32 %v7452_v20, 20.0  ;;  %v7462_v52 = vadd.f32 %v4040_v34, %v7310_v55  ;;  %vm4126_vm11 = vcmp.gt.f32.partialorder %v7452_v20, 20.0 }
 0x3c6   : > { %v4144_v50 = vmin.f32 %v7455_v19, 20.0  ;;  %v7465_v41 = vadd.f32 %v4111_v24, %v7310_v55  ;;  %v5420_v55 = vpop.eup %5419  ;;  %vm4128_vm13 = vcmp.gt.f32.partialorder %v7455_v19, 20.0 }
 0x3c7   : > { %v4170_v17 = vmul.f32 1.442695, %v4142_v38  ;;  %v4143_v57 = vmin.f32 %v7462_v52, 20.0  ;;  %v5422_v44 = vpop.eup %5421  ;;  %v4252_v15 = vmul.f32 0.6931472, %v5420_v55  ;;  %vm4127_vm15 = vcmp.gt.f32.partialorder %v7462_v52, 20.0 }
 0x3c8   : > { %v4174_v0 = vmul.f32 1.442695, %v4144_v50  ;;  %v4145_v1 = vmin.f32 %v7465_v41, 20.0  ;;  %v5424_v7 = vpop.eup %5423  ;;  %v4270_v3 = vmul.f32 0.6931472, %v5422_v44  ;;  %vm4129_vm1 = vcmp.gt.f32.partialorder %v7465_v41, 20.0 }
 0x3c9   : > { %5425 = vpow2.f32 %v4170_v17  ;;  %v4172_v51 = vmul.f32 1.442695, %v4143_v57  ;;  %v4261_v26 = vmul.f32 0.6931472, %v5424_v7  ;;  %v4258_v21 = vsel %vm4257_vm3, %v4255_v35, %v4252_v15 }
 0x3ca   : > { %5427 = vpow2.f32 %v4174_v0  ;;  %v4176_v25 = vmul.f32 1.442695, %v4145_v1  ;;  %v4276_v56 = vsel %vm4275_vm6, %v4273_v23, %v4270_v3  ;;  %v4330_v32 = vsel %vm4122_vm7, %v7430_v13, %v4258_v21 }
 0x3cb   : > { %5429 = vlog2.f32 %v4277_v53  ;;  %v4267_v18 = vsel %vm7487_vm2, %v4264_v59, %v4261_v26  ;;  %v4346_v38 = vadd.f32 1e-06, %v4330_v32 }
 0x3cc   : > { %5431 = vpow2.f32 %v4172_v51  ;;  %v4331_v43 = vsel %vm4123_vm4, %v7436_v61, %v4267_v18  ;;  %v4332_v61 = vsel %vm4124_vm9, %v7433_v9, %v4276_v56 }
 0x3cd   : > { %5433 = vpow2.f32 %v4176_v25  ;;  %v4347_v16 = vadd.f32 1e-06, %v4331_v43  ;;  %v4348_v57 = vadd.f32 1e-06, %v4332_v61 }
 0x3cf   : > { %v4419_v1 = vcombine.low %v4346_v38, %v4347_v16 }
 0x3d1   : > { %v4429_v37 = vrot.slane %v4419_v1, %v7401_v14 }
 0x3d6   : > { %v7473_v45 = vpop.eup %5425 }
 0x3d7   : > { %v7475_v33 = vpop.eup %5427  ;;  %v4286_v36 = vadd.f32 1.0, %v7473_v45  ;;  %v4289_v2 = vmul.f32 -0.5, %v7473_v45  ;;  %v4292_v50 = vand.u32 2147483647, %v7473_v45 }
 0x3d8   : > { %v5430_v5 = vpop.eup %5429  ;;  %v4304_v63 = vadd.f32 1.0, %v7475_v33  ;;  %v4307_v10 = vmul.f32 -0.5, %v7475_v33  ;;  %v4310_v13 = vand.u32 2147483647, %v7475_v33 }
 0x3d9   : > { %v7481_v60 = vpop.eup %5431  ;;  %5435 = vlog2.f32 %v4286_v36  ;;  %v4279_v48 = vmul.f32 0.6931472, %v5430_v5  ;;  %v4290_v34 = vadd.f32 1.0, %v4289_v2  ;;  %vm4293_vm10 = vcmp.lt.f32.partialorder %v4292_v50, 0.0004427343 }
 0x3da   : > { %v7484_v4 = vpop.eup %5433  ;;  %5437 = vlog2.f32 %v4304_v63  ;;  %v4295_v58 = vadd.f32 1.0, %v7481_v60  ;;  %v4298_v62 = vmul.f32 -0.5, %v7481_v60  ;;  %v4308_v53 = vadd.f32 1.0, %v4307_v10 }
 0x3db   : > { %v4313_v22 = vadd.f32 1.0, %v7484_v4  ;;  %v4285_v31 = vsel %vm4284_vm5, %v4282_v8, %v4279_v48  ;;  %v4316_v24 = vmul.f32 -0.5, %v7484_v4  ;;  %v4291_v30 = vmul.f32 %v7473_v45, %v4290_v34 }
 0x3dc   : > { %5439 = vlog2.f32 %v4295_v58  ;;  %v4333_v39 = vsel %vm4125_vm8, %v7441_v6, %v4285_v31  ;;  %v4299_v51 = vadd.f32 1.0, %v4298_v62  ;;  %v4301_v9 = vand.u32 2147483647, %v7481_v60 }
 0x3dd   : > { %5441 = vlog2.f32 %v4313_v22  ;;  %v4349_v17 = vadd.f32 1e-06, %v4333_v39  ;;  %v4317_v55 = vadd.f32 1.0, %v4316_v24  ;;  %v4309_v47 = vmul.f32 %v7475_v33, %v4308_v53 }
 0x3de   : > { %v4319_v7 = vand.u32 2147483647, %v7484_v4  ;;  %vm4311_vm12 = vcmp.lt.f32.partialorder %v4310_v13, 0.0004427343  ;;  %v4300_v36 = vmul.f32 %v7481_v60, %v4299_v51  ;;  %vm4302_vm14 = vcmp.lt.f32.partialorder %v4301_v9, 0.0004427343 }
 0x3df   : > { %v4420_v28 = vcombine.low %v4348_v57, %v4349_v17  ;;  %v4318_v33 = vmul.f32 %v7484_v4, %v4317_v55 }
 0x3e0   : > { %vm4320_vm0 = vcmp.lt.f32.partialorder %v4319_v7, 0.0004427343 }
 0x3e6   : > { %v5436_v0 = vpop.eup %5435 }
 0x3e7   : > { %v5438_v25 = vpop.eup %5437  ;;  %v4288_v6 = vmul.f32 0.6931472, %v5436_v0 }
 0x3e8   : > { %v4306_v44 = vmul.f32 0.6931472, %v5438_v25 }
 0x3e9   : > { %v5440_v27 = vpop.eup %5439  ;;  %v4294_v12 = vsel %vm4293_vm10, %v4291_v30, %v4288_v6 }
 0x3ea   : > { %v5442_v54 = vpop.eup %5441  ;;  %v4312_v40 = vsel %vm4311_vm12, %v4309_v47, %v4306_v44  ;;  %v4297_v45 = vmul.f32 0.6931472, %v5440_v27  ;;  %v4334_v5 = vsel %vm4126_vm11, %v7452_v20, %v4294_v12 }
 0x3eb   : > { %v4315_v42 = vmul.f32 0.6931472, %v5442_v54  ;;  %v4336_v11 = vsel %vm4128_vm13, %v7455_v19, %v4312_v40  ;;  %v4350_v29 = vadd.f32 1e-06, %v4334_v5  ;;  %v4436_v19 = vrot.slane %v4420_v28, %v7401_v14 }
 0x3ec   : > { %v4303_v26 = vsel %vm4302_vm14, %v4300_v36, %v4297_v45  ;;  %v4352_v4 = vadd.f32 1e-06, %v4336_v11 }
 0x3ed   : > { %v4335_v63 = vsel %vm4127_vm15, %v7462_v52, %v4303_v26  ;;  %v4321_v46 = vsel %vm4320_vm0, %v4318_v33, %v4315_v42  ;;  %v4451_v49 = vcombine.low %v4429_v37, %v4436_v19 }
 0x3ee   : > { %v4351_v60 = vadd.f32 1e-06, %v4335_v63  ;;  %v4337_v20 = vsel %vm4129_vm1, %v7465_v41, %v4321_v46 }
 0x3ef   : > { %v4353_v15 = vadd.f32 1e-06, %v4337_v20  ;;  %v4459_v41 = vrot.slane %v4451_v49, %v7401_v14 }
 0x3f0   : > { %v4421_v59 = vcombine.low %v4350_v29, %v4351_v60 }
 0x3f1   : > { %v4422_v52 = vcombine.low %v4352_v4, %v4353_v15 }
 0x3f2   : > { %v4443_v58 = vrot.slane %v4421_v59, %v7401_v14 }
 0x3f3   : > { %v4450_v48 = vrot.slane %v4422_v52, %v7401_v14 }
 0x3f5   : > { %v4452_v22 = vcombine.low %v4443_v58, %v4450_v48 }
 0x3f7   : > { %v4466_v35 = vrot.slane %v4452_v22, %v7401_v14 }
 0x3f9   : > { %v4467_v3 = vcombine.low %v4459_v41, %v4466_v35 }
 0x3fb   : > { %4471 = vst [vmem:[%s7426_s19 + $0x8] sm:$0xff] %v4467_v3 }
 0x3fc   : > { %5458 = shalt.err (!%p5455_p3)
}
 0x3fd   : > { %s5459_s10 = scalar_lea.hbm %s4485_s23, 256  ;;  %s5463_s16 = scalar_lea.hbm %s7575_s7, 512 }
 0x3fe   : > { %p5460_p4 = scmp.ne.s32.totalorder %s4485_s23, %s5459_s10  ;;  %p5464_p9 = scmp.lt.s32.totalorder %s4485_s23, %s7575_s7 }
 0x3ff   : > { %p5465_p10 = scmp.lt.s32.totalorder %s5463_s16, %s5459_s10 }
 0x400   : > { %p5461_p7 = pnand %p5460_p4, %p5589_p5 }
 0x401   : > { %p5466_p11 = por %p5465_p10, %p5464_p9 }
 0x402   : > { %p5462_p8 = pneg %p5461_p7 }
 0x404   : > { %p5467_p12 = pnand %p5466_p11, %p5462_p8 }
 0x406   : > { %5470 = shalt.err (!%p5467_p12)
}
 0x407   : > { %5335 = dma.vmem_to_hbm [thread:$0]  (%p5589_p5), %s4488_s20, 256, %s4485_s23, %s4473_s24  }
 0x408 PF: > { %p5341_p13 = scmp.ge.s32.totalorder %s5505_s29, 2  ;;  %s4499_s19 = sand.u32 1, %s5493_s26  }
 0x409   : > { %s4500_s21 = scalar_lea.sflag [#allocation4], %s4499_s19 }
 0x40a   : > { %p5338_p0 = pnand %p5341_p13, %p5593_p6 }
 0x40c   : > { %p5339_p1 = pneg %p5338_p0 }
 0x40e   : > { %5488 = dma.done.wait (%p5339_p1), %s4500_s21, 256  }
 0x40f   : > { %5490 = vsyncadd (%p5339_p1), %s4500_s21, 4294967040  ;;  %p19_p2 = scmp.ge.s32.totalorder %s5577_s8, 4   ;;  %s7584_s26 = smov %s5497_s27 }
 0x410   : > { %s7585_s27 = smov %s5501_s28  ;;  %s7586_s28 = smov %s5587_s11 }
 0x411   : > { %s7587_s29 = smov %s5577_s8  ;;  %21 = sbr.rel (!%p19_p2) target bundleno = 6 (0x6), region = 83 }
 0x416   :  { %4505 = vsyncpa [#allocation4], 1 }
 0x417   :  { %4507 = vsyncpa [#allocation4 + $0x1], 1 }

</bundles_post_ra>
